<compile_context>
chip_gen: v5e
topology: v5e:2x2
jax: 0.10.0
libtpu: 0.0.40
codegen_flags: <defaults>
</compile_context>

<pallas_src>
import jax
import jax.numpy as jnp
from jax.experimental import pallas as pl
from jax.experimental.pallas import tpu as pltpu


_MIB = 1024 * 1024


def _round_up(x, m):
    return ((x + m - 1) // m) * m


def _vmem_capacity_bytes():
    """Physical VMEM per core; conservative (v7x-sized) fallback on failure."""
    try:
        info = pltpu.get_tpu_info()
        cap = (getattr(info, "vmem_capacity_bytes", None)
               or getattr(info, "vmem_size_bytes", None))
        if cap:
            return int(cap)
    except Exception:
        pass
    return 64 * _MIB


def _choose_tiling(P, L_outer, L_k, N, budget_bytes):
    """VMEM-aware choice of plane chunk Pc (multiple of 8 -> layout-preserving
    reshapes), padded plane count, lane-dense pixel tile (multiple of 128) and
    padded pixel count."""
    p8 = _round_up(max(P, 1), 8)

    # Plane chunk: image chunk (x2 pipeline buffers) <= ~budget/3, capped at 64
    # planes so the matmul intermediate stays a few MiB and the grid keeps
    # enough points to balance across cores.
    img_plane_bytes = L_outer * L_k * 4
    pc_cap = (budget_bytes // 3) // max(1, 2 * img_plane_bytes)
    pc_cap = max(8, min(p8, 64, (pc_cap // 8) * 8))
    pc = 8
    for cand in range(pc_cap, 7, -8):          # prefer a chunk with no plane padding
        if p8 % cand == 0:
            pc = cand
            break
    p_pad = _round_up(p8, pc)

    # Pixel tile: matmul intermediate + weights + coord temps + output blocks
    # <= ~budget/2.  Lane-dense (multiple of 128), capped at 2048, and a single
    # tile for small outputs (no pointless grid steps on 1-TC v5e/v6e).
    per_lane_bytes = 4 * (2 * L_outer * pc            # m1 (+ slack)
                          + (L_k + L_outer + 8)       # weights + coord temps
                          + 4 * pc)                   # out blocks + accumulator
    tile_cap = (budget_bytes // 2) // max(1, per_lane_bytes)
    tile_cap = max(128, (tile_cap // 128) * 128)
    tile_n = min(tile_cap, 2048, _round_up(N, 128))
    n_pad = _round_up(N, tile_n)
    return pc, p_pad, tile_n, n_pad


def _image_block_spec(block_shape, index_map, single_buffer):
    """Image BlockSpec; single-buffered when grid-invariant (VMEM saving)."""
    if single_buffer:
        try:
            return pl.BlockSpec(block_shape, index_map,
                                pipeline_mode=pl.Buffered(1))
        except Exception:          # older jax without pipeline_mode / Buffered(1)
            pass
    return pl.BlockSpec(block_shape, index_map)


# ---------------------------------------------------------------------------
# Pallas kernel: warp one plane chunk for one tile of output pixels.
# ---------------------------------------------------------------------------
def _make_warp_kernel(Pc, L_outer, L_k, Wout, off_h, off_w, tile_n, k_is_x,
                      use_bf16):
    inv_wout = 1.0 / float(Wout)
    wout_f = float(Wout)

    def kernel(params_ref, img_ref, out_ref):
        # params_ref : SMEM (4,) f32              [cos, sin, tx, ty]
        # img_ref    : VMEM (L_outer, Pc, L_k)    plane chunk, MXU K-axis last
        # out_ref    : VMEM (Pc, tile_n)          lane-dense output slab
        c = params_ref[0]
        s = params_ref[1]
        tx = params_ref[2]
        ty = params_ref[3]

        # Flat output-pixel indices of this tile (exact in f32 for < ~2^22 px).
        base = (pl.program_id(1) * tile_n).astype(jnp.float32)
        ii = jax.lax.broadcasted_iota(jnp.int32, (1, tile_n), 1)
        ii = ii.astype(jnp.float32) + base
        row = jnp.floor((ii + 0.5) * inv_wout)        # reciprocal mul, no EUP divide
        col = ii - row * wout_f
        x_o = col + float(off_w)                      # output x (+ fused crop offset)
        y_o = row + float(off_h)                      # output y (+ fused crop offset)

        # Backward-mapped source coordinates (kornia/OpenCV inverse-warp form:
        # src = [c -s; s c] (dst - centre) + centre, folded into tx/ty).
        src_x = c * x_o - s * y_o + tx                # (1, tile_n)
        src_y = s * x_o + c * y_o + ty
        src_k = src_x if k_is_x else src_y            # MXU-contracted source axis
        src_o = src_y if k_is_x else src_x            # VPU-accumulated source axis

        # Tent-formula bilinear weights along the contracted axis, generated
        # transposed (L_k, tile_n); out-of-range taps get weight 0 == zero pad.
        taps_k = jax.lax.broadcasted_iota(jnp.int32, (L_k, tile_n), 0)
        taps_k = taps_k.astype(jnp.float32)
        wk_t = jnp.maximum(0.0, 1.0 - jnp.abs(taps_k - src_k))    # (L_k, tile_n)

        lhs = img_ref[...].reshape(L_outer * Pc, L_k)             # Pc % 8 == 0
        if use_bf16:
            lhs = lhs.astype(jnp.bfloat16)
            wk_t = wk_t.astype(jnp.bfloat16)

        # K contraction on the MXU for the whole plane chunk at once:
        #   (L_outer*Pc, L_k) @ (L_k, tile_n) -> (L_outer*Pc, tile_n)
        m1 = jnp.dot(lhs, wk_t, preferred_element_type=jnp.float32)
        m1 = m1.reshape(L_outer, Pc, tile_n)

        # Second contraction: leading-axis multiply-accumulate (VPU only --
        # no cross-sublane XLU reduce stealing vector-extended slots, and no
        # (L_outer, Pc, tile_n) product temporary).
        if L_outer <= 64:
            acc = jnp.zeros((Pc, tile_n), jnp.float32)
            for h in range(L_outer):                              # unrolled
                w_h = jnp.maximum(0.0, 1.0 - jnp.abs(float(h) - src_o))
                acc = acc + m1[h] * w_h
        else:
            def body(h, a):
                w_h = jnp.maximum(0.0,
                                  1.0 - jnp.abs(h.astype(jnp.float32) - src_o))
                return a + m1[h] * w_h
            acc = jax.lax.fori_loop(0, L_outer, body,
                                    jnp.zeros((Pc, tile_n), jnp.float32))

        out_ref[...] = acc.astype(out_ref.dtype)

    return kernel


# ---------------------------------------------------------------------------
# Rotation (optionally with a fused centre crop) via the Pallas kernel.
# ---------------------------------------------------------------------------
def rotate_pallas(img, angle_deg, out_h, out_w, off_h=0, off_w=0,
                  use_bf16_matmul=False):
    """img: (B, C, Hin, Win) -> (B, C, out_h, out_w), rotated by `angle_deg`
    about the image centre (kornia `rotate`: bilinear, zero padding,
    align_corners=True).  (off_h, off_w) fuse an inverse-transform crop."""
    B, C, Hin, Win = img.shape
    P = B * C
    N = out_h * out_w

    # Put the longer source axis on the MXU contraction (K); the shorter one is
    # handled by the in-kernel VPU accumulate.
    k_is_x = Win >= Hin
    if k_is_x:
        L_outer, L_k = Hin, Win
        img_k = jnp.transpose(img, (2, 0, 1, 3)).reshape(Hin, P, Win)
    else:
        L_outer, L_k = Win, Hin
        img_k = jnp.transpose(img, (3, 0, 1, 2)).reshape(Win, P, Hin)
    img_k = img_k.astype(jnp.float32)

    vmem_cap = _vmem_capacity_bytes()
    budget = max(16 * _MIB, min(vmem_cap // 2, 64 * _MIB))       # working-set target
    vmem_limit = max(32 * _MIB, min((vmem_cap * 3) // 4, 100 * _MIB))

    Pc, P_pad, tile_n, N_pad = _choose_tiling(P, L_outer, L_k, N, budget)
    if P_pad != P:
        img_k = jnp.pad(img_k, ((0, 0), (0, P_pad - P), (0, 0)))

    # Affine params (4 scalars -> SMEM); weights are built in-kernel from them.
    a = jnp.deg2rad(jnp.reshape(angle_deg, ()).astype(jnp.float32))
    c, s = jnp.cos(a), jnp.sin(a)
    cx = (Win - 1) / 2.0
    cy = (Hin - 1) / 2.0
    tx = (1.0 - c) * cx + s * cy
    ty = -s * cx + (1.0 - c) * cy
    params = jnp.stack([c, s, tx, ty]).astype(jnp.float32)

    grid = (P_pad // Pc, N_pad // tile_n)
    single_buffer_img = grid[0] == 1            # image block is grid-invariant

    flops = 2 * N_pad * P_pad * L_outer * L_k + 3 * N_pad * P_pad * L_outer
    bytes_accessed = img_k.size * 4 + P_pad * N_pad * 4 + 16

    out = pl.pallas_call(
        _make_warp_kernel(Pc, L_outer, L_k, out_w, off_h, off_w, tile_n,
                          k_is_x, use_bf16_matmul),
        out_shape=jax.ShapeDtypeStruct((P_pad, N_pad), jnp.float32),
        grid_spec=pltpu.PrefetchScalarGridSpec(
            num_scalar_prefetch=0,
            grid=grid,
            in_specs=[
                pl.BlockSpec(memory_space=pltpu.MemorySpace.SMEM),   # 4 scalars
                _image_block_spec((L_outer, Pc, L_k),
                                  lambda p, i: (0, p, 0),
                                  single_buffer_img),
            ],
            out_specs=pl.BlockSpec((Pc, tile_n), lambda p, i: (p, i)),
        ),
        compiler_params=pltpu.CompilerParams(
            dimension_semantics=("parallel", "parallel"),
            vmem_limit_bytes=int(vmem_limit),
        ),
        cost_estimate=pl.CostEstimate(
            flops=int(flops), transcendentals=0,
            bytes_accessed=int(bytes_accessed)),
    )(params, img_k)

    return out[:P, :N].reshape(B, C, out_h, out_w)


# ---------------------------------------------------------------------------
# LearnableSpatialTransformWrapper forward (impl = identity by default).
# ---------------------------------------------------------------------------
def _transform(x, angle_deg, pad_coef, use_bf16_matmul=False):
    H, W = x.shape[2], x.shape[3]
    pad_h, pad_w = int(H * pad_coef), int(W * pad_coef)
    assert pad_h < H and pad_w < W, "reflect padding requires pad < dim"
    x_padded = jnp.pad(x, ((0, 0), (0, 0), (pad_h, pad_h), (pad_w, pad_w)),
                       mode="reflect")
    Hp, Wp = H + 2 * pad_h, W + 2 * pad_w
    return rotate_pallas(x_padded, angle_deg, out_h=Hp, out_w=Wp,
                         use_bf16_matmul=use_bf16_matmul).astype(x.dtype)


def _inverse_transform(y_padded_rotated, orig_x, angle_deg, pad_coef,
                       use_bf16_matmul=False):
    H, W = orig_x.shape[2], orig_x.shape[3]
    pad_h, pad_w = int(H * pad_coef), int(W * pad_coef)
    # rotate by -angle, then crop [pad_h:H+pad_h, pad_w:W+pad_w]
    # (crop fused into the warp via output-coordinate offsets)
    y = rotate_pallas(y_padded_rotated, -angle_deg, out_h=H, out_w=W,
                      off_h=pad_h, off_w=pad_w,
                      use_bf16_matmul=use_bf16_matmul)
    return y.astype(orig_x.dtype)


def learnable_spatial_transform_forward(x, angle_deg, pad_coef=0.5,
                                        impl=lambda t: t,
                                        use_bf16_matmul=False):
    """Forward of LearnableSpatialTransformWrapper.
    # TODO(synk): `impl` is an arbitrary wrapped nn.Module; identity is used here.
    """
    if isinstance(x, tuple):
        x_trans = tuple(_transform(e, angle_deg, pad_coef, use_bf16_matmul)
                        for e in x)
        y_trans = impl(x_trans)
        return tuple(_inverse_transform(e, o, angle_deg, pad_coef,
                                        use_bf16_matmul)
                     for e, o in zip(y_trans, x))
    x_trans = _transform(x, angle_deg, pad_coef, use_bf16_matmul)
    y_trans = impl(x_trans)
    return _inverse_transform(y_trans, x, angle_deg, pad_coef, use_bf16_matmul)


if __name__ == "__main__":
    key = jax.random.PRNGKey(0)
    k_x, k_angle = jax.random.split(key)

    # x ~ (B=2, C=4, H=16, W=16), NCHW like the PyTorch module
    x = jax.random.normal(k_x, (2, 4, 16, 16), dtype=jnp.float32)
    # self.angle = torch.rand(1) * angle_init_range  (deterministic init here)
    angle = jax.random.uniform(k_angle, (1,), dtype=jnp.float32) * 80.0

    # sanity: with angle = 0 the pad->rotate->rotate->crop pipeline is identity
    y_id = learnable_spatial_transform_forward(x, jnp.zeros((1,), jnp.float32))
    jax.block_until_ready(y_id)
    assert jnp.allclose(y_id, x, atol=1e-5), "identity-angle roundtrip failed"

    # actual forward with the learnable angle
    y = learnable_spatial_transform_forward(x, angle)
    jax.block_until_ready(y)
    assert y.shape == x.shape and y.dtype == x.dtype

    print("KERNEL_OK")
</pallas_src>

<mosaic_0001>
module attributes {stable_mosaic.version = 11 : i64} {
  func.func @kernel(%arg0: i32, %arg1: i32, %arg2: memref<4xf32, #tpu.memory_space<smem>>, %arg3: memref<32x8x32xf32, #tpu.memory_space<vmem>>, %arg4: memref<8x1024xf32, #tpu.memory_space<vmem>>) attributes {dimension_semantics = [#tpu.dimension_semantics<parallel>, #tpu.dimension_semantics<parallel>], iteration_bounds = array<i64: 1, 1>, scalar_prefetch = 0 : i64, scratch_operands = 0 : i64, tpu.core_type = #tpu.core_type<tc>, window_params = [{transform_indices = @transform_0, window_bounds = array<i64: 4>}, {pipeline_mode = #tpu.pipeline_mode<synchronous>, transform_indices = @transform_1, window_bounds = array<i64: 32, 8, 32>}, {transform_indices = @transform_2, window_bounds = array<i64: 8, 1024>}]} {
    %c0 = arith.constant 0 : index
    %0 = memref.load %arg2[%c0] : memref<4xf32, #tpu.memory_space<smem>>
    %c1 = arith.constant 1 : index
    %1 = memref.load %arg2[%c1] : memref<4xf32, #tpu.memory_space<smem>>
    %c2 = arith.constant 2 : index
    %2 = memref.load %arg2[%c2] : memref<4xf32, #tpu.memory_space<smem>>
    %c3 = arith.constant 3 : index
    %3 = memref.load %arg2[%c3] : memref<4xf32, #tpu.memory_space<smem>>
    %c1024_i32 = arith.constant 1024 : i32
    %4 = arith.muli %arg1, %c1024_i32 : i32
    %5 = arith.sitofp %4 : i32 to f32
    %6 = tpu.iota {dimensions = array<i32: 1>} : vector<1x1024xi32>
    %7 = arith.sitofp %6 : vector<1x1024xi32> to vector<1x1024xf32>
    %8 = vector.broadcast %5 : f32 to vector<1x1024xf32>
    %9 = arith.addf %7, %8 : vector<1x1024xf32>
    %cst = arith.constant 5.000000e-01 : f32
    %10 = vector.broadcast %cst : f32 to vector<1x1024xf32>
    %11 = arith.addf %9, %10 : vector<1x1024xf32>
    %cst_0 = arith.constant 3.125000e-02 : f32
    %12 = vector.broadcast %cst_0 : f32 to vector<1x1024xf32>
    %13 = arith.mulf %11, %12 : vector<1x1024xf32>
    %14 = math.floor %13 : vector<1x1024xf32>
    %cst_1 = arith.constant 3.200000e+01 : f32
    %15 = vector.broadcast %cst_1 : f32 to vector<1x1024xf32>
    %16 = arith.mulf %14, %15 : vector<1x1024xf32>
    %17 = arith.subf %9, %16 : vector<1x1024xf32>
    %cst_2 = arith.constant 0.000000e+00 : f32
    %18 = vector.broadcast %cst_2 : f32 to vector<1x1024xf32>
    %19 = arith.addf %17, %18 : vector<1x1024xf32>
    %cst_3 = arith.constant 0.000000e+00 : f32
    %20 = vector.broadcast %cst_3 : f32 to vector<1x1024xf32>
    %21 = arith.addf %14, %20 : vector<1x1024xf32>
    %22 = vector.broadcast %0 : f32 to vector<1x1024xf32>
    %23 = arith.mulf %22, %19 : vector<1x1024xf32>
    %24 = vector.broadcast %1 : f32 to vector<1x1024xf32>
    %25 = arith.mulf %24, %21 : vector<1x1024xf32>
    %26 = arith.subf %23, %25 : vector<1x1024xf32>
    %27 = vector.broadcast %2 : f32 to vector<1x1024xf32>
    %28 = arith.addf %26, %27 : vector<1x1024xf32>
    %29 = vector.broadcast %1 : f32 to vector<1x1024xf32>
    %30 = arith.mulf %29, %19 : vector<1x1024xf32>
    %31 = vector.broadcast %0 : f32 to vector<1x1024xf32>
    %32 = arith.mulf %31, %21 : vector<1x1024xf32>
    %33 = arith.addf %30, %32 : vector<1x1024xf32>
    %34 = vector.broadcast %3 : f32 to vector<1x1024xf32>
    %35 = arith.addf %33, %34 : vector<1x1024xf32>
    %36 = tpu.iota {dimensions = array<i32: 0>} : vector<32x1024xi32>
    %37 = arith.sitofp %36 : vector<32x1024xi32> to vector<32x1024xf32>
    %38 = vector.broadcast %28 : vector<1x1024xf32> to vector<32x1024xf32>
    %39 = arith.subf %37, %38 : vector<32x1024xf32>
    %40 = math.absf %39 : vector<32x1024xf32>
    %cst_4 = arith.constant 1.000000e+00 : f32
    %41 = vector.broadcast %cst_4 : f32 to vector<32x1024xf32>
    %42 = arith.subf %41, %40 : vector<32x1024xf32>
    %cst_5 = arith.constant 0.000000e+00 : f32
    %43 = vector.broadcast %cst_5 : f32 to vector<32x1024xf32>
    %44 = arith.maximumf %43, %42 : vector<32x1024xf32>
    %c0_6 = arith.constant 0 : index
    %c0_7 = arith.constant 0 : index
    %c0_8 = arith.constant 0 : index
    %45 = vector.load %arg3[%c0_6, %c0_7, %c0_8] : memref<32x8x32xf32, #tpu.memory_space<vmem>>, vector<32x8x32xf32>
    %46 = vector.shape_cast %45 : vector<32x8x32xf32> to vector<256x32xf32>
    %cst_9 = arith.constant dense<0.000000e+00> : vector<256x1024xf32>
    %47 = tpu.matmul %46, %44, %cst_9 {dimension_numbers = #tpu.dot_dimension_numbers<[1], [0], [0], [1], [0, 0, 1, 1], [], []>} : vector<256x32xf32>, vector<32x1024xf32>, vector<256x1024xf32> -> vector<256x1024xf32>
    %48 = vector.shape_cast %47 : vector<256x1024xf32> to vector<32x8x1024xf32>
    %cst_10 = arith.constant 0.000000e+00 : f32
    %49 = vector.broadcast %cst_10 : f32 to vector<8x1024xf32>
    %cst_11 = arith.constant 0.000000e+00 : f32
    %50 = vector.broadcast %cst_11 : f32 to vector<1x1024xf32>
    %51 = arith.subf %50, %35 : vector<1x1024xf32>
    %52 = math.absf %51 : vector<1x1024xf32>
    %cst_12 = arith.constant 1.000000e+00 : f32
    %53 = vector.broadcast %cst_12 : f32 to vector<1x1024xf32>
    %54 = arith.subf %53, %52 : vector<1x1024xf32>
    %cst_13 = arith.constant 0.000000e+00 : f32
    %55 = vector.broadcast %cst_13 : f32 to vector<1x1024xf32>
    %56 = arith.maximumf %55, %54 : vector<1x1024xf32>
    %57 = vector.extract_strided_slice %48 {offsets = [0, 0, 0], sizes = [1, 8, 1024], strides = [1, 1, 1]} : vector<32x8x1024xf32> to vector<1x8x1024xf32>
    %58 = vector.shape_cast %57 : vector<1x8x1024xf32> to vector<8x1024xf32>
    %59 = vector.broadcast %56 : vector<1x1024xf32> to vector<8x1024xf32>
    %60 = arith.mulf %58, %59 : vector<8x1024xf32>
    %61 = arith.addf %49, %60 : vector<8x1024xf32>
    %cst_14 = arith.constant 1.000000e+00 : f32
    %62 = vector.broadcast %cst_14 : f32 to vector<1x1024xf32>
    %63 = arith.subf %62, %35 : vector<1x1024xf32>
    %64 = math.absf %63 : vector<1x1024xf32>
    %cst_15 = arith.constant 1.000000e+00 : f32
    %65 = vector.broadcast %cst_15 : f32 to vector<1x1024xf32>
    %66 = arith.subf %65, %64 : vector<1x1024xf32>
    %cst_16 = arith.constant 0.000000e+00 : f32
    %67 = vector.broadcast %cst_16 : f32 to vector<1x1024xf32>
    %68 = arith.maximumf %67, %66 : vector<1x1024xf32>
    %69 = vector.extract_strided_slice %48 {offsets = [1, 0, 0], sizes = [1, 8, 1024], strides = [1, 1, 1]} : vector<32x8x1024xf32> to vector<1x8x1024xf32>
    %70 = vector.shape_cast %69 : vector<1x8x1024xf32> to vector<8x1024xf32>
    %71 = vector.broadcast %68 : vector<1x1024xf32> to vector<8x1024xf32>
    %72 = arith.mulf %70, %71 : vector<8x1024xf32>
    %73 = arith.addf %61, %72 : vector<8x1024xf32>
    %cst_17 = arith.constant 2.000000e+00 : f32
    %74 = vector.broadcast %cst_17 : f32 to vector<1x1024xf32>
    %75 = arith.subf %74, %35 : vector<1x1024xf32>
    %76 = math.absf %75 : vector<1x1024xf32>
    %cst_18 = arith.constant 1.000000e+00 : f32
    %77 = vector.broadcast %cst_18 : f32 to vector<1x1024xf32>
    %78 = arith.subf %77, %76 : vector<1x1024xf32>
    %cst_19 = arith.constant 0.000000e+00 : f32
    %79 = vector.broadcast %cst_19 : f32 to vector<1x1024xf32>
    %80 = arith.maximumf %79, %78 : vector<1x1024xf32>
    %81 = vector.extract_strided_slice %48 {offsets = [2, 0, 0], sizes = [1, 8, 1024], strides = [1, 1, 1]} : vector<32x8x1024xf32> to vector<1x8x1024xf32>
    %82 = vector.shape_cast %81 : vector<1x8x1024xf32> to vector<8x1024xf32>
    %83 = vector.broadcast %80 : vector<1x1024xf32> to vector<8x1024xf32>
    %84 = arith.mulf %82, %83 : vector<8x1024xf32>
    %85 = arith.addf %73, %84 : vector<8x1024xf32>
    %cst_20 = arith.constant 3.000000e+00 : f32
    %86 = vector.broadcast %cst_20 : f32 to vector<1x1024xf32>
    %87 = arith.subf %86, %35 : vector<1x1024xf32>
    %88 = math.absf %87 : vector<1x1024xf32>
    %cst_21 = arith.constant 1.000000e+00 : f32
    %89 = vector.broadcast %cst_21 : f32 to vector<1x1024xf32>
    %90 = arith.subf %89, %88 : vector<1x1024xf32>
    %cst_22 = arith.constant 0.000000e+00 : f32
    %91 = vector.broadcast %cst_22 : f32 to vector<1x1024xf32>
    %92 = arith.maximumf %91, %90 : vector<1x1024xf32>
    %93 = vector.extract_strided_slice %48 {offsets = [3, 0, 0], sizes = [1, 8, 1024], strides = [1, 1, 1]} : vector<32x8x1024xf32> to vector<1x8x1024xf32>
    %94 = vector.shape_cast %93 : vector<1x8x1024xf32> to vector<8x1024xf32>
    %95 = vector.broadcast %92 : vector<1x1024xf32> to vector<8x1024xf32>
    %96 = arith.mulf %94, %95 : vector<8x1024xf32>
    %97 = arith.addf %85, %96 : vector<8x1024xf32>
    %cst_23 = arith.constant 4.000000e+00 : f32
    %98 = vector.broadcast %cst_23 : f32 to vector<1x1024xf32>
    %99 = arith.subf %98, %35 : vector<1x1024xf32>
    %100 = math.absf %99 : vector<1x1024xf32>
    %cst_24 = arith.constant 1.000000e+00 : f32
    %101 = vector.broadcast %cst_24 : f32 to vector<1x1024xf32>
    %102 = arith.subf %101, %100 : vector<1x1024xf32>
    %cst_25 = arith.constant 0.000000e+00 : f32
    %103 = vector.broadcast %cst_25 : f32 to vector<1x1024xf32>
    %104 = arith.maximumf %103, %102 : vector<1x1024xf32>
    %105 = vector.extract_strided_slice %48 {offsets = [4, 0, 0], sizes = [1, 8, 1024], strides = [1, 1, 1]} : vector<32x8x1024xf32> to vector<1x8x1024xf32>
    %106 = vector.shape_cast %105 : vector<1x8x1024xf32> to vector<8x1024xf32>
    %107 = vector.broadcast %104 : vector<1x1024xf32> to vector<8x1024xf32>
    %108 = arith.mulf %106, %107 : vector<8x1024xf32>
    %109 = arith.addf %97, %108 : vector<8x1024xf32>
    %cst_26 = arith.constant 5.000000e+00 : f32
    %110 = vector.broadcast %cst_26 : f32 to vector<1x1024xf32>
    %111 = arith.subf %110, %35 : vector<1x1024xf32>
    %112 = math.absf %111 : vector<1x1024xf32>
    %cst_27 = arith.constant 1.000000e+00 : f32
    %113 = vector.broadcast %cst_27 : f32 to vector<1x1024xf32>
    %114 = arith.subf %113, %112 : vector<1x1024xf32>
    %cst_28 = arith.constant 0.000000e+00 : f32
    %115 = vector.broadcast %cst_28 : f32 to vector<1x1024xf32>
    %116 = arith.maximumf %115, %114 : vector<1x1024xf32>
    %117 = vector.extract_strided_slice %48 {offsets = [5, 0, 0], sizes = [1, 8, 1024], strides = [1, 1, 1]} : vector<32x8x1024xf32> to vector<1x8x1024xf32>
    %118 = vector.shape_cast %117 : vector<1x8x1024xf32> to vector<8x1024xf32>
    %119 = vector.broadcast %116 : vector<1x1024xf32> to vector<8x1024xf32>
    %120 = arith.mulf %118, %119 : vector<8x1024xf32>
    %121 = arith.addf %109, %120 : vector<8x1024xf32>
    %cst_29 = arith.constant 6.000000e+00 : f32
    %122 = vector.broadcast %cst_29 : f32 to vector<1x1024xf32>
    %123 = arith.subf %122, %35 : vector<1x1024xf32>
    %124 = math.absf %123 : vector<1x1024xf32>
    %cst_30 = arith.constant 1.000000e+00 : f32
    %125 = vector.broadcast %cst_30 : f32 to vector<1x1024xf32>
    %126 = arith.subf %125, %124 : vector<1x1024xf32>
    %cst_31 = arith.constant 0.000000e+00 : f32
    %127 = vector.broadcast %cst_31 : f32 to vector<1x1024xf32>
    %128 = arith.maximumf %127, %126 : vector<1x1024xf32>
    %129 = vector.extract_strided_slice %48 {offsets = [6, 0, 0], sizes = [1, 8, 1024], strides = [1, 1, 1]} : vector<32x8x1024xf32> to vector<1x8x1024xf32>
    %130 = vector.shape_cast %129 : vector<1x8x1024xf32> to vector<8x1024xf32>
    %131 = vector.broadcast %128 : vector<1x1024xf32> to vector<8x1024xf32>
    %132 = arith.mulf %130, %131 : vector<8x1024xf32>
    %133 = arith.addf %121, %132 : vector<8x1024xf32>
    %cst_32 = arith.constant 7.000000e+00 : f32
    %134 = vector.broadcast %cst_32 : f32 to vector<1x1024xf32>
    %135 = arith.subf %134, %35 : vector<1x1024xf32>
    %136 = math.absf %135 : vector<1x1024xf32>
    %cst_33 = arith.constant 1.000000e+00 : f32
    %137 = vector.broadcast %cst_33 : f32 to vector<1x1024xf32>
    %138 = arith.subf %137, %136 : vector<1x1024xf32>
    %cst_34 = arith.constant 0.000000e+00 : f32
    %139 = vector.broadcast %cst_34 : f32 to vector<1x1024xf32>
    %140 = arith.maximumf %139, %138 : vector<1x1024xf32>
    %141 = vector.extract_strided_slice %48 {offsets = [7, 0, 0], sizes = [1, 8, 1024], strides = [1, 1, 1]} : vector<32x8x1024xf32> to vector<1x8x1024xf32>
    %142 = vector.shape_cast %141 : vector<1x8x1024xf32> to vector<8x1024xf32>
    %143 = vector.broadcast %140 : vector<1x1024xf32> to vector<8x1024xf32>
    %144 = arith.mulf %142, %143 : vector<8x1024xf32>
    %145 = arith.addf %133, %144 : vector<8x1024xf32>
    %cst_35 = arith.constant 8.000000e+00 : f32
    %146 = vector.broadcast %cst_35 : f32 to vector<1x1024xf32>
    %147 = arith.subf %146, %35 : vector<1x1024xf32>
    %148 = math.absf %147 : vector<1x1024xf32>
    %cst_36 = arith.constant 1.000000e+00 : f32
    %149 = vector.broadcast %cst_36 : f32 to vector<1x1024xf32>
    %150 = arith.subf %149, %148 : vector<1x1024xf32>
    %cst_37 = arith.constant 0.000000e+00 : f32
    %151 = vector.broadcast %cst_37 : f32 to vector<1x1024xf32>
    %152 = arith.maximumf %151, %150 : vector<1x1024xf32>
    %153 = vector.extract_strided_slice %48 {offsets = [8, 0, 0], sizes = [1, 8, 1024], strides = [1, 1, 1]} : vector<32x8x1024xf32> to vector<1x8x1024xf32>
    %154 = vector.shape_cast %153 : vector<1x8x1024xf32> to vector<8x1024xf32>
    %155 = vector.broadcast %152 : vector<1x1024xf32> to vector<8x1024xf32>
    %156 = arith.mulf %154, %155 : vector<8x1024xf32>
    %157 = arith.addf %145, %156 : vector<8x1024xf32>
    %cst_38 = arith.constant 9.000000e+00 : f32
    %158 = vector.broadcast %cst_38 : f32 to vector<1x1024xf32>
    %159 = arith.subf %158, %35 : vector<1x1024xf32>
    %160 = math.absf %159 : vector<1x1024xf32>
    %cst_39 = arith.constant 1.000000e+00 : f32
    %161 = vector.broadcast %cst_39 : f32 to vector<1x1024xf32>
    %162 = arith.subf %161, %160 : vector<1x1024xf32>
    %cst_40 = arith.constant 0.000000e+00 : f32
    %163 = vector.broadcast %cst_40 : f32 to vector<1x1024xf32>
    %164 = arith.maximumf %163, %162 : vector<1x1024xf32>
    %165 = vector.extract_strided_slice %48 {offsets = [9, 0, 0], sizes = [1, 8, 1024], strides = [1, 1, 1]} : vector<32x8x1024xf32> to vector<1x8x1024xf32>
    %166 = vector.shape_cast %165 : vector<1x8x1024xf32> to vector<8x1024xf32>
    %167 = vector.broadcast %164 : vector<1x1024xf32> to vector<8x1024xf32>
    %168 = arith.mulf %166, %167 : vector<8x1024xf32>
    %169 = arith.addf %157, %168 : vector<8x1024xf32>
    %cst_41 = arith.constant 1.000000e+01 : f32
    %170 = vector.broadcast %cst_41 : f32 to vector<1x1024xf32>
    %171 = arith.subf %170, %35 : vector<1x1024xf32>
    %172 = math.absf %171 : vector<1x1024xf32>
    %cst_42 = arith.constant 1.000000e+00 : f32
    %173 = vector.broadcast %cst_42 : f32 to vector<1x1024xf32>
    %174 = arith.subf %173, %172 : vector<1x1024xf32>
    %cst_43 = arith.constant 0.000000e+00 : f32
    %175 = vector.broadcast %cst_43 : f32 to vector<1x1024xf32>
    %176 = arith.maximumf %175, %174 : vector<1x1024xf32>
    %177 = vector.extract_strided_slice %48 {offsets = [10, 0, 0], sizes = [1, 8, 1024], strides = [1, 1, 1]} : vector<32x8x1024xf32> to vector<1x8x1024xf32>
    %178 = vector.shape_cast %177 : vector<1x8x1024xf32> to vector<8x1024xf32>
    %179 = vector.broadcast %176 : vector<1x1024xf32> to vector<8x1024xf32>
    %180 = arith.mulf %178, %179 : vector<8x1024xf32>
    %181 = arith.addf %169, %180 : vector<8x1024xf32>
    %cst_44 = arith.constant 1.100000e+01 : f32
    %182 = vector.broadcast %cst_44 : f32 to vector<1x1024xf32>
    %183 = arith.subf %182, %35 : vector<1x1024xf32>
    %184 = math.absf %183 : vector<1x1024xf32>
    %cst_45 = arith.constant 1.000000e+00 : f32
    %185 = vector.broadcast %cst_45 : f32 to vector<1x1024xf32>
    %186 = arith.subf %185, %184 : vector<1x1024xf32>
    %cst_46 = arith.constant 0.000000e+00 : f32
    %187 = vector.broadcast %cst_46 : f32 to vector<1x1024xf32>
    %188 = arith.maximumf %187, %186 : vector<1x1024xf32>
    %189 = vector.extract_strided_slice %48 {offsets = [11, 0, 0], sizes = [1, 8, 1024], strides = [1, 1, 1]} : vector<32x8x1024xf32> to vector<1x8x1024xf32>
    %190 = vector.shape_cast %189 : vector<1x8x1024xf32> to vector<8x1024xf32>
    %191 = vector.broadcast %188 : vector<1x1024xf32> to vector<8x1024xf32>
    %192 = arith.mulf %190, %191 : vector<8x1024xf32>
    %193 = arith.addf %181, %192 : vector<8x1024xf32>
    %cst_47 = arith.constant 1.200000e+01 : f32
    %194 = vector.broadcast %cst_47 : f32 to vector<1x1024xf32>
    %195 = arith.subf %194, %35 : vector<1x1024xf32>
    %196 = math.absf %195 : vector<1x1024xf32>
    %cst_48 = arith.constant 1.000000e+00 : f32
    %197 = vector.broadcast %cst_48 : f32 to vector<1x1024xf32>
    %198 = arith.subf %197, %196 : vector<1x1024xf32>
    %cst_49 = arith.constant 0.000000e+00 : f32
    %199 = vector.broadcast %cst_49 : f32 to vector<1x1024xf32>
    %200 = arith.maximumf %199, %198 : vector<1x1024xf32>
    %201 = vector.extract_strided_slice %48 {offsets = [12, 0, 0], sizes = [1, 8, 1024], strides = [1, 1, 1]} : vector<32x8x1024xf32> to vector<1x8x1024xf32>
    %202 = vector.shape_cast %201 : vector<1x8x1024xf32> to vector<8x1024xf32>
    %203 = vector.broadcast %200 : vector<1x1024xf32> to vector<8x1024xf32>
    %204 = arith.mulf %202, %203 : vector<8x1024xf32>
    %205 = arith.addf %193, %204 : vector<8x1024xf32>
    %cst_50 = arith.constant 1.300000e+01 : f32
    %206 = vector.broadcast %cst_50 : f32 to vector<1x1024xf32>
    %207 = arith.subf %206, %35 : vector<1x1024xf32>
    %208 = math.absf %207 : vector<1x1024xf32>
    %cst_51 = arith.constant 1.000000e+00 : f32
    %209 = vector.broadcast %cst_51 : f32 to vector<1x1024xf32>
    %210 = arith.subf %209, %208 : vector<1x1024xf32>
    %cst_52 = arith.constant 0.000000e+00 : f32
    %211 = vector.broadcast %cst_52 : f32 to vector<1x1024xf32>
    %212 = arith.maximumf %211, %210 : vector<1x1024xf32>
    %213 = vector.extract_strided_slice %48 {offsets = [13, 0, 0], sizes = [1, 8, 1024], strides = [1, 1, 1]} : vector<32x8x1024xf32> to vector<1x8x1024xf32>
    %214 = vector.shape_cast %213 : vector<1x8x1024xf32> to vector<8x1024xf32>
    %215 = vector.broadcast %212 : vector<1x1024xf32> to vector<8x1024xf32>
    %216 = arith.mulf %214, %215 : vector<8x1024xf32>
    %217 = arith.addf %205, %216 : vector<8x1024xf32>
    %cst_53 = arith.constant 1.400000e+01 : f32
    %218 = vector.broadcast %cst_53 : f32 to vector<1x1024xf32>
    %219 = arith.subf %218, %35 : vector<1x1024xf32>
    %220 = math.absf %219 : vector<1x1024xf32>
    %cst_54 = arith.constant 1.000000e+00 : f32
    %221 = vector.broadcast %cst_54 : f32 to vector<1x1024xf32>
    %222 = arith.subf %221, %220 : vector<1x1024xf32>
    %cst_55 = arith.constant 0.000000e+00 : f32
    %223 = vector.broadcast %cst_55 : f32 to vector<1x1024xf32>
    %224 = arith.maximumf %223, %222 : vector<1x1024xf32>
    %225 = vector.extract_strided_slice %48 {offsets = [14, 0, 0], sizes = [1, 8, 1024], strides = [1, 1, 1]} : vector<32x8x1024xf32> to vector<1x8x1024xf32>
    %226 = vector.shape_cast %225 : vector<1x8x1024xf32> to vector<8x1024xf32>
    %227 = vector.broadcast %224 : vector<1x1024xf32> to vector<8x1024xf32>
    %228 = arith.mulf %226, %227 : vector<8x1024xf32>
    %229 = arith.addf %217, %228 : vector<8x1024xf32>
    %cst_56 = arith.constant 1.500000e+01 : f32
    %230 = vector.broadcast %cst_56 : f32 to vector<1x1024xf32>
    %231 = arith.subf %230, %35 : vector<1x1024xf32>
    %232 = math.absf %231 : vector<1x1024xf32>
    %cst_57 = arith.constant 1.000000e+00 : f32
    %233 = vector.broadcast %cst_57 : f32 to vector<1x1024xf32>
    %234 = arith.subf %233, %232 : vector<1x1024xf32>
    %cst_58 = arith.constant 0.000000e+00 : f32
    %235 = vector.broadcast %cst_58 : f32 to vector<1x1024xf32>
    %236 = arith.maximumf %235, %234 : vector<1x1024xf32>
    %237 = vector.extract_strided_slice %48 {offsets = [15, 0, 0], sizes = [1, 8, 1024], strides = [1, 1, 1]} : vector<32x8x1024xf32> to vector<1x8x1024xf32>
    %238 = vector.shape_cast %237 : vector<1x8x1024xf32> to vector<8x1024xf32>
    %239 = vector.broadcast %236 : vector<1x1024xf32> to vector<8x1024xf32>
    %240 = arith.mulf %238, %239 : vector<8x1024xf32>
    %241 = arith.addf %229, %240 : vector<8x1024xf32>
    %cst_59 = arith.constant 1.600000e+01 : f32
    %242 = vector.broadcast %cst_59 : f32 to vector<1x1024xf32>
    %243 = arith.subf %242, %35 : vector<1x1024xf32>
    %244 = math.absf %243 : vector<1x1024xf32>
    %cst_60 = arith.constant 1.000000e+00 : f32
    %245 = vector.broadcast %cst_60 : f32 to vector<1x1024xf32>
    %246 = arith.subf %245, %244 : vector<1x1024xf32>
    %cst_61 = arith.constant 0.000000e+00 : f32
    %247 = vector.broadcast %cst_61 : f32 to vector<1x1024xf32>
    %248 = arith.maximumf %247, %246 : vector<1x1024xf32>
    %249 = vector.extract_strided_slice %48 {offsets = [16, 0, 0], sizes = [1, 8, 1024], strides = [1, 1, 1]} : vector<32x8x1024xf32> to vector<1x8x1024xf32>
    %250 = vector.shape_cast %249 : vector<1x8x1024xf32> to vector<8x1024xf32>
    %251 = vector.broadcast %248 : vector<1x1024xf32> to vector<8x1024xf32>
    %252 = arith.mulf %250, %251 : vector<8x1024xf32>
    %253 = arith.addf %241, %252 : vector<8x1024xf32>
    %cst_62 = arith.constant 1.700000e+01 : f32
    %254 = vector.broadcast %cst_62 : f32 to vector<1x1024xf32>
    %255 = arith.subf %254, %35 : vector<1x1024xf32>
    %256 = math.absf %255 : vector<1x1024xf32>
    %cst_63 = arith.constant 1.000000e+00 : f32
    %257 = vector.broadcast %cst_63 : f32 to vector<1x1024xf32>
    %258 = arith.subf %257, %256 : vector<1x1024xf32>
    %cst_64 = arith.constant 0.000000e+00 : f32
    %259 = vector.broadcast %cst_64 : f32 to vector<1x1024xf32>
    %260 = arith.maximumf %259, %258 : vector<1x1024xf32>
    %261 = vector.extract_strided_slice %48 {offsets = [17, 0, 0], sizes = [1, 8, 1024], strides = [1, 1, 1]} : vector<32x8x1024xf32> to vector<1x8x1024xf32>
    %262 = vector.shape_cast %261 : vector<1x8x1024xf32> to vector<8x1024xf32>
    %263 = vector.broadcast %260 : vector<1x1024xf32> to vector<8x1024xf32>
    %264 = arith.mulf %262, %263 : vector<8x1024xf32>
    %265 = arith.addf %253, %264 : vector<8x1024xf32>
    %cst_65 = arith.constant 1.800000e+01 : f32
    %266 = vector.broadcast %cst_65 : f32 to vector<1x1024xf32>
    %267 = arith.subf %266, %35 : vector<1x1024xf32>
    %268 = math.absf %267 : vector<1x1024xf32>
    %cst_66 = arith.constant 1.000000e+00 : f32
    %269 = vector.broadcast %cst_66 : f32 to vector<1x1024xf32>
    %270 = arith.subf %269, %268 : vector<1x1024xf32>
    %cst_67 = arith.constant 0.000000e+00 : f32
    %271 = vector.broadcast %cst_67 : f32 to vector<1x1024xf32>
    %272 = arith.maximumf %271, %270 : vector<1x1024xf32>
    %273 = vector.extract_strided_slice %48 {offsets = [18, 0, 0], sizes = [1, 8, 1024], strides = [1, 1, 1]} : vector<32x8x1024xf32> to vector<1x8x1024xf32>
    %274 = vector.shape_cast %273 : vector<1x8x1024xf32> to vector<8x1024xf32>
    %275 = vector.broadcast %272 : vector<1x1024xf32> to vector<8x1024xf32>
    %276 = arith.mulf %274, %275 : vector<8x1024xf32>
    %277 = arith.addf %265, %276 : vector<8x1024xf32>
    %cst_68 = arith.constant 1.900000e+01 : f32
    %278 = vector.broadcast %cst_68 : f32 to vector<1x1024xf32>
    %279 = arith.subf %278, %35 : vector<1x1024xf32>
    %280 = math.absf %279 : vector<1x1024xf32>
    %cst_69 = arith.constant 1.000000e+00 : f32
    %281 = vector.broadcast %cst_69 : f32 to vector<1x1024xf32>
    %282 = arith.subf %281, %280 : vector<1x1024xf32>
    %cst_70 = arith.constant 0.000000e+00 : f32
    %283 = vector.broadcast %cst_70 : f32 to vector<1x1024xf32>
    %284 = arith.maximumf %283, %282 : vector<1x1024xf32>
    %285 = vector.extract_strided_slice %48 {offsets = [19, 0, 0], sizes = [1, 8, 1024], strides = [1, 1, 1]} : vector<32x8x1024xf32> to vector<1x8x1024xf32>
    %286 = vector.shape_cast %285 : vector<1x8x1024xf32> to vector<8x1024xf32>
    %287 = vector.broadcast %284 : vector<1x1024xf32> to vector<8x1024xf32>
    %288 = arith.mulf %286, %287 : vector<8x1024xf32>
    %289 = arith.addf %277, %288 : vector<8x1024xf32>
    %cst_71 = arith.constant 2.000000e+01 : f32
    %290 = vector.broadcast %cst_71 : f32 to vector<1x1024xf32>
    %291 = arith.subf %290, %35 : vector<1x1024xf32>
    %292 = math.absf %291 : vector<1x1024xf32>
    %cst_72 = arith.constant 1.000000e+00 : f32
    %293 = vector.broadcast %cst_72 : f32 to vector<1x1024xf32>
    %294 = arith.subf %293, %292 : vector<1x1024xf32>
    %cst_73 = arith.constant 0.000000e+00 : f32
    %295 = vector.broadcast %cst_73 : f32 to vector<1x1024xf32>
    %296 = arith.maximumf %295, %294 : vector<1x1024xf32>
    %297 = vector.extract_strided_slice %48 {offsets = [20, 0, 0], sizes = [1, 8, 1024], strides = [1, 1, 1]} : vector<32x8x1024xf32> to vector<1x8x1024xf32>
    %298 = vector.shape_cast %297 : vector<1x8x1024xf32> to vector<8x1024xf32>
    %299 = vector.broadcast %296 : vector<1x1024xf32> to vector<8x1024xf32>
    %300 = arith.mulf %298, %299 : vector<8x1024xf32>
    %301 = arith.addf %289, %300 : vector<8x1024xf32>
    %cst_74 = arith.constant 2.100000e+01 : f32
    %302 = vector.broadcast %cst_74 : f32 to vector<1x1024xf32>
    %303 = arith.subf %302, %35 : vector<1x1024xf32>
    %304 = math.absf %303 : vector<1x1024xf32>
    %cst_75 = arith.constant 1.000000e+00 : f32
    %305 = vector.broadcast %cst_75 : f32 to vector<1x1024xf32>
    %306 = arith.subf %305, %304 : vector<1x1024xf32>
    %cst_76 = arith.constant 0.000000e+00 : f32
    %307 = vector.broadcast %cst_76 : f32 to vector<1x1024xf32>
    %308 = arith.maximumf %307, %306 : vector<1x1024xf32>
    %309 = vector.extract_strided_slice %48 {offsets = [21, 0, 0], sizes = [1, 8, 1024], strides = [1, 1, 1]} : vector<32x8x1024xf32> to vector<1x8x1024xf32>
    %310 = vector.shape_cast %309 : vector<1x8x1024xf32> to vector<8x1024xf32>
    %311 = vector.broadcast %308 : vector<1x1024xf32> to vector<8x1024xf32>
    %312 = arith.mulf %310, %311 : vector<8x1024xf32>
    %313 = arith.addf %301, %312 : vector<8x1024xf32>
    %cst_77 = arith.constant 2.200000e+01 : f32
    %314 = vector.broadcast %cst_77 : f32 to vector<1x1024xf32>
    %315 = arith.subf %314, %35 : vector<1x1024xf32>
    %316 = math.absf %315 : vector<1x1024xf32>
    %cst_78 = arith.constant 1.000000e+00 : f32
    %317 = vector.broadcast %cst_78 : f32 to vector<1x1024xf32>
    %318 = arith.subf %317, %316 : vector<1x1024xf32>
    %cst_79 = arith.constant 0.000000e+00 : f32
    %319 = vector.broadcast %cst_79 : f32 to vector<1x1024xf32>
    %320 = arith.maximumf %319, %318 : vector<1x1024xf32>
    %321 = vector.extract_strided_slice %48 {offsets = [22, 0, 0], sizes = [1, 8, 1024], strides = [1, 1, 1]} : vector<32x8x1024xf32> to vector<1x8x1024xf32>
    %322 = vector.shape_cast %321 : vector<1x8x1024xf32> to vector<8x1024xf32>
    %323 = vector.broadcast %320 : vector<1x1024xf32> to vector<8x1024xf32>
    %324 = arith.mulf %322, %323 : vector<8x1024xf32>
    %325 = arith.addf %313, %324 : vector<8x1024xf32>
    %cst_80 = arith.constant 2.300000e+01 : f32
    %326 = vector.broadcast %cst_80 : f32 to vector<1x1024xf32>
    %327 = arith.subf %326, %35 : vector<1x1024xf32>
    %328 = math.absf %327 : vector<1x1024xf32>
    %cst_81 = arith.constant 1.000000e+00 : f32
    %329 = vector.broadcast %cst_81 : f32 to vector<1x1024xf32>
    %330 = arith.subf %329, %328 : vector<1x1024xf32>
    %cst_82 = arith.constant 0.000000e+00 : f32
    %331 = vector.broadcast %cst_82 : f32 to vector<1x1024xf32>
    %332 = arith.maximumf %331, %330 : vector<1x1024xf32>
    %333 = vector.extract_strided_slice %48 {offsets = [23, 0, 0], sizes = [1, 8, 1024], strides = [1, 1, 1]} : vector<32x8x1024xf32> to vector<1x8x1024xf32>
    %334 = vector.shape_cast %333 : vector<1x8x1024xf32> to vector<8x1024xf32>
    %335 = vector.broadcast %332 : vector<1x1024xf32> to vector<8x1024xf32>
    %336 = arith.mulf %334, %335 : vector<8x1024xf32>
    %337 = arith.addf %325, %336 : vector<8x1024xf32>
    %cst_83 = arith.constant 2.400000e+01 : f32
    %338 = vector.broadcast %cst_83 : f32 to vector<1x1024xf32>
    %339 = arith.subf %338, %35 : vector<1x1024xf32>
    %340 = math.absf %339 : vector<1x1024xf32>
    %cst_84 = arith.constant 1.000000e+00 : f32
    %341 = vector.broadcast %cst_84 : f32 to vector<1x1024xf32>
    %342 = arith.subf %341, %340 : vector<1x1024xf32>
    %cst_85 = arith.constant 0.000000e+00 : f32
    %343 = vector.broadcast %cst_85 : f32 to vector<1x1024xf32>
    %344 = arith.maximumf %343, %342 : vector<1x1024xf32>
    %345 = vector.extract_strided_slice %48 {offsets = [24, 0, 0], sizes = [1, 8, 1024], strides = [1, 1, 1]} : vector<32x8x1024xf32> to vector<1x8x1024xf32>
    %346 = vector.shape_cast %345 : vector<1x8x1024xf32> to vector<8x1024xf32>
    %347 = vector.broadcast %344 : vector<1x1024xf32> to vector<8x1024xf32>
    %348 = arith.mulf %346, %347 : vector<8x1024xf32>
    %349 = arith.addf %337, %348 : vector<8x1024xf32>
    %cst_86 = arith.constant 2.500000e+01 : f32
    %350 = vector.broadcast %cst_86 : f32 to vector<1x1024xf32>
    %351 = arith.subf %350, %35 : vector<1x1024xf32>
    %352 = math.absf %351 : vector<1x1024xf32>
    %cst_87 = arith.constant 1.000000e+00 : f32
    %353 = vector.broadcast %cst_87 : f32 to vector<1x1024xf32>
    %354 = arith.subf %353, %352 : vector<1x1024xf32>
    %cst_88 = arith.constant 0.000000e+00 : f32
    %355 = vector.broadcast %cst_88 : f32 to vector<1x1024xf32>
    %356 = arith.maximumf %355, %354 : vector<1x1024xf32>
    %357 = vector.extract_strided_slice %48 {offsets = [25, 0, 0], sizes = [1, 8, 1024], strides = [1, 1, 1]} : vector<32x8x1024xf32> to vector<1x8x1024xf32>
    %358 = vector.shape_cast %357 : vector<1x8x1024xf32> to vector<8x1024xf32>
    %359 = vector.broadcast %356 : vector<1x1024xf32> to vector<8x1024xf32>
    %360 = arith.mulf %358, %359 : vector<8x1024xf32>
    %361 = arith.addf %349, %360 : vector<8x1024xf32>
    %cst_89 = arith.constant 2.600000e+01 : f32
    %362 = vector.broadcast %cst_89 : f32 to vector<1x1024xf32>
    %363 = arith.subf %362, %35 : vector<1x1024xf32>
    %364 = math.absf %363 : vector<1x1024xf32>
    %cst_90 = arith.constant 1.000000e+00 : f32
    %365 = vector.broadcast %cst_90 : f32 to vector<1x1024xf32>
    %366 = arith.subf %365, %364 : vector<1x1024xf32>
    %cst_91 = arith.constant 0.000000e+00 : f32
    %367 = vector.broadcast %cst_91 : f32 to vector<1x1024xf32>
    %368 = arith.maximumf %367, %366 : vector<1x1024xf32>
    %369 = vector.extract_strided_slice %48 {offsets = [26, 0, 0], sizes = [1, 8, 1024], strides = [1, 1, 1]} : vector<32x8x1024xf32> to vector<1x8x1024xf32>
    %370 = vector.shape_cast %369 : vector<1x8x1024xf32> to vector<8x1024xf32>
    %371 = vector.broadcast %368 : vector<1x1024xf32> to vector<8x1024xf32>
    %372 = arith.mulf %370, %371 : vector<8x1024xf32>
    %373 = arith.addf %361, %372 : vector<8x1024xf32>
    %cst_92 = arith.constant 2.700000e+01 : f32
    %374 = vector.broadcast %cst_92 : f32 to vector<1x1024xf32>
    %375 = arith.subf %374, %35 : vector<1x1024xf32>
    %376 = math.absf %375 : vector<1x1024xf32>
    %cst_93 = arith.constant 1.000000e+00 : f32
    %377 = vector.broadcast %cst_93 : f32 to vector<1x1024xf32>
    %378 = arith.subf %377, %376 : vector<1x1024xf32>
    %cst_94 = arith.constant 0.000000e+00 : f32
    %379 = vector.broadcast %cst_94 : f32 to vector<1x1024xf32>
    %380 = arith.maximumf %379, %378 : vector<1x1024xf32>
    %381 = vector.extract_strided_slice %48 {offsets = [27, 0, 0], sizes = [1, 8, 1024], strides = [1, 1, 1]} : vector<32x8x1024xf32> to vector<1x8x1024xf32>
    %382 = vector.shape_cast %381 : vector<1x8x1024xf32> to vector<8x1024xf32>
    %383 = vector.broadcast %380 : vector<1x1024xf32> to vector<8x1024xf32>
    %384 = arith.mulf %382, %383 : vector<8x1024xf32>
    %385 = arith.addf %373, %384 : vector<8x1024xf32>
    %cst_95 = arith.constant 2.800000e+01 : f32
    %386 = vector.broadcast %cst_95 : f32 to vector<1x1024xf32>
    %387 = arith.subf %386, %35 : vector<1x1024xf32>
    %388 = math.absf %387 : vector<1x1024xf32>
    %cst_96 = arith.constant 1.000000e+00 : f32
    %389 = vector.broadcast %cst_96 : f32 to vector<1x1024xf32>
    %390 = arith.subf %389, %388 : vector<1x1024xf32>
    %cst_97 = arith.constant 0.000000e+00 : f32
    %391 = vector.broadcast %cst_97 : f32 to vector<1x1024xf32>
    %392 = arith.maximumf %391, %390 : vector<1x1024xf32>
    %393 = vector.extract_strided_slice %48 {offsets = [28, 0, 0], sizes = [1, 8, 1024], strides = [1, 1, 1]} : vector<32x8x1024xf32> to vector<1x8x1024xf32>
    %394 = vector.shape_cast %393 : vector<1x8x1024xf32> to vector<8x1024xf32>
    %395 = vector.broadcast %392 : vector<1x1024xf32> to vector<8x1024xf32>
    %396 = arith.mulf %394, %395 : vector<8x1024xf32>
    %397 = arith.addf %385, %396 : vector<8x1024xf32>
    %cst_98 = arith.constant 2.900000e+01 : f32
    %398 = vector.broadcast %cst_98 : f32 to vector<1x1024xf32>
    %399 = arith.subf %398, %35 : vector<1x1024xf32>
    %400 = math.absf %399 : vector<1x1024xf32>
    %cst_99 = arith.constant 1.000000e+00 : f32
    %401 = vector.broadcast %cst_99 : f32 to vector<1x1024xf32>
    %402 = arith.subf %401, %400 : vector<1x1024xf32>
    %cst_100 = arith.constant 0.000000e+00 : f32
    %403 = vector.broadcast %cst_100 : f32 to vector<1x1024xf32>
    %404 = arith.maximumf %403, %402 : vector<1x1024xf32>
    %405 = vector.extract_strided_slice %48 {offsets = [29, 0, 0], sizes = [1, 8, 1024], strides = [1, 1, 1]} : vector<32x8x1024xf32> to vector<1x8x1024xf32>
    %406 = vector.shape_cast %405 : vector<1x8x1024xf32> to vector<8x1024xf32>
    %407 = vector.broadcast %404 : vector<1x1024xf32> to vector<8x1024xf32>
    %408 = arith.mulf %406, %407 : vector<8x1024xf32>
    %409 = arith.addf %397, %408 : vector<8x1024xf32>
    %cst_101 = arith.constant 3.000000e+01 : f32
    %410 = vector.broadcast %cst_101 : f32 to vector<1x1024xf32>
    %411 = arith.subf %410, %35 : vector<1x1024xf32>
    %412 = math.absf %411 : vector<1x1024xf32>
    %cst_102 = arith.constant 1.000000e+00 : f32
    %413 = vector.broadcast %cst_102 : f32 to vector<1x1024xf32>
    %414 = arith.subf %413, %412 : vector<1x1024xf32>
    %cst_103 = arith.constant 0.000000e+00 : f32
    %415 = vector.broadcast %cst_103 : f32 to vector<1x1024xf32>
    %416 = arith.maximumf %415, %414 : vector<1x1024xf32>
    %417 = vector.extract_strided_slice %48 {offsets = [30, 0, 0], sizes = [1, 8, 1024], strides = [1, 1, 1]} : vector<32x8x1024xf32> to vector<1x8x1024xf32>
    %418 = vector.shape_cast %417 : vector<1x8x1024xf32> to vector<8x1024xf32>
    %419 = vector.broadcast %416 : vector<1x1024xf32> to vector<8x1024xf32>
    %420 = arith.mulf %418, %419 : vector<8x1024xf32>
    %421 = arith.addf %409, %420 : vector<8x1024xf32>
    %cst_104 = arith.constant 3.100000e+01 : f32
    %422 = vector.broadcast %cst_104 : f32 to vector<1x1024xf32>
    %423 = arith.subf %422, %35 : vector<1x1024xf32>
    %424 = math.absf %423 : vector<1x1024xf32>
    %cst_105 = arith.constant 1.000000e+00 : f32
    %425 = vector.broadcast %cst_105 : f32 to vector<1x1024xf32>
    %426 = arith.subf %425, %424 : vector<1x1024xf32>
    %cst_106 = arith.constant 0.000000e+00 : f32
    %427 = vector.broadcast %cst_106 : f32 to vector<1x1024xf32>
    %428 = arith.maximumf %427, %426 : vector<1x1024xf32>
    %429 = vector.extract_strided_slice %48 {offsets = [31, 0, 0], sizes = [1, 8, 1024], strides = [1, 1, 1]} : vector<32x8x1024xf32> to vector<1x8x1024xf32>
    %430 = vector.shape_cast %429 : vector<1x8x1024xf32> to vector<8x1024xf32>
    %431 = vector.broadcast %428 : vector<1x1024xf32> to vector<8x1024xf32>
    %432 = arith.mulf %430, %431 : vector<8x1024xf32>
    %433 = arith.addf %421, %432 : vector<8x1024xf32>
    %c0_107 = arith.constant 0 : index
    %c0_108 = arith.constant 0 : index
    %434 = vector.load %arg4[%c0_107, %c0_108] : memref<8x1024xf32, #tpu.memory_space<vmem>>, vector<8x1024xf32>
    tpu.vector_store %arg4[%c0_107, %c0_108], %433 {strides = array<i32>} : memref<8x1024xf32, #tpu.memory_space<vmem>>, vector<8x1024xf32>,
    return
  }
  func.func @transform_0(%arg0: i32, %arg1: i32) -> i32 {
    %c0_i32 = arith.constant 0 : i32
    %c0_i32_0 = arith.constant 0 : i32
    return %c0_i32 : i32
  }
  func.func @transform_1(%arg0: i32, %arg1: i32) -> (i32, i32, i32) {
    %c0_i32 = arith.constant 0 : i32
    %c0_i32_0 = arith.constant 0 : i32
    %c0_i32_1 = arith.constant 0 : i32
    return %c0_i32, %arg0, %c0_i32_0 : i32, i32, i32
  }
  func.func @transform_2(%arg0: i32, %arg1: i32) -> (i32, i32) {
    %c0_i32 = arith.constant 0 : i32
    return %arg0, %arg1 : i32, i32
  }
}

</mosaic_0001>

<bundles_post_ra>
// kernel: tpu_custom_call.1
= control target key start
LH: loop header
LB: loop body
LE: loop exit
PB: predicated region body
PF: predicated region fallthrough
CT: control target
= control target key end

     0   :  { %7 = vsyncpa [#allocation5], 0  ;;  %s4246_s0 = inlined_call_operand.hbm [shape: f32[4], index: 0, kind: input, shape index: {}]   ;;  %s4247_s1 = inlined_call_operand.hbm [shape: f32[32,8,32], index: 1, kind: input, shape index: {}]   ;;  %s4248_s2 = inlined_call_operand.hbm [shape: f32[8,1024], index: 2, kind: output, shape index: {}]  }
   0x1   :  { %8 = vsyncpa [#allocation3], 0 }
   0x2   :  { %9 = vsyncpa [#allocation4], 0  ;;  %s15_s11 = sshll.u32 %s4246_s0, 4  ;;  %s23_s14 = sshll.u32 %s4247_s1, 4  ;;  %s16_s11 = int_to_ptr.hbm [resolvable:$true] %s15_s11  ;;  %s24_s14 = int_to_ptr.hbm [resolvable:$true] %s23_s14 }
   0x3   :  { %s3291_s15 = smov [#allocation2]   ;;  %s3292_s16 = smov [#allocation6]  }
   0x4   :  { %18 = dma.hbm_to_smem %s16_s11, 16, %s3291_s15, [#allocation5]  }
   0x5   :  { %s25_s17 = sshll.u32 %s3292_s16, 4  ;;  %s3293_s18 = smov 128   ;;  %s26_s17 = int_to_ptr.vmem [resolvable:$true] %s25_s17 }
   0x6   :  { %s3294_s19 = smov 8  }
   0x7   :  { %31 = dma.hbm_to_vmem [thread:$0]  %s24_s14, 4096, %s26_s17, [#allocation3], %s3293_s18, %s3293_s18, %s3294_s19  }
   0x8   :  { %3285 = dma.done.wait [#allocation5], 16  }
   0x9   :  { %3286 = vsyncadd [#allocation5], 4294967280 }
   0xa   :  { %3287 = dma.done.wait [#allocation3], 4096  }
   0xb   :  { %3288 = vsyncadd [#allocation3], 4294963200 }
   0xc   :  { %40 = sfence }
   0xd   :  { %v47_v0 = vlaneseq  ;;  %s41_s0 = sld [smem:[#allocation2]]  ;;  %vm366_vm0 = vcmask 261120   ;;  %s3295_s22 = smov [#allocation7]  }
   0xe   :  { %s2929_s20 = sld [smem:[#allocation2 + $0x1]]  ;;  %s2916_s23 = sshll.u32 %s3295_s22, 4  ;;  %s2917_s23 = int_to_ptr.vmem [resolvable:$true] %s2916_s23 }
   0xf   :  { %v3317_v1 = vand.u32 127, %v47_v0  ;;  %v3321_v4 = vshrl.u32 %v47_v0, 7  ;;  %s2930_s1 = sld [smem:[#allocation2 + $0x2]]  ;;  %s2918_s26 = sshll.u32 %s4248_s2, 4  ;;  %s2919_s26 = int_to_ptr.hbm [resolvable:$true] %s2918_s26 }
  0x10   :  { %s3407_s21 = sld [smem:[#allocation2 + $0x3]] }
  0x11   :  { %v56_v2 = vcvt.s32.f32 %v3317_v1  ;;  %v49_v3 = vadd.s32 128, %v3317_v1  ;;  %v50_v5 = vadd.s32 256, %v3317_v1  ;;  %v51_v6 = vadd.s32 384, %v3317_v1 }
  0x12   :  { %v201_v12 = vadd.s32 24, %v3321_v4  ;;  %v200_v18 = vadd.s32 16, %v3321_v4  ;;  %v199_v25 = vadd.s32 8, %v3321_v4  ;;  %v3342_v37 = vadd.s32 768, %v3317_v1 }
  0x13   :  { %v73_v7 = vadd.f32 0.5, %v56_v2  ;;  %v57_v8 = vcvt.s32.f32 %v49_v3  ;;  %v58_v9 = vcvt.s32.f32 %v50_v5  ;;  %v59_v10 = vcvt.s32.f32 %v51_v6 }
  0x14   :  { %v3326_v17 = vstv %s41_s0  ;;  %v3329_v19 = vstv %s2929_s20  ;;  %v3333_v26 = vcvt.s32.f32 %v201_v12  ;;  %v3338_v33 = vcvt.s32.f32 %v200_v18 }
  0x15   :  { %v81_v11 = vmul.f32 0.03125, %v73_v7  ;;  %v74_v13 = vadd.f32 0.5, %v57_v8  ;;  %v75_v14 = vadd.f32 0.5, %v58_v9  ;;  %v76_v15 = vadd.f32 0.5, %v59_v10 }
  0x16   :  { %v3336_v32 = vstv %s2930_s1  ;;  %v3352_v49 = vcvt.s32.f32 %v199_v25  ;;  %v62_v57 = vcvt.s32.f32 %v3342_v37  ;;  %v3376_v6 = vcvt.s32.f32 %v3321_v4 }
  0x17   :  { %v89_v16 = vfloor.f32 %v81_v11  ;;  %v82_v20 = vmul.f32 0.03125, %v74_v13  ;;  %v83_v21 = vmul.f32 0.03125, %v75_v14  ;;  %v84_v22 = vmul.f32 0.03125, %v76_v15 }
  0x18   :  { %v79_v18 = vadd.f32 0.5, %v62_v57 }
  0x19   :  { %v97_v23 = vmul.f32 32.0, %v89_v16  ;;  %v172_v24 = vmul.f32 %v3326_v17, %v89_v16  ;;  %v90_v27 = vfloor.f32 %v82_v20  ;;  %v91_v28 = vfloor.f32 %v83_v21 }
  0x1a   :  { %v92_v29 = vfloor.f32 %v84_v22  ;;  %v139_v31 = vmul.f32 %v3329_v19, %v89_v16 }
  0x1b   :  { %v105_v30 = vsub.f32 %v56_v2, %v97_v23  ;;  %v98_v34 = vmul.f32 32.0, %v90_v27  ;;  %v173_v35 = vmul.f32 %v3326_v17, %v90_v27  ;;  %v99_v36 = vmul.f32 32.0, %v91_v28 }
  0x1c   :  { %v140_v40 = vmul.f32 %v3329_v19, %v90_v27  ;;  %v174_v41 = vmul.f32 %v3326_v17, %v91_v28  ;;  %v141_v44 = vmul.f32 %v3329_v19, %v91_v28  ;;  %v100_v45 = vmul.f32 32.0, %v92_v29 }
  0x1d   :  { %v130_v38 = vmul.f32 %v3326_v17, %v105_v30  ;;  %v164_v39 = vmul.f32 %v3329_v19, %v105_v30  ;;  %v106_v42 = vsub.f32 %v57_v8, %v98_v34  ;;  %v107_v43 = vsub.f32 %v58_v9, %v99_v36 }
  0x1e   :  { %v175_v48 = vmul.f32 %v3326_v17, %v92_v29  ;;  %v108_v55 = vsub.f32 %v59_v10, %v100_v45  ;;  %v142_v56 = vmul.f32 %v3329_v19, %v92_v29 }
  0x1f   :  { %v147_v46 = vsub.f32 %v130_v38, %v139_v31  ;;  %v3349_v47 = vadd.f32 %v172_v24, %v164_v39  ;;  %v131_v50 = vmul.f32 %v3326_v17, %v106_v42  ;;  %v165_v51 = vmul.f32 %v3329_v19, %v106_v42 }
  0x20   :  { %v132_v52 = vmul.f32 %v3326_v17, %v107_v43  ;;  %v166_v53 = vmul.f32 %v3329_v19, %v107_v43  ;;  %v133_v0 = vmul.f32 %v3326_v17, %v108_v55  ;;  %v167_v2 = vmul.f32 %v3329_v19, %v108_v55 }
  0x21   :  { %v156_v54 = vadd.f32 %v3336_v32, %v147_v46  ;;  %v148_v58 = vsub.f32 %v131_v50, %v140_v40  ;;  %v3361_v59 = vadd.f32 %v173_v35, %v165_v51 }
  0x22   :  { %v149_v60 = vsub.f32 %v132_v52, %v141_v44  ;;  %v3363_v61 = vadd.f32 %v174_v41, %v166_v53  ;;  %v150_v9 = vsub.f32 %v133_v0, %v142_v56  ;;  %v3378_v10 = vadd.f32 %v175_v48, %v167_v2 }
  0x23   :  { %v230_v62 = vsub.f32 %v3333_v26, %v156_v54  ;;  %v222_v63 = vsub.f32 %v3338_v33, %v156_v54  ;;  %v3370_v3 = vadd.f32 %v3336_v32, %v148_v58  ;;  %v214_v13 = vsub.f32 %v3352_v49, %v156_v54 }
  0x24   :  { %v3373_v5 = vadd.f32 %v3336_v32, %v149_v60  ;;  %v159_v4 = vadd.f32 %v3336_v32, %v150_v9  ;;  %v206_v39 = vsub.f32 %v3376_v6, %v156_v54 }
  0x25   :  { %v262_v7 = vand.u32 2147483647, %v230_v62  ;;  %v254_v8 = vand.u32 2147483647, %v222_v63  ;;  %v231_v11 = vsub.f32 %v3333_v26, %v3370_v3  ;;  %v223_v14 = vsub.f32 %v3338_v33, %v3370_v3 }
  0x26   :  { %v232_v12 = vsub.f32 %v3333_v26, %v3373_v5  ;;  %v246_v22 = vand.u32 2147483647, %v214_v13  ;;  %v224_v23 = vsub.f32 %v3338_v33, %v3373_v5  ;;  %v233_v27 = vsub.f32 %v3333_v26, %v159_v4 }
  0x27   :  { %v294_v15 = vsub.f32 1.0, %v262_v7  ;;  %v286_v16 = vsub.f32 1.0, %v254_v8  ;;  %v263_v20 = vand.u32 2147483647, %v231_v11  ;;  %v255_v28 = vand.u32 2147483647, %v223_v14 }
  0x28   :  { %v264_v21 = vand.u32 2147483647, %v232_v12  ;;  %v278_v31 = vsub.f32 1.0, %v246_v22  ;;  %v256_v34 = vand.u32 2147483647, %v224_v23  ;;  %v225_v38 = vsub.f32 %v3338_v33, %v159_v4  ;;  %v334_v8 = vld [vmem:[#allocation6] sm:$0xff] }
  0x29   :  { %v326_v24 = vmax.f32 %v294_v15, 0.0  ;;  %v318_v25 = vmax.f32 %v286_v16, 0.0  ;;  %v295_v29 = vsub.f32 1.0, %v263_v20  ;;  %v265_v35 = vand.u32 2147483647, %v233_v27 }
  0x2a   :  { %v296_v30 = vsub.f32 1.0, %v264_v21  ;;  %v287_v36 = vsub.f32 1.0, %v255_v28  ;;  %v310_v42 = vmax.f32 %v278_v31, 0.0  ;;  %v288_v43 = vsub.f32 1.0, %v256_v34 }
  0x2b   :  { %475 = vmatpush.msra.mxu0 %v326_v24  ;;  %v327_v40 = vmax.f32 %v295_v29, 0.0  ;;  %v297_v44 = vsub.f32 1.0, %v265_v35  ;;  %v257_v46 = vand.u32 2147483647, %v225_v38  ;;  %v238_v48 = vand.u32 2147483647, %v206_v39 }
  0x2c   :  { %v328_v41 = vmax.f32 %v296_v30, 0.0  ;;  %v319_v45 = vmax.f32 %v287_v36, 0.0  ;;  %v320_v50 = vmax.f32 %v288_v43, 0.0  ;;  %v215_v51 = vsub.f32 %v3352_v49, %v3370_v3 }
  0x2d   :  { %476 = vmatpush.msra.mxu0 %v318_v25  ;;  %588 = vmatpush.msra.mxu1 %v327_v40  ;;  %v216_v52 = vsub.f32 %v3352_v49, %v3373_v5  ;;  %v217_v53 = vsub.f32 %v3352_v49, %v159_v4  ;;  %v329_v54 = vmax.f32 %v297_v44, 0.0  ;;  %v289_v55 = vsub.f32 1.0, %v257_v46 }
  0x2e   :  { %701 = vmatpush.msra.mxu2 %v328_v41  ;;  %v270_v56 = vsub.f32 1.0, %v238_v48  ;;  %v207_v58 = vsub.f32 %v3376_v6, %v3370_v3  ;;  %v247_v60 = vand.u32 2147483647, %v215_v51  ;;  %v208_v0 = vsub.f32 %v3376_v6, %v3373_v5 }
  0x2f   :  { %477 = vmatpush.msra.mxu0 %v310_v42  ;;  %589 = vmatpush.msra.mxu1 %v319_v45  ;;  %v248_v62 = vand.u32 2147483647, %v216_v52  ;;  %v249_v63 = vand.u32 2147483647, %v217_v53  ;;  %v321_v2 = vmax.f32 %v289_v55, 0.0  ;;  %v209_v11 = vsub.f32 %v3376_v6, %v159_v4 }
  0x30   :  { %702 = vmatpush.msra.mxu2 %v320_v50  ;;  %814 = vmatpush.msra.mxu3 %v329_v54  ;;  %v302_v7 = vmax.f32 %v270_v56, 0.0  ;;  %v239_v9 = vand.u32 2147483647, %v207_v58  ;;  %v279_v12 = vsub.f32 1.0, %v247_v60  ;;  %v240_v15 = vand.u32 2147483647, %v208_v0 }
  0x31   :  { %v280_v13 = vsub.f32 1.0, %v248_v62  ;;  %v281_v14 = vsub.f32 1.0, %v249_v63  ;;  %v241_v16 = vand.u32 2147483647, %v209_v11  ;;  %v87_v20 = vmul.f32 0.03125, %v79_v18 }
  0x32   :  { %815 = vmatpush.msra.mxu3 %v321_v2  ;;  %478 = vmatpush.msra.mxu0 %v302_v7  ;;  %v271_v3 = vsub.f32 1.0, %v239_v9  ;;  %v55_v21 = vadd.s32 896, %v3317_v1  ;;  %v311_v22 = vmax.f32 %v279_v12, 0.0  ;;  %v272_v24 = vsub.f32 1.0, %v240_v15  ;;  %v336_v12 = vld [vmem:[#allocation6 + $0x10] sm:$0xff] }
  0x33   :  { %v312_v5 = vmax.f32 %v280_v13, 0.0  ;;  %v313_v23 = vmax.f32 %v281_v14, 0.0  ;;  %2932 = vmatmul.msk.f32.vlgmr.msra.gmra.mxu0 %vm366_vm0, %v334_v8  ;;  %v273_v27 = vsub.f32 1.0, %v241_v16  ;;  %v95_v4 = vfloor.f32 %v87_v20 }
  0x34   :  { %v303_v25 = vmax.f32 %v271_v3, 0.0  ;;  %v63_v28 = vcvt.s32.f32 %v55_v21  ;;  %590 = vmatpush.msra.mxu1 %v311_v22  ;;  %v304_v29 = vmax.f32 %v272_v24, 0.0  ;;  %v52_v30 = vadd.s32 512, %v3317_v1 }
  0x35   :  { %703 = vmatpush.msra.mxu2 %v312_v5  ;;  %v53_v18 = vadd.s32 640, %v3317_v1  ;;  %816 = vmatpush.msra.mxu3 %v313_v23  ;;  %v305_v31 = vmax.f32 %v273_v27, 0.0  ;;  %v103_v34 = vmul.f32 32.0, %v95_v4  ;;  %v178_v35 = vmul.f32 %v3326_v17, %v95_v4  ;;  %v335_v1 = vld [vmem:[#allocation6 + $0x8] sm:$0xff] }
  0x36   :  { %591 = vmatpush.msra.mxu1 %v303_v25  ;;  %v80_v36 = vadd.f32 0.5, %v63_v28  ;;  %v60_v38 = vcvt.s32.f32 %v52_v30  ;;  %v145_v41 = vmul.f32 %v3329_v19, %v95_v4  ;;  %v3422_v52 = vstv %s3407_s21 }
  0x37   :  { %704 = vmatpush.msra.mxu2 %v304_v29  ;;  %v61_v39 = vcvt.s32.f32 %v53_v18  ;;  %817 = vmatpush.msra.mxu3 %v305_v31  ;;  %v111_v40 = vsub.f32 %v62_v57, %v103_v34 }
  0x38   :  { %2964 = vmatmul.msk.f32.vlgmr.msra.gmra.mxu1 %vm366_vm0, %v334_v8  ;;  %2996 = vmatmul.msk.f32.vlgmr.msra.gmra.mxu2 %vm366_vm0, %v334_v8  ;;  %v88_v42 = vmul.f32 0.03125, %v80_v36  ;;  %v77_v43 = vadd.f32 0.5, %v60_v38 }
  0x39   :  { %3028 = vmatmul.msk.f32.vlgmr.msra.gmra.mxu3 %vm366_vm0, %v334_v8  ;;  %v78_v44 = vadd.f32 0.5, %v61_v39  ;;  %v136_v45 = vmul.f32 %v3326_v17, %v111_v40  ;;  %v170_v46 = vmul.f32 %v3329_v19, %v111_v40 }
  0x3a   :  { %v96_v48 = vfloor.f32 %v88_v42  ;;  %v85_v37 = vmul.f32 0.03125, %v77_v43 }
  0x3b   :  { %2933 = vmatmul.msk.f32.gmra.mxu0 %vm366_vm0, %v335_v1  ;;  %v86_v57 = vmul.f32 0.03125, %v78_v44  ;;  %v153_v50 = vsub.f32 %v136_v45, %v145_v41  ;;  %v186_v51 = vadd.f32 %v178_v35, %v170_v46 }
  0x3c   :  { %v104_v53 = vmul.f32 32.0, %v96_v48  ;;  %v179_v54 = vmul.f32 %v3326_v17, %v96_v48  ;;  %v93_v55 = vfloor.f32 %v85_v37  ;;  %v146_v63 = vmul.f32 %v3329_v19, %v96_v48 }
  0x3d   :  { %v3426_v56 = vadd.f32 %v3336_v32, %v153_v50  ;;  %v3429_v58 = vadd.f32 %v3422_v52, %v186_v51  ;;  %v94_v60 = vfloor.f32 %v86_v57  ;;  %v338_v57 = vld [vmem:[#allocation6 + $0x20] sm:$0xff] }
  0x3e   :  { %v112_v62 = vsub.f32 %v63_v28, %v104_v53  ;;  %v101_v0 = vmul.f32 32.0, %v93_v55  ;;  %v176_v2 = vmul.f32 %v3326_v17, %v93_v55  ;;  %v143_v8 = vmul.f32 %v3329_v19, %v93_v55 }
  0x3f   :  { %v236_v7 = vsub.f32 %v3333_v26, %v3426_v56  ;;  %v102_v9 = vmul.f32 32.0, %v94_v60  ;;  %v177_v11 = vmul.f32 %v3326_v17, %v94_v60  ;;  %v144_v20 = vmul.f32 %v3329_v19, %v94_v60 }
  0x40   :  { %2965 = vmatmul.msk.f32.gmra.mxu1 %vm366_vm0, %v335_v1  ;;  %v137_v13 = vmul.f32 %v3326_v17, %v112_v62  ;;  %v171_v14 = vmul.f32 %v3329_v19, %v112_v62  ;;  %v109_v15 = vsub.f32 %v60_v38, %v101_v0  ;;  %2997 = vmatmul.msk.f32.gmra.mxu2 %vm366_vm0, %v335_v1 }
  0x41   :  { %3029 = vmatmul.msk.f32.gmra.mxu3 %vm366_vm0, %v335_v1  ;;  %v268_v3 = vand.u32 2147483647, %v236_v7  ;;  %v110_v16 = vsub.f32 %v61_v39, %v102_v9  ;;  %v337_v39 = vld [vmem:[#allocation6 + $0x18] sm:$0xff]  ;;  %v228_v50 = vsub.f32 %v3338_v33, %v3426_v56  ;;  %v340_v9 = vld [vmem:[#allocation6 + $0x30] sm:$0xff] }
  0x42   :  { %v154_v21 = vsub.f32 %v137_v13, %v146_v63  ;;  %v187_v22 = vadd.f32 %v179_v54, %v171_v14  ;;  %v134_v5 = vmul.f32 %v3326_v17, %v109_v15  ;;  %v168_v23 = vmul.f32 %v3329_v19, %v109_v15  ;;  %v342_v15 = vld [vmem:[#allocation6 + $0x40] sm:$0xff] }
  0x43   :  { %2934 = vmatmul.msk.f32.gmra.mxu0 %vm366_vm0, %v336_v12  ;;  %v300_v24 = vsub.f32 1.0, %v268_v3  ;;  %v135_v25 = vmul.f32 %v3326_v17, %v110_v16  ;;  %v169_v27 = vmul.f32 %v3329_v19, %v110_v16  ;;  %v260_v55 = vand.u32 2147483647, %v228_v50  ;;  %v343_v3 = vld [vmem:[#allocation6 + $0x48] sm:$0xff]  ;;  %v344_v16 = vld [vmem:[#allocation6 + $0x50] sm:$0xff] }
  0x44   :  { %v3449_v4 = vadd.f32 %v3336_v32, %v154_v21  ;;  %v3452_v28 = vadd.f32 %v3422_v52, %v187_v22  ;;  %v151_v29 = vsub.f32 %v134_v5, %v143_v8  ;;  %v184_v30 = vadd.f32 %v176_v2, %v168_v23  ;;  %v346_v21 = vld [vmem:[#allocation6 + $0x60] sm:$0xff]  ;;  %v347_v22 = vld [vmem:[#allocation6 + $0x68] sm:$0xff] }
  0x45   :  { %v332_v18 = vmax.f32 %v300_v24, 0.0  ;;  %v152_v31 = vsub.f32 %v135_v25, %v144_v20  ;;  %v185_v34 = vadd.f32 %v177_v11, %v169_v27  ;;  %v292_v0 = vsub.f32 1.0, %v260_v55  ;;  %v345_v20 = vld [vmem:[#allocation6 + $0x58] sm:$0xff]  ;;  %v351_v55 = vld [vmem:[#allocation6 + $0x88] sm:$0xff] }
  0x46   :  { %v237_v35 = vsub.f32 %v3333_v26, %v3449_v4  ;;  %v3457_v36 = vadd.f32 %v3336_v32, %v151_v29  ;;  %v3460_v17 = vadd.f32 %v3422_v52, %v184_v30  ;;  %v229_v51 = vsub.f32 %v3338_v33, %v3449_v4  ;;  %v348_v30 = vld [vmem:[#allocation6 + $0x70] sm:$0xff] }
  0x47   :  { %1153 = vmatpush.msrb.mxu2 %v332_v18  ;;  %v3463_v19 = vadd.f32 %v3336_v32, %v152_v31  ;;  %v3466_v38 = vadd.f32 %v3422_v52, %v185_v34  ;;  %v324_v11 = vmax.f32 %v292_v0, 0.0  ;;  %v220_v5 = vsub.f32 %v3352_v49, %v3426_v56 }
  0x48   :  { %2966 = vmatmul.msk.f32.gmra.mxu1 %vm366_vm0, %v336_v12  ;;  %v269_v40 = vand.u32 2147483647, %v237_v35  ;;  %v234_v41 = vsub.f32 %v3333_v26, %v3457_v36  ;;  %2998 = vmatmul.msk.f32.gmra.mxu2 %vm366_vm0, %v336_v12  ;;  %v226_v53 = vsub.f32 %v3338_v33, %v3457_v36  ;;  %v261_v60 = vand.u32 2147483647, %v229_v51 }
  0x49   :  { %3030 = vmatmul.msk.f32.gmra.mxu3 %vm366_vm0, %v336_v12  ;;  %v235_v1 = vsub.f32 %v3333_v26, %v3463_v19  ;;  %v339_v26 = vld [vmem:[#allocation6 + $0x28] sm:$0xff]  ;;  %v227_v54 = vsub.f32 %v3338_v33, %v3463_v19  ;;  %1154 = vmatpush.msrb.mxu2 %v324_v11  ;;  %v341_v33 = vld [vmem:[#allocation6 + $0x38] sm:$0xff]  ;;  %v221_v23 = vsub.f32 %v3352_v49, %v3449_v4  ;;  %v252_v24 = vand.u32 2147483647, %v220_v5 }
  0x4a   :  { %v301_v42 = vsub.f32 1.0, %v269_v40  ;;  %v266_v32 = vand.u32 2147483647, %v234_v41  ;;  %v258_v62 = vand.u32 2147483647, %v226_v53  ;;  %v293_v2 = vsub.f32 1.0, %v261_v60 }
  0x4b   :  { %2935 = vmatmul.msk.f32.gmra.mxu0 %vm366_vm0, %v337_v39  ;;  %v267_v43 = vand.u32 2147483647, %v235_v1  ;;  %v259_v63 = vand.u32 2147483647, %v227_v54  ;;  %v253_v25 = vand.u32 2147483647, %v221_v23  ;;  %v218_v34 = vsub.f32 %v3352_v49, %v3457_v36 }
  0x4c   :  { %v333_v44 = vmax.f32 %v301_v42, 0.0  ;;  %v298_v45 = vsub.f32 1.0, %v266_v32  ;;  %v290_v7 = vsub.f32 1.0, %v258_v62  ;;  %v325_v12 = vmax.f32 %v293_v2, 0.0 }
  0x4d   :  { %v299_v46 = vsub.f32 1.0, %v267_v43  ;;  %v291_v8 = vsub.f32 1.0, %v259_v63  ;;  %v284_v27 = vsub.f32 1.0, %v252_v24  ;;  %v285_v29 = vsub.f32 1.0, %v253_v25  ;;  %v349_v43 = vld [vmem:[#allocation6 + $0x78] sm:$0xff] }
  0x4e   :  { %1266 = vmatpush.msrb.mxu3 %v333_v44  ;;  %v330_v48 = vmax.f32 %v298_v45, 0.0  ;;  %v322_v13 = vmax.f32 %v290_v7, 0.0  ;;  %v219_v35 = vsub.f32 %v3352_v49, %v3463_v19  ;;  %v3539_v49 = vadd.f32 %v3422_v52, %v3363_v61  ;;  %v350_v61 = vld [vmem:[#allocation6 + $0x80] sm:$0xff] }
  0x4f   :  { %v331_v37 = vmax.f32 %v299_v46, 0.0  ;;  %v323_v14 = vmax.f32 %v291_v8, 0.0  ;;  %v316_v18 = vmax.f32 %v284_v27, 0.0  ;;  %v317_v31 = vmax.f32 %v285_v29, 0.0 }
  0x50   :  { %2967 = vmatmul.msk.f32.gmra.mxu1 %vm366_vm0, %v337_v39  ;;  %927 = vmatpush.msrb.mxu0 %v330_v48  ;;  %v251_v40 = vand.u32 2147483647, %v219_v35  ;;  %v3543_v44 = vadd.f32 %v3422_v52, %v3378_v10  ;;  %v1369_v45 = vsub.f32 0.0, %v3539_v49 }
  0x51   :  { %2999 = vmatmul.msk.f32.gmra.mxu2 %vm366_vm0, %v337_v39  ;;  %1040 = vmatpush.msrb.mxu1 %v331_v37 }
  0x52   :  { %3031 = vmatmul.msk.f32.gmra.mxu3 %vm366_vm0, %v337_v39  ;;  %928 = vmatpush.msrb.mxu0 %v322_v13  ;;  %v250_v39 = vand.u32 2147483647, %v218_v34  ;;  %v283_v1 = vsub.f32 1.0, %v251_v40  ;;  %v1370_v46 = vsub.f32 0.0, %v3543_v44  ;;  %v1377_v10 = vand.u32 2147483647, %v1369_v45 }
  0x53   :  { %2936 = vmatmul.msk.f32.gmra.mxu0 %vm366_vm0, %v338_v57  ;;  %1267 = vmatpush.msrb.mxu3 %v325_v12  ;;  %v1418_v53 = vsub.f32 1.0, %v3543_v44  ;;  %v353_v40 = vld [vmem:[#allocation6 + $0x98] sm:$0xff] }
  0x54   :  { %1041 = vmatpush.msrb.mxu1 %v323_v14  ;;  %1155 = vmatpush.msrb.mxu2 %v316_v18  ;;  %v282_v41 = vsub.f32 1.0, %v250_v39  ;;  %v315_v32 = vmax.f32 %v283_v1, 0.0  ;;  %v1378_v37 = vand.u32 2147483647, %v1370_v46  ;;  %v1385_v50 = vsub.f32 1.0, %v1377_v10 }
  0x55   :  { %1268 = vmatpush.msrb.mxu3 %v317_v31  ;;  %v1426_v0 = vand.u32 2147483647, %v1418_v53  ;;  %v1513_v18 = vsub.f32 3.0, %v3539_v49  ;;  %v1514_v31 = vsub.f32 3.0, %v3543_v44 }
  0x56   :  { %v314_v42 = vmax.f32 %v282_v41, 0.0  ;;  %1042 = vmatpush.msrb.mxu1 %v315_v32  ;;  %v1386_v51 = vsub.f32 1.0, %v1378_v37  ;;  %v1393_v62 = vmax.f32 %v1385_v50, 0.0 }
  0x57   :  { %v1434_v14 = vsub.f32 1.0, %v1426_v0  ;;  %v1522_v32 = vand.u32 2147483647, %v1514_v31  ;;  %v213_v31 = vsub.f32 %v3376_v6, %v3449_v4 }
  0x58   :  { %2968 = vmatmul.msk.f32.gmra.mxu1 %vm366_vm0, %v338_v57  ;;  %929 = vmatpush.msrb.mxu0 %v314_v42  ;;  %v1394_v63 = vmax.f32 %v1386_v51, 0.0  ;;  %v1521_v42 = vand.u32 2147483647, %v1513_v18  ;;  %v1562_v51 = vsub.f32 4.0, %v3543_v44  ;;  %v212_v18 = vsub.f32 %v3376_v6, %v3426_v56 }
  0x59   :  { %3000 = vmatmul.msk.f32.gmra.mxu2 %vm366_vm0, %v338_v57  ;;  %v1530_v50 = vsub.f32 1.0, %v1522_v32 }
  0x5a   :  { %3032 = vmatmul.msk.f32.gmra.mxu3 %vm366_vm0, %v338_v57  ;;  %v1417_v57 = vsub.f32 1.0, %v3539_v49  ;;  %v1529_v37 = vsub.f32 1.0, %v1521_v42 }
  0x5b   :  { %2937 = vmatmul.msk.f32.gmra.mxu0 %vm366_vm0, %v339_v26 }
  0x5c   :  { %v1425_v60 = vand.u32 2147483647, %v1417_v57  ;;  %v1561_v57 = vsub.f32 4.0, %v3539_v49 }
  0x5e   :  { %v1433_v8 = vsub.f32 1.0, %v1425_v60  ;;  %v1569_v0 = vand.u32 2147483647, %v1561_v57 }
  0x60   :  { %2969 = vmatmul.msk.f32.gmra.mxu1 %vm366_vm0, %v339_v26 }
  0x61   :  { %3001 = vmatmul.msk.f32.gmra.mxu2 %vm366_vm0, %v339_v26 }
  0x62   :  { %3033 = vmatmul.msk.f32.gmra.mxu3 %vm366_vm0, %v339_v26 }
  0x63   :  { %2938 = vmatmul.msk.f32.gmra.mxu0 %vm366_vm0, %v340_v9 }
  0x68   :  { %2970 = vmatmul.msk.f32.gmra.mxu1 %vm366_vm0, %v340_v9 }
  0x69   :  { %3002 = vmatmul.msk.f32.gmra.mxu2 %vm366_vm0, %v340_v9 }
  0x6a   :  { %3034 = vmatmul.msk.f32.gmra.mxu3 %vm366_vm0, %v340_v9  ;;  %v1465_v9 = vsub.f32 2.0, %v3539_v49 }
  0x6b   :  { %2939 = vmatmul.msk.f32.gmra.mxu0 %vm366_vm0, %v341_v33 }
  0x70   :  { %2971 = vmatmul.msk.f32.gmra.mxu1 %vm366_vm0, %v341_v33 }
  0x71   :  { %3003 = vmatmul.msk.f32.gmra.mxu2 %vm366_vm0, %v341_v33 }
  0x72   :  { %3035 = vmatmul.msk.f32.gmra.mxu3 %vm366_vm0, %v341_v33  ;;  %v1466_v33 = vsub.f32 2.0, %v3543_v44 }
  0x73   :  { %2940 = vmatmul.msk.f32.gmra.mxu0 %vm366_vm0, %v342_v15 }
  0x78   :  { %2972 = vmatmul.msk.f32.gmra.mxu1 %vm366_vm0, %v342_v15 }
  0x79   :  { %3004 = vmatmul.msk.f32.gmra.mxu2 %vm366_vm0, %v342_v15 }
  0x7a   :  { %3036 = vmatmul.msk.f32.gmra.mxu3 %vm366_vm0, %v342_v15 }
  0x7b   :  { %2941 = vmatmul.msk.f32.gmra.mxu0 %vm366_vm0, %v343_v3 }
  0x80   :  { %2973 = vmatmul.msk.f32.gmra.mxu1 %vm366_vm0, %v343_v3 }
  0x81   :  { %3005 = vmatmul.msk.f32.gmra.mxu2 %vm366_vm0, %v343_v3 }
  0x82   :  { %3037 = vmatmul.msk.f32.gmra.mxu3 %vm366_vm0, %v343_v3  ;;  %v352_v3 = vld [vmem:[#allocation6 + $0x90] sm:$0xff] }
  0x83   :  { %2942 = vmatmul.msk.f32.gmra.mxu0 %vm366_vm0, %v344_v16 }
  0x88   :  { %2974 = vmatmul.msk.f32.gmra.mxu1 %vm366_vm0, %v344_v16 }
  0x89   :  { %3006 = vmatmul.msk.f32.gmra.mxu2 %vm366_vm0, %v344_v16 }
  0x8a   :  { %3038 = vmatmul.msk.f32.gmra.mxu3 %vm366_vm0, %v344_v16  ;;  %v1473_v16 = vand.u32 2147483647, %v1465_v9 }
  0x8b   :  { %2943 = vmatmul.msk.f32.gmra.mxu0 %vm366_vm0, %v345_v20 }
  0x8c   :  { %v1481_v24 = vsub.f32 1.0, %v1473_v16 }
  0x8e   :  { %v1489_v41 = vmax.f32 %v1481_v24, 0.0 }
  0x90   :  { %2975 = vmatmul.msk.f32.gmra.mxu1 %vm366_vm0, %v345_v20 }
  0x91   :  { %3007 = vmatmul.msk.f32.gmra.mxu2 %vm366_vm0, %v345_v20 }
  0x92   :  { %3039 = vmatmul.msk.f32.gmra.mxu3 %vm366_vm0, %v345_v20  ;;  %v1441_v20 = vmax.f32 %v1433_v8, 0.0 }
  0x93   :  { %2944 = vmatmul.msk.f32.gmra.mxu0 %vm366_vm0, %v346_v21 }
  0x98   :  { %2976 = vmatmul.msk.f32.gmra.mxu1 %vm366_vm0, %v346_v21 }
  0x99   :  { %3008 = vmatmul.msk.f32.gmra.mxu2 %vm366_vm0, %v346_v21 }
  0x9a   :  { %3040 = vmatmul.msk.f32.gmra.mxu3 %vm366_vm0, %v346_v21  ;;  %v1442_v21 = vmax.f32 %v1434_v14, 0.0  ;;  %v1577_v14 = vsub.f32 1.0, %v1569_v0  ;;  %v210_v0 = vsub.f32 %v3376_v6, %v3457_v36  ;;  %v1705_v36 = vsub.f32 7.0, %v3539_v49 }
  0x9b   :  { %2945 = vmatmul.msk.f32.gmra.mxu0 %vm366_vm0, %v347_v22 }
  0x9c   :  { %v1585_v24 = vmax.f32 %v1577_v14, 0.0 }
  0xa0   :  { %2977 = vmatmul.msk.f32.gmra.mxu1 %vm366_vm0, %v347_v22 }
  0xa1   :  { %3009 = vmatmul.msk.f32.gmra.mxu2 %vm366_vm0, %v347_v22 }
  0xa2   :  { %3041 = vmatmul.msk.f32.gmra.mxu3 %vm366_vm0, %v347_v22  ;;  %v1474_v22 = vand.u32 2147483647, %v1466_v33  ;;  %v1609_v33 = vsub.f32 5.0, %v3539_v49 }
  0xa3   :  { %2946 = vmatmul.msk.f32.gmra.mxu0 %vm366_vm0, %v348_v30 }
  0xa8   :  { %2978 = vmatmul.msk.f32.gmra.mxu1 %vm366_vm0, %v348_v30 }
  0xa9   :  { %3010 = vmatmul.msk.f32.gmra.mxu2 %vm366_vm0, %v348_v30 }
  0xaa   :  { %3042 = vmatmul.msk.f32.gmra.mxu3 %vm366_vm0, %v348_v30  ;;  %v1482_v30 = vsub.f32 1.0, %v1474_v22 }
  0xab   :  { %2947 = vmatmul.msk.f32.gmra.mxu0 %vm366_vm0, %v349_v43 }
  0xac   :  { %v1490_v1 = vmax.f32 %v1482_v30, 0.0 }
  0xb0   :  { %2979 = vmatmul.msk.f32.gmra.mxu1 %vm366_vm0, %v349_v43  ;;  %v3551_v48 = vpop.f32.mrf.mxu0 }
  0xb1   :  { %3011 = vmatmul.msk.f32.gmra.mxu2 %vm366_vm0, %v349_v43 }
  0xb2   :  { %3043 = vmatmul.msk.f32.gmra.mxu3 %vm366_vm0, %v349_v43 }
  0xb3   :  { %2948 = vmatmul.msk.f32.gmra.mxu0 %vm366_vm0, %v350_v61 }
  0xb5   :  { %v3557_v26 = vpop.f32.mrf.mxu1 }
  0xb8   :  { %2980 = vmatmul.msk.f32.gmra.mxu1 %vm366_vm0, %v350_v61  ;;  %v3561_v54 = vpop.f32.mrf.mxu0 }
  0xb9   :  { %3012 = vmatmul.msk.f32.gmra.mxu2 %vm366_vm0, %v350_v61 }
  0xba   :  { %3044 = vmatmul.msk.f32.gmra.mxu3 %vm366_vm0, %v350_v61 }
  0xbb   :  { %2949 = vmatmul.msk.f32.gmra.mxu0 %vm366_vm0, %v351_v55  ;;  %v706_v2 = vpop.f32.mrf.mxu2 }
  0xbc   :  { %v819_v7 = vpop.f32.mrf.mxu3  ;;  %v1401_v11 = vmul.f32 %v1393_v62, %v706_v2  ;;  %v354_v62 = vld [vmem:[#allocation6 + $0xa0] sm:$0xff]  ;;  %v1538_v2 = vmax.f32 %v1530_v50, 0.0 }
  0xbd   :  { %v1402_v12 = vmul.f32 %v1394_v63, %v819_v7  ;;  %v3567_v13 = vpop.f32.mrf.mxu1  ;;  %v1537_v63 = vmax.f32 %v1529_v37, 0.0  ;;  %v1570_v7 = vand.u32 2147483647, %v1562_v51  ;;  %v356_v51 = vld [vmem:[#allocation6 + $0xb0] sm:$0xff] }
  0xc0   :  { %2981 = vmatmul.msk.f32.gmra.mxu1 %vm366_vm0, %v351_v55  ;;  %v3571_v15 = vpop.f32.mrf.mxu0 }
  0xc1   :  { %3013 = vmatmul.msk.f32.gmra.mxu2 %vm366_vm0, %v351_v55 }
  0xc2   :  { %3045 = vmatmul.msk.f32.gmra.mxu3 %vm366_vm0, %v351_v55 }
  0xc3   :  { %2950 = vmatmul.msk.f32.gmra.mxu0 %vm366_vm0, %v352_v3  ;;  %v709_v5 = vpop.f32.mrf.mxu2 }
  0xc4   :  { %v822_v23 = vpop.f32.mrf.mxu3  ;;  %v1449_v25 = vmul.f32 %v1441_v20, %v709_v5  ;;  %v1578_v20 = vsub.f32 1.0, %v1570_v7 }
  0xc5   :  { %v1450_v27 = vmul.f32 %v1442_v21, %v822_v23  ;;  %v3576_v29 = vpop.f32.mrf.mxu1  ;;  %v355_v23 = vld [vmem:[#allocation6 + $0xa8] sm:$0xff] }
  0xc6   :  { %v1457_v34 = vadd.f32 %v1449_v25, %v1401_v11  ;;  %v1617_v25 = vand.u32 2147483647, %v1609_v33  ;;  %v1586_v30 = vmax.f32 %v1578_v20, 0.0 }
  0xc7   :  { %v1458_v35 = vadd.f32 %v1450_v27, %v1402_v12 }
  0xc8   :  { %2982 = vmatmul.msk.f32.gmra.mxu1 %vm366_vm0, %v352_v3  ;;  %v3581_v39 = vpop.f32.mrf.mxu0 }
  0xc9   :  { %3014 = vmatmul.msk.f32.gmra.mxu2 %vm366_vm0, %v352_v3 }
  0xca   :  { %3046 = vmatmul.msk.f32.gmra.mxu3 %vm366_vm0, %v352_v3  ;;  %v1610_v3 = vsub.f32 5.0, %v3543_v44 }
  0xcb   :  { %2951 = vmatmul.msk.f32.gmra.mxu0 %vm366_vm0, %v353_v40  ;;  %v712_v43 = vpop.f32.mrf.mxu2 }
  0xcc   :  { %v825_v45 = vpop.f32.mrf.mxu3  ;;  %v1497_v46 = vmul.f32 %v1489_v41, %v712_v43  ;;  %v1618_v27 = vand.u32 2147483647, %v1610_v3  ;;  %v245_v41 = vand.u32 2147483647, %v213_v31  ;;  %v1625_v43 = vsub.f32 1.0, %v1617_v25 }
  0xcd   :  { %v1498_v61 = vmul.f32 %v1490_v1, %v825_v45  ;;  %v3586_v10 = vpop.f32.mrf.mxu1  ;;  %v3634_v25 = vadd.f32 %v3422_v52, %v3361_v59 }
  0xce   :  { %v1505_v53 = vadd.f32 %v1497_v46, %v1457_v34  ;;  %v1626_v45 = vsub.f32 1.0, %v1618_v27  ;;  %v277_v37 = vsub.f32 1.0, %v245_v41 }
  0xcf   :  { %v1506_v55 = vadd.f32 %v1498_v61, %v1458_v35  ;;  %v1657_v35 = vsub.f32 6.0, %v3539_v49  ;;  %v1658_v61 = vsub.f32 6.0, %v3543_v44 }
  0xd0   :  { %2983 = vmatmul.msk.f32.gmra.mxu1 %vm366_vm0, %v353_v40  ;;  %v3591_v60 = vpop.f32.mrf.mxu0  ;;  %v1634_v7 = vmax.f32 %v1626_v45, 0.0 }
  0xd1   :  { %3015 = vmatmul.msk.f32.gmra.mxu2 %vm366_vm0, %v353_v40 }
  0xd2   :  { %3047 = vmatmul.msk.f32.gmra.mxu3 %vm366_vm0, %v353_v40  ;;  %v244_v40 = vand.u32 2147483647, %v212_v18 }
  0xd3   :  { %2952 = vmatmul.msk.f32.gmra.mxu0 %vm366_vm0, %v354_v62 }
  0xd4   :  { %v715_v8 = vpop.f32.mrf.mxu2  ;;  %v276_v56 = vsub.f32 1.0, %v244_v40  ;;  %v1713_v40 = vand.u32 2147483647, %v1705_v36 }
  0xd5   :  { %v1545_v9 = vmul.f32 %v1537_v63, %v715_v8  ;;  %v828_v11 = vpop.f32.mrf.mxu3  ;;  %v3596_v12 = vpop.f32.mrf.mxu1  ;;  %v1633_v63 = vmax.f32 %v1625_v43, 0.0  ;;  %v1666_v8 = vand.u32 2147483647, %v1658_v61  ;;  %v1416_v43 = vsub.f32 1.0, %v3634_v25 }
  0xd6   :  { %v1546_v16 = vmul.f32 %v1538_v2, %v828_v11  ;;  %v211_v2 = vsub.f32 %v3376_v6, %v3463_v19  ;;  %v3629_v19 = vadd.f32 %v3422_v52, %v3349_v47  ;;  %v1368_v52 = vsub.f32 0.0, %v3634_v25 }
  0xd7   :  { %v1553_v21 = vadd.f32 %v1545_v9, %v1505_v53  ;;  %v1665_v53 = vand.u32 2147483647, %v1657_v35  ;;  %v242_v9 = vand.u32 2147483647, %v210_v0  ;;  %v357_v35 = vld [vmem:[#allocation6 + $0xb8] sm:$0xff] }
  0xd8   :  { %v1554_v22 = vadd.f32 %v1546_v16, %v1506_v55  ;;  %2984 = vmatmul.msk.f32.gmra.mxu1 %vm366_vm0, %v354_v62  ;;  %v3601_v5 = vpop.f32.mrf.mxu0  ;;  %v308_v55 = vmax.f32 %v276_v56, 0.0  ;;  %v243_v11 = vand.u32 2147483647, %v211_v2  ;;  %v1367_v59 = vsub.f32 0.0, %v3629_v19 }
  0xd9   :  { %3016 = vmatmul.msk.f32.gmra.mxu2 %vm366_vm0, %v354_v62  ;;  %v1673_v33 = vsub.f32 1.0, %v1665_v53 }
  0xda   :  { %3048 = vmatmul.msk.f32.gmra.mxu3 %vm366_vm0, %v354_v62  ;;  %v309_v62 = vmax.f32 %v277_v37, 0.0  ;;  %1156 = vmatpush.msrb.mxu2 %v308_v55  ;;  %v275_v6 = vsub.f32 1.0, %v243_v11  ;;  %v1754_v55 = vsub.f32 8.0, %v3543_v44  ;;  %v358_v11 = vld [vmem:[#allocation6 + $0xc0] sm:$0xff] }
  0xdb   :  { %2953 = vmatmul.msk.f32.gmra.mxu0 %vm366_vm0, %v355_v23  ;;  %v1681_v47 = vmax.f32 %v1673_v33, 0.0 }
  0xdc   :  { %v718_v34 = vpop.f32.mrf.mxu2  ;;  %1269 = vmatpush.msrb.mxu3 %v309_v62  ;;  %v307_v18 = vmax.f32 %v275_v6, 0.0  ;;  %v1375_v62 = vand.u32 2147483647, %v1367_v59 }
  0xdd   :  { %v1593_v1 = vmul.f32 %v1585_v24, %v718_v34  ;;  %v831_v42 = vpop.f32.mrf.mxu3  ;;  %v3611_v32 = vpop.f32.mrf.mxu1  ;;  %v1706_v24 = vsub.f32 7.0, %v3543_v44 }
  0xde   :  { %v1594_v46 = vmul.f32 %v1586_v30, %v831_v42  ;;  %1043 = vmatpush.msrb.mxu1 %v307_v18  ;;  %v1415_v42 = vsub.f32 1.0, %v3629_v19  ;;  %v1383_v6 = vsub.f32 1.0, %v1375_v62  ;;  %v1559_v18 = vsub.f32 4.0, %v3629_v19 }
  0xdf   :  { %v1601_v57 = vadd.f32 %v1593_v1, %v1553_v21  ;;  %v274_v21 = vsub.f32 1.0, %v242_v9  ;;  %v1714_v1 = vand.u32 2147483647, %v1706_v24  ;;  %v1512_v24 = vsub.f32 3.0, %v3634_v25 }
  0xe0   :  { %v1602_v4 = vadd.f32 %v1594_v46, %v1554_v22  ;;  %2985 = vmatmul.msk.f32.gmra.mxu1 %vm366_vm0, %v355_v23  ;;  %v3615_v50 = vpop.f32.mrf.mxu0  ;;  %v1463_v46 = vsub.f32 2.0, %v3629_v19  ;;  %v1423_v2 = vand.u32 2147483647, %v1415_v42 }
  0xe1   :  { %3017 = vmatmul.msk.f32.gmra.mxu2 %vm366_vm0, %v355_v23  ;;  %v306_v30 = vmax.f32 %v274_v21, 0.0  ;;  %v1722_v53 = vsub.f32 1.0, %v1714_v1  ;;  %v1762_v21 = vand.u32 2147483647, %v1754_v55 }
  0xe2   :  { %3049 = vmatmul.msk.f32.gmra.mxu3 %vm366_vm0, %v355_v23  ;;  %v1674_v23 = vsub.f32 1.0, %v1666_v8 }
  0xe3   :  { %2954 = vmatmul.msk.f32.gmra.mxu0 %vm366_vm0, %v356_v51  ;;  %v1730_v36 = vmax.f32 %v1722_v53, 0.0  ;;  %v1567_v53 = vand.u32 2147483647, %v1559_v18 }
  0xe4   :  { %v721_v14 = vpop.f32.mrf.mxu2  ;;  %930 = vmatpush.msrb.mxu0 %v306_v30  ;;  %v1682_v41 = vmax.f32 %v1674_v23, 0.0  ;;  %v1511_v23 = vsub.f32 3.0, %v3629_v19 }
  0xe5   :  { %v1641_v3 = vmul.f32 %v1633_v63, %v721_v14  ;;  %v834_v16 = vpop.f32.mrf.mxu3  ;;  %v3624_v20 = vpop.f32.mrf.mxu1  ;;  %v1376_v63 = vand.u32 2147483647, %v1368_v52  ;;  %v1471_v14 = vand.u32 2147483647, %v1463_v46  ;;  %v1801_v52 = vsub.f32 9.0, %v3539_v49 }
  0xe6   :  { %v1642_v22 = vmul.f32 %v1634_v7, %v834_v16  ;;  %v1424_v7 = vand.u32 2147483647, %v1416_v43  ;;  %v1464_v16 = vsub.f32 2.0, %v3634_v25  ;;  %v1802_v46 = vsub.f32 9.0, %v3543_v44 }
  0xe7   :  { %v1649_v27 = vadd.f32 %v1641_v3, %v1601_v57  ;;  %v1721_v57 = vsub.f32 1.0, %v1713_v40  ;;  %v1479_v40 = vsub.f32 1.0, %v1471_v14  ;;  %v1575_v18 = vsub.f32 1.0, %v1567_v53 }
  0xe8   :  { %v1650_v31 = vadd.f32 %v1642_v22, %v1602_v4  ;;  %2986 = vmatmul.msk.f32.gmra.mxu1 %vm366_vm0, %v356_v51  ;;  %v3637_v34 = vpop.f32.mrf.mxu0  ;;  %v1753_v4 = vsub.f32 8.0, %v3539_v49  ;;  %v1384_v22 = vsub.f32 1.0, %v1376_v63  ;;  %v1432_v30 = vsub.f32 1.0, %v1424_v7 }
  0xe9   :  { %3018 = vmatmul.msk.f32.gmra.mxu2 %vm366_vm0, %v356_v51  ;;  %v1729_v33 = vmax.f32 %v1721_v57, 0.0  ;;  %v1472_v42 = vand.u32 2147483647, %v1464_v16  ;;  %v1607_v57 = vsub.f32 5.0, %v3629_v19 }
  0xea   :  { %3050 = vmatmul.msk.f32.gmra.mxu3 %vm366_vm0, %v356_v51  ;;  %v1761_v3 = vand.u32 2147483647, %v1753_v4  ;;  %v1392_v7 = vmax.f32 %v1384_v22, 0.0  ;;  %v1440_v16 = vmax.f32 %v1432_v30, 0.0  ;;  %v1655_v30 = vsub.f32 6.0, %v3629_v19 }
  0xeb   :  { %2955 = vmatmul.msk.f32.gmra.mxu0 %vm366_vm0, %v357_v35 }
  0xec   :  { %v724_v45 = vpop.f32.mrf.mxu2  ;;  %v1769_v59 = vsub.f32 1.0, %v1761_v3  ;;  %v1809_v3 = vand.u32 2147483647, %v1801_v52  ;;  %v1656_v52 = vsub.f32 6.0, %v3634_v25 }
  0xed   :  { %v1689_v61 = vmul.f32 %v1681_v47, %v724_v45  ;;  %v837_v56 = vpop.f32.mrf.mxu3  ;;  %v3647_v37 = vpop.f32.mrf.mxu1  ;;  %v1770_v45 = vsub.f32 1.0, %v1762_v21  ;;  %v1810_v21 = vand.u32 2147483647, %v1802_v46 }
  0xee   :  { %v1690_v51 = vmul.f32 %v1682_v41, %v837_v56  ;;  %v1520_v56 = vand.u32 2147483647, %v1512_v24  ;;  %v1608_v24 = vsub.f32 5.0, %v3634_v25 }
  0xef   :  { %v1697_v0 = vadd.f32 %v1689_v61, %v1649_v27  ;;  %v1431_v27 = vsub.f32 1.0, %v1423_v2  ;;  %v1519_v61 = vand.u32 2147483647, %v1511_v23  ;;  %v359_v2 = vld [vmem:[#allocation6 + $0xc8] sm:$0xff] }
  0xf0   :  { %v1698_v8 = vadd.f32 %v1690_v51, %v1650_v31  ;;  %2987 = vmatmul.msk.f32.gmra.mxu1 %vm366_vm0, %v357_v35  ;;  %v3652_v9 = vpop.f32.mrf.mxu0  ;;  %v1560_v31 = vsub.f32 4.0, %v3634_v25  ;;  %v1391_v51 = vmax.f32 %v1383_v6, 0.0  ;;  %v1480_v6 = vsub.f32 1.0, %v1472_v42 }
  0xf1   :  { %3019 = vmatmul.msk.f32.gmra.mxu2 %vm366_vm0, %v357_v35  ;;  %v1439_v14 = vmax.f32 %v1431_v27, 0.0  ;;  %v1527_v23 = vsub.f32 1.0, %v1519_v61  ;;  %v1528_v27 = vsub.f32 1.0, %v1520_v56  ;;  %v1616_v61 = vand.u32 2147483647, %v1608_v24 }
  0xf2   :  { %3051 = vmatmul.msk.f32.gmra.mxu3 %vm366_vm0, %v357_v35  ;;  %v1568_v55 = vand.u32 2147483647, %v1560_v31  ;;  %v1399_v22 = vmul.f32 %v1391_v51, %v3551_v48 }
  0xf3   :  { %2956 = vmatmul.msk.f32.gmra.mxu0 %vm366_vm0, %v358_v11  ;;  %v1447_v48 = vmul.f32 %v1439_v14, %v3561_v54  ;;  %v1535_v51 = vmax.f32 %v1527_v23, 0.0  ;;  %v1536_v53 = vmax.f32 %v1528_v27, 0.0  ;;  %v1400_v54 = vmul.f32 %v1392_v7, %v3557_v26 }
  0xf4   :  { %v727_v47 = vpop.f32.mrf.mxu2  ;;  %v1576_v31 = vsub.f32 1.0, %v1568_v55  ;;  %v1664_v14 = vand.u32 2147483647, %v1656_v52  ;;  %v1624_v24 = vsub.f32 1.0, %v1616_v61  ;;  %v1448_v27 = vmul.f32 %v1440_v16, %v3567_v13 }
  0xf5   :  { %v1737_v41 = vmul.f32 %v1729_v33, %v727_v47  ;;  %v840_v35 = vpop.f32.mrf.mxu3  ;;  %v3662_v1 = vpop.f32.mrf.mxu1  ;;  %v1777_v33 = vmax.f32 %v1769_v59, 0.0  ;;  %v1849_v59 = vsub.f32 10.0, %v3539_v49  ;;  %v1704_v26 = vsub.f32 7.0, %v3634_v25 }
  0xf6   :  { %v1738_v43 = vmul.f32 %v1730_v36, %v840_v35  ;;  %v1487_v36 = vmax.f32 %v1479_v40, 0.0  ;;  %v1817_v35 = vsub.f32 1.0, %v1809_v3  ;;  %v360_v3 = vld [vmem:[#allocation6 + $0xd0] sm:$0xff]  ;;  %v3690_v23 = vmax.f32 %v1576_v31, 0.0 }
  0xf7   :  { %v1745_v4 = vadd.f32 %v1737_v41, %v1697_v0  ;;  %v1778_v0 = vmax.f32 %v1770_v45, 0.0  ;;  %v1850_v45 = vsub.f32 10.0, %v3543_v44  ;;  %v1672_v52 = vsub.f32 1.0, %v1664_v14 }
  0xf8   :  { %v1746_v62 = vadd.f32 %v1738_v43, %v1698_v8  ;;  %2988 = vmatmul.msk.f32.gmra.mxu1 %vm366_vm0, %v358_v11  ;;  %v3668_v63 = vpop.f32.mrf.mxu0  ;;  %v1615_v8 = vand.u32 2147483647, %v1607_v57  ;;  %v1818_v43 = vsub.f32 1.0, %v1810_v21  ;;  %v1488_v57 = vmax.f32 %v1480_v6, 0.0 }
  0xf9   :  { %3020 = vmatmul.msk.f32.gmra.mxu2 %vm366_vm0, %v358_v11  ;;  %v1825_v21 = vmax.f32 %v1817_v35, 0.0  ;;  %v1858_v6 = vand.u32 2147483647, %v1850_v45  ;;  %v1898_v13 = vsub.f32 11.0, %v3543_v44  ;;  %v1751_v16 = vsub.f32 8.0, %v3629_v19 }
  0xfa   :  { %3052 = vmatmul.msk.f32.gmra.mxu3 %vm366_vm0, %v358_v11  ;;  %v1623_v46 = vsub.f32 1.0, %v1615_v8  ;;  %v1712_v61 = vand.u32 2147483647, %v1704_v26  ;;  %v1456_v14 = vadd.f32 %v1448_v27, %v1400_v54  ;;  %v1544_v54 = vmul.f32 %v1536_v53, %v3586_v10 }
  0xfb   :  { %2957 = vmatmul.msk.f32.gmra.mxu0 %vm366_vm0, %v359_v2  ;;  %v1759_v26 = vand.u32 2147483647, %v1751_v16  ;;  %v1946_v10 = vsub.f32 12.0, %v3543_v44 }
  0xfc   :  { %v730_v47 = vpop.f32.mrf.mxu2  ;;  %v3692_v8 = vmax.f32 %v1623_v46, 0.0  ;;  %v1720_v27 = vsub.f32 1.0, %v1712_v61 }
  0xfd   :  { %v1785_v40 = vmul.f32 %v1777_v33, %v730_v47  ;;  %v843_v41 = vpop.f32.mrf.mxu3  ;;  %v3676_v11 = vpop.f32.mrf.mxu1  ;;  %v3685_v47 = vmax.f32 %v1575_v18, 0.0  ;;  %v1495_v18 = vmul.f32 %v1487_v36, %v3571_v15  ;;  %v1496_v15 = vmul.f32 %v1488_v57, %v3576_v29 }
  0xfe   :  { %v1786_v42 = vmul.f32 %v1778_v0, %v843_v41  ;;  %v1663_v0 = vand.u32 2147483647, %v1655_v30  ;;  %v1857_v41 = vand.u32 2147483647, %v1849_v59  ;;  %v1703_v30 = vsub.f32 7.0, %v3629_v19 }
  0xff   :  { %v1793_v56 = vadd.f32 %v1785_v40, %v1745_v4  ;;  %v1826_v4 = vmax.f32 %v1818_v43, 0.0  ;;  %v1897_v59 = vsub.f32 11.0, %v3539_v49  ;;  %v1866_v43 = vsub.f32 1.0, %v1858_v6 }
 0x100   :  { %v1794_v55 = vadd.f32 %v1786_v42, %v1746_v62  ;;  %2989 = vmatmul.msk.f32.gmra.mxu1 %vm366_vm0, %v359_v2  ;;  %v3683_v33 = vpop.f32.mrf.mxu0  ;;  %v1455_v62 = vadd.f32 %v1447_v48, %v1399_v22  ;;  %v1865_v31 = vsub.f32 1.0, %v1857_v41  ;;  %v1752_v36 = vsub.f32 8.0, %v3634_v25  ;;  %v361_v41 = vld [vmem:[#allocation6 + $0xd8] sm:$0xff] }
 0x101   :  { %3021 = vmatmul.msk.f32.gmra.mxu2 %vm366_vm0, %v359_v2  ;;  %v3706_v48 = vmax.f32 %v1624_v24, 0.0  ;;  %v1711_v46 = vand.u32 2147483647, %v1703_v30  ;;  %v1905_v57 = vand.u32 2147483647, %v1897_v59  ;;  %v1543_v30 = vmul.f32 %v1535_v51, %v3581_v39 }
 0x102   :  { %3053 = vmatmul.msk.f32.gmra.mxu3 %vm366_vm0, %v359_v2  ;;  %v1671_v2 = vsub.f32 1.0, %v1663_v0  ;;  %v1873_v29 = vmax.f32 %v1865_v31, 0.0  ;;  %v1906_v24 = vand.u32 2147483647, %v1898_v13  ;;  %v1945_v39 = vsub.f32 12.0, %v3539_v49 }
 0x103   :  { %2958 = vmatmul.msk.f32.gmra.mxu0 %vm366_vm0, %v360_v3  ;;  %v1591_v51 = vmul.f32 %v3685_v47, %v3591_v60  ;;  %v1767_v53 = vsub.f32 1.0, %v1759_v26 }
 0x104   :  { %v733_v7 = vpop.f32.mrf.mxu2  ;;  %v3712_v6 = vmax.f32 %v1671_v2, 0.0 }
 0x105   :  { %v1833_v40 = vmul.f32 %v1825_v21, %v733_v7  ;;  %v846_v35 = vpop.f32.mrf.mxu3  ;;  %v3699_v22 = vpop.f32.mrf.mxu1  ;;  %v3714_v7 = vmax.f32 %v1672_v52, 0.0  ;;  %v1913_v52 = vsub.f32 1.0, %v1905_v57  ;;  %v362_v57 = vld [vmem:[#allocation6 + $0xe0] sm:$0xff] }
 0x106   :  { %v1834_v42 = vmul.f32 %v1826_v4, %v846_v35  ;;  %v1503_v4 = vadd.f32 %v1495_v18, %v1455_v62  ;;  %v1719_v62 = vsub.f32 1.0, %v1711_v46  ;;  %v1799_v18 = vsub.f32 9.0, %v3629_v19 }
 0x107   :  { %v1841_v45 = vadd.f32 %v1833_v40, %v1793_v56  ;;  %v1874_v56 = vmax.f32 %v1866_v43, 0.0  ;;  %v1760_v40 = vand.u32 2147483647, %v1752_v36  ;;  %v1800_v35 = vsub.f32 9.0, %v3634_v25 }
 0x108   :  { %v1842_v0 = vadd.f32 %v1834_v42, %v1794_v55  ;;  %2990 = vmatmul.msk.f32.gmra.mxu1 %vm366_vm0, %v360_v3  ;;  %v3709_v21 = vpop.f32.mrf.mxu0  ;;  %v1504_v55 = vadd.f32 %v1496_v15, %v1456_v14  ;;  %v1914_v43 = vsub.f32 1.0, %v1906_v24  ;;  %v1847_v15 = vsub.f32 10.0, %v3629_v19 }
 0x109   :  { %3022 = vmatmul.msk.f32.gmra.mxu2 %vm366_vm0, %v360_v3  ;;  %v1768_v13 = vsub.f32 1.0, %v1760_v40  ;;  %v1551_v36 = vadd.f32 %v1543_v30, %v1503_v4  ;;  %v1727_v46 = vmax.f32 %v1719_v62, 0.0  ;;  %v1807_v61 = vand.u32 2147483647, %v1799_v18 }
 0x10a   :  { %3054 = vmatmul.msk.f32.gmra.mxu3 %vm366_vm0, %v360_v3  ;;  %v1808_v60 = vand.u32 2147483647, %v1800_v35  ;;  %v1921_v47 = vmax.f32 %v1913_v52, 0.0  ;;  %v1552_v24 = vadd.f32 %v1544_v54, %v1504_v55  ;;  %v1954_v4 = vand.u32 2147483647, %v1946_v10 }
 0x10b   :  { %2959 = vmatmul.msk.f32.gmra.mxu0 %vm366_vm0, %v361_v41  ;;  %v1599_v26 = vadd.f32 %v1591_v51, %v1551_v36  ;;  %v3738_v30 = vmax.f32 %v1767_v53, 0.0  ;;  %v3740_v40 = vmax.f32 %v1768_v13, 0.0  ;;  %v1855_v62 = vand.u32 2147483647, %v1847_v15 }
 0x10c   :  { %v736_v2 = vpop.f32.mrf.mxu2  ;;  %v1815_v18 = vsub.f32 1.0, %v1807_v61  ;;  %v1848_v55 = vsub.f32 10.0, %v3634_v25  ;;  %v1816_v35 = vsub.f32 1.0, %v1808_v60  ;;  %v1993_v52 = vsub.f32 13.0, %v3539_v49 }
 0x10d   :  { %v1881_v31 = vmul.f32 %v1873_v29, %v736_v2  ;;  %v849_v3 = vpop.f32.mrf.mxu3  ;;  %v3722_v59 = vpop.f32.mrf.mxu1  ;;  %v3732_v2 = vmax.f32 %v1720_v27, 0.0  ;;  %v1639_v27 = vmul.f32 %v3692_v8, %v3601_v5  ;;  %v1994_v5 = vsub.f32 13.0, %v3543_v44 }
 0x10e   :  { %v1882_v42 = vmul.f32 %v1874_v56, %v849_v3  ;;  %v1953_v56 = vand.u32 2147483647, %v1945_v39  ;;  %v1640_v39 = vmul.f32 %v3706_v48, %v3611_v32  ;;  %v1863_v10 = vsub.f32 1.0, %v1855_v62 }
 0x10f   :  { %v1889_v16 = vadd.f32 %v1881_v31, %v1841_v45  ;;  %v1922_v45 = vmax.f32 %v1914_v43, 0.0  ;;  %v1687_v43 = vmul.f32 %v3712_v6, %v3615_v50  ;;  %v1647_v13 = vadd.f32 %v1639_v27, %v1599_v26 }
 0x110   :  { %v1890_v14 = vadd.f32 %v1882_v42, %v1842_v0  ;;  %2991 = vmatmul.msk.f32.gmra.mxu1 %vm366_vm0, %v361_v41  ;;  %v3730_v29 = vpop.f32.mrf.mxu0  ;;  %v1592_v0 = vmul.f32 %v3690_v23, %v3596_v12  ;;  %v1961_v23 = vsub.f32 1.0, %v1953_v56  ;;  %v1962_v42 = vsub.f32 1.0, %v1954_v4 }
 0x111   :  { %3023 = vmatmul.msk.f32.gmra.mxu2 %vm366_vm0, %v361_v41  ;;  %v1856_v15 = vand.u32 2147483647, %v1848_v55  ;;  %v1823_v32 = vmax.f32 %v1815_v18, 0.0  ;;  %v1896_v48 = vsub.f32 11.0, %v3634_v25  ;;  %v3760_v50 = vmax.f32 %v1816_v35, 0.0 }
 0x112   :  { %3055 = vmatmul.msk.f32.gmra.mxu3 %vm366_vm0, %v361_v41  ;;  %v1895_v41 = vsub.f32 11.0, %v3629_v19  ;;  %v1600_v8 = vadd.f32 %v1592_v0, %v1552_v24  ;;  %v1969_v56 = vmax.f32 %v1961_v23, 0.0  ;;  %v2001_v24 = vand.u32 2147483647, %v1993_v52 }
 0x113   :  { %2960 = vmatmul.msk.f32.gmra.mxu0 %vm366_vm0, %v362_v57  ;;  %v1970_v6 = vmax.f32 %v1962_v42, 0.0  ;;  %v1688_v26 = vmul.f32 %v3714_v7, %v3624_v20  ;;  %v3765_v4 = vmax.f32 %v1863_v10, 0.0  ;;  %v1943_v0 = vsub.f32 12.0, %v3629_v19 }
 0x114   :  { %v739_v54 = vpop.f32.mrf.mxu2  ;;  %v1903_v36 = vand.u32 2147483647, %v1895_v41  ;;  %v1735_v62 = vmul.f32 %v1727_v46, %v3637_v34  ;;  %v1864_v27 = vsub.f32 1.0, %v1856_v15  ;;  %v1944_v55 = vsub.f32 12.0, %v3634_v25  ;;  %v364_v15 = vld [vmem:[#allocation6 + $0xf0] sm:$0xff] }
 0x115   :  { %v1929_v31 = vmul.f32 %v1921_v47, %v739_v54  ;;  %v852_v3 = vpop.f32.mrf.mxu3  ;;  %v3747_v12 = vpop.f32.mrf.mxu1  ;;  %v363_v47 = vld [vmem:[#allocation6 + $0xe8] sm:$0xff]  ;;  %v2041_v20 = vsub.f32 14.0, %v3539_v49  ;;  %v1991_v7 = vsub.f32 13.0, %v3629_v19  ;;  %v1736_v34 = vmul.f32 %v3732_v2, %v3647_v37 }
 0x116   :  { %v1930_v51 = vmul.f32 %v1922_v45, %v852_v3  ;;  %v1648_v45 = vadd.f32 %v1640_v39, %v1600_v8  ;;  %v1911_v18 = vsub.f32 1.0, %v1903_v36  ;;  %v2009_v3 = vsub.f32 1.0, %v2001_v24 }
 0x117   :  { %v1937_v53 = vadd.f32 %v1929_v31, %v1889_v16  ;;  %v2002_v16 = vand.u32 2147483647, %v1994_v5  ;;  %v2042_v39 = vsub.f32 14.0, %v3543_v44  ;;  %v1951_v46 = vand.u32 2147483647, %v1943_v0 }
 0x118   :  { %v1938_v61 = vadd.f32 %v1930_v51, %v1890_v14  ;;  %2992 = vmatmul.msk.f32.gmra.mxu1 %vm366_vm0, %v362_v57  ;;  %v3756_v60 = vpop.f32.mrf.mxu0  ;;  %v1695_v14 = vadd.f32 %v1687_v43, %v1647_v13  ;;  %v1992_v42 = vsub.f32 13.0, %v3634_v25  ;;  %v1696_v5 = vadd.f32 %v1688_v26, %v1648_v45 }
 0x119   :  { %3024 = vmatmul.msk.f32.gmra.mxu2 %vm366_vm0, %v362_v57  ;;  %v2010_v52 = vsub.f32 1.0, %v2002_v16  ;;  %v3779_v8 = vmax.f32 %v1864_v27, 0.0  ;;  %v1952_v43 = vand.u32 2147483647, %v1944_v55  ;;  %v2017_v37 = vmax.f32 %v2009_v3, 0.0 }
 0x11a   :  { %3056 = vmatmul.msk.f32.gmra.mxu3 %vm366_vm0, %v362_v57  ;;  %v1904_v57 = vand.u32 2147483647, %v1896_v48  ;;  %v1743_v36 = vadd.f32 %v1735_v62, %v1695_v14  ;;  %v3784_v48 = vmax.f32 %v1911_v18, 0.0  ;;  %v2049_v2 = vand.u32 2147483647, %v2041_v20 }
 0x11b   :  { %2961 = vmatmul.msk.f32.gmra.mxu0 %vm366_vm0, %v363_v47  ;;  %v2018_v24 = vmax.f32 %v2010_v52, 0.0  ;;  %v2050_v45 = vand.u32 2147483647, %v2042_v39  ;;  %v1959_v16 = vsub.f32 1.0, %v1951_v46  ;;  %v2000_v26 = vand.u32 2147483647, %v1992_v42 }
 0x11c   :  { %v742_v41 = vpop.f32.mrf.mxu2  ;;  %v1784_v14 = vmul.f32 %v3740_v40, %v3662_v1  ;;  %v1960_v0 = vsub.f32 1.0, %v1952_v43  ;;  %v2039_v62 = vsub.f32 14.0, %v3629_v19  ;;  %v2040_v18 = vsub.f32 14.0, %v3634_v25  ;;  %v365_v46 = vld [vmem:[#allocation6 + $0xf8] sm:$0xff] }
 0x11d   :  { %v1977_v54 = vmul.f32 %v1969_v56, %v742_v41  ;;  %v855_v35 = vpop.f32.mrf.mxu3  ;;  %v3771_v31 = vpop.f32.mrf.mxu1  ;;  %v1999_v56 = vand.u32 2147483647, %v1991_v7  ;;  %v2058_v3 = vsub.f32 1.0, %v2050_v45  ;;  %v2090_v1 = vsub.f32 15.0, %v3543_v44 }
 0x11e   :  { %v1978_v23 = vmul.f32 %v1970_v6, %v855_v35  ;;  %v1744_v6 = vadd.f32 %v1736_v34, %v1696_v5  ;;  %v2008_v7 = vsub.f32 1.0, %v2000_v26  ;;  %v3802_v52 = vmax.f32 %v1959_v16, 0.0 }
 0x11f   :  { %v1985_v51 = vadd.f32 %v1977_v54, %v1937_v53  ;;  %v1912_v53 = vsub.f32 1.0, %v1904_v57  ;;  %v2007_v54 = vsub.f32 1.0, %v1999_v56  ;;  %v2048_v39 = vand.u32 2147483647, %v2040_v18 }
 0x120   :  { %v1986_v10 = vadd.f32 %v1978_v23, %v1938_v61  ;;  %2993 = vmatmul.msk.f32.gmra.mxu1 %vm366_vm0, %v363_v47  ;;  %v3782_v13 = vpop.f32.mrf.mxu0  ;;  %v1783_v61 = vmul.f32 %v3738_v30, %v3652_v9  ;;  %v2057_v9 = vsub.f32 1.0, %v2049_v2  ;;  %v2089_v30 = vsub.f32 15.0, %v3539_v49 }
 0x121   :  { %3025 = vmatmul.msk.f32.gmra.mxu2 %vm366_vm0, %v363_v47  ;;  %v3800_v20 = vmax.f32 %v1912_v53, 0.0  ;;  %v1792_v42 = vadd.f32 %v1784_v14, %v1744_v6  ;;  %v3807_v5 = vmax.f32 %v1960_v0, 0.0  ;;  %v3810_v2 = vmax.f32 %v2007_v54, 0.0 }
 0x122   :  { %3057 = vmatmul.msk.f32.gmra.mxu3 %vm366_vm0, %v363_v47  ;;  %v1831_v47 = vmul.f32 %v1823_v32, %v3668_v63  ;;  %v1791_v40 = vadd.f32 %v1783_v61, %v1743_v36  ;;  %v2047_v63 = vand.u32 2147483647, %v2039_v62  ;;  %v2065_v43 = vmax.f32 %v2057_v9, 0.0 }
 0x123   :  { %2962 = vmatmul.msk.f32.gmra.mxu0 %vm366_vm0, %v364_v15  ;;  %v2097_v36 = vand.u32 2147483647, %v2089_v30  ;;  %v1832_v53 = vmul.f32 %v3760_v50, %v3676_v11  ;;  %v3815_v56 = vmax.f32 %v2008_v7, 0.0  ;;  %v2088_v45 = vsub.f32 15.0, %v3634_v25 }
 0x124   :  { %v745_v27 = vpop.f32.mrf.mxu2  ;;  %v1879_v6 = vmul.f32 %v3765_v4, %v3683_v33  ;;  %v2055_v61 = vsub.f32 1.0, %v2047_v63  ;;  %v2056_v16 = vsub.f32 1.0, %v2048_v39  ;;  %v2136_v50 = vsub.f32 16.0, %v3634_v25 }
 0x125   :  { %v2025_v55 = vmul.f32 %v2017_v37, %v745_v27  ;;  %v858_v41 = vpop.f32.mrf.mxu3  ;;  %v3796_v57 = vpop.f32.mrf.mxu1  ;;  %v1839_v37 = vadd.f32 %v1831_v47, %v1791_v40  ;;  %v2105_v11 = vsub.f32 1.0, %v2097_v36  ;;  %v2137_v27 = vsub.f32 16.0, %v3539_v49 }
 0x126   :  { %v2026_v35 = vmul.f32 %v2018_v24, %v858_v41  ;;  %v2087_v24 = vsub.f32 15.0, %v3629_v19  ;;  %v1880_v18 = vmul.f32 %v3779_v8, %v3699_v22  ;;  %v2138_v33 = vsub.f32 16.0, %v3543_v44 }
 0x127   :  { %v2033_v23 = vadd.f32 %v2025_v55, %v1985_v51  ;;  %v2066_v51 = vmax.f32 %v2058_v3, 0.0  ;;  %v1927_v4 = vmul.f32 %v3784_v48, %v3709_v21  ;;  %v2096_v30 = vand.u32 2147483647, %v2088_v45 }
 0x128   :  { %v2034_v32 = vadd.f32 %v2026_v35, %v1986_v10  ;;  %2994 = vmatmul.msk.f32.gmra.mxu1 %vm366_vm0, %v364_v15  ;;  %v3805_v34 = vpop.f32.mrf.mxu0  ;;  %v2098_v10 = vand.u32 2147483647, %v2090_v1  ;;  %v2095_v41 = vand.u32 2147483647, %v2087_v24  ;;  %v1840_v54 = vadd.f32 %v1832_v53, %v1792_v42 }
 0x129   :  { %3026 = vmatmul.msk.f32.gmra.mxu2 %vm366_vm0, %v364_v15  ;;  %v2183_v40 = vsub.f32 17.0, %v3629_v19  ;;  %v1887_v22 = vadd.f32 %v1879_v6, %v1839_v37  ;;  %v2113_v8 = vmax.f32 %v2105_v11, 0.0  ;;  %v2144_v7 = vand.u32 2147483647, %v2136_v50 }
 0x12a   :  { %3058 = vmatmul.msk.f32.gmra.mxu3 %vm366_vm0, %v364_v15  ;;  %v2135_v15 = vsub.f32 16.0, %v3629_v19  ;;  %v2106_v55 = vsub.f32 1.0, %v2098_v10  ;;  %v2145_v63 = vand.u32 2147483647, %v2137_v27  ;;  %v3837_v39 = vmax.f32 %v2055_v61, 0.0 }
 0x12b   :  { %2963 = vmatmul.msk.f32.gmra.mxu0 %vm366_vm0, %v365_v46  ;;  %v3839_v21 = vmax.f32 %v2056_v16, 0.0  ;;  %v1935_v42 = vadd.f32 %v1927_v4, %v1887_v22  ;;  %v2104_v36 = vsub.f32 1.0, %v2096_v30  ;;  %v1928_v37 = vmul.f32 %v3800_v20, %v3722_v59  ;;  %v3194_v22 = vld [vmem:[#allocation6 + $0x8] sm:$0xff] }
 0x12c   :  { %v748_v26 = vpop.f32.mrf.mxu2  ;;  %v2143_v1 = vand.u32 2147483647, %v2135_v15  ;;  %v2114_v48 = vmax.f32 %v2106_v55, 0.0  ;;  %v1975_v10 = vmul.f32 %v3802_v52, %v3730_v29  ;;  %v2191_v24 = vand.u32 2147483647, %v2183_v40 }
 0x12d   :  { %v2073_v14 = vmul.f32 %v2065_v43, %v748_v26  ;;  %v861_v0 = vpop.f32.mrf.mxu3  ;;  %v3823_v62 = vpop.f32.mrf.mxu1  ;;  %v2103_v43 = vsub.f32 1.0, %v2095_v41  ;;  %v2185_v45 = vsub.f32 17.0, %v3539_v49  ;;  %v2152_v26 = vsub.f32 1.0, %v2144_v7 }
 0x12e   :  { %v2074_v47 = vmul.f32 %v2066_v51, %v861_v0  ;;  %v3193_v51 = vld [vmem:[#allocation6] sm:$0xff]  ;;  %v2153_v15 = vsub.f32 1.0, %v2145_v63  ;;  %v2184_v11 = vsub.f32 17.0, %v3634_v25  ;;  %v2186_v59 = vsub.f32 17.0, %v3543_v44 }
 0x12f   :  { %v2081_v9 = vadd.f32 %v2073_v14, %v2033_v23  ;;  %v2146_v23 = vand.u32 2147483647, %v2138_v33  ;;  %v1976_v29 = vmul.f32 %v3807_v5, %v3747_v12  ;;  %v2231_v52 = vsub.f32 18.0, %v3629_v19 }
 0x130   :  { %v2082_v35 = vadd.f32 %v2074_v47, %v2034_v32  ;;  %2995 = vmatmul.msk.f32.gmra.mxu1 %vm366_vm0, %v365_v46  ;;  %v3833_v3 = vpop.f32.mrf.mxu0  ;;  %v1888_v32 = vadd.f32 %v1880_v18, %v1840_v54  ;;  %v2232_v50 = vsub.f32 18.0, %v3634_v25  ;;  %v2111_v27 = vmax.f32 %v2103_v43, 0.0 }
 0x131   :  { %3027 = vmatmul.msk.f32.gmra.mxu2 %vm366_vm0, %v365_v46  ;;  %v2154_v0 = vsub.f32 1.0, %v2146_v23  ;;  %v2199_v55 = vsub.f32 1.0, %v2191_v24  ;;  %v2193_v33 = vand.u32 2147483647, %v2185_v45  ;;  %v1983_v41 = vadd.f32 %v1975_v10, %v1935_v42 }
 0x132   :  { %3059 = vmatmul.msk.f32.gmra.mxu3 %vm366_vm0, %v365_v46  ;;  %v2151_v46 = vsub.f32 1.0, %v2143_v1  ;;  %v1936_v4 = vadd.f32 %v1928_v37, %v1888_v32  ;;  %v3859_v30 = vmax.f32 %v2104_v36, 0.0  ;;  %v2161_v12 = vmax.f32 %v2153_v15, 0.0 }
 0x133   :  { %3060 = vmatmul.msk.f32.vlgmr.msrb.gmra.mxu0 %vm366_vm0, %v3193_v51  ;;  %v2192_v54 = vand.u32 2147483647, %v2184_v11  ;;  %v3865_v40 = vmax.f32 %v2152_v26, 0.0  ;;  %v2240_v7 = vand.u32 2147483647, %v2232_v50  ;;  %v2023_v63 = vmul.f32 %v3810_v2, %v3756_v60 }
 0x134   :  { %v751_v53 = vpop.f32.mrf.mxu2  ;;  %v3862_v5 = vmax.f32 %v2151_v46, 0.0  ;;  %v1984_v1 = vadd.f32 %v1976_v29, %v1936_v4  ;;  %v2201_v32 = vsub.f32 1.0, %v2193_v33  ;;  %v2279_v42 = vsub.f32 19.0, %v3629_v19 }
 0x135   :  { %v2121_v6 = vmul.f32 %v2113_v8, %v751_v53  ;;  %v864_v61 = vpop.f32.mrf.mxu3  ;;  %v3848_v16 = vpop.f32.mrf.mxu1  ;;  %v2239_v8 = vand.u32 2147483647, %v2231_v52  ;;  %v2233_v37 = vsub.f32 18.0, %v3539_v49  ;;  %v2234_v10 = vsub.f32 18.0, %v3543_v44 }
 0x136   :  { %v2122_v14 = vmul.f32 %v2114_v48, %v864_v61  ;;  %v3870_v48 = vmax.f32 %v2199_v55, 0.0  ;;  %v2280_v53 = vsub.f32 19.0, %v3634_v25  ;;  %v2024_v24 = vmul.f32 %v3815_v56, %v3771_v31 }
 0x137   :  { %v2129_v20 = vadd.f32 %v2121_v6, %v2081_v9  ;;  %v2162_v9 = vmax.f32 %v2154_v0, 0.0  ;;  %v2200_v2 = vsub.f32 1.0, %v2192_v54  ;;  %v2071_v46 = vmul.f32 %v3837_v39, %v3782_v13 }
 0x138   :  { %v2130_v18 = vadd.f32 %v2122_v14, %v2082_v35  ;;  %3092 = vmatmul.msk.f32.vlgmr.msrb.gmra.mxu1 %vm366_vm0, %v3193_v51  ;;  %v3857_v47 = vpop.f32.mrf.mxu0  ;;  %v2194_v35 = vand.u32 2147483647, %v2186_v59  ;;  %v2247_v61 = vsub.f32 1.0, %v2239_v8  ;;  %v2248_v26 = vsub.f32 1.0, %v2240_v7 }
 0x139   :  { %3124 = vmatmul.msk.f32.vlgmr.msrb.gmra.mxu2 %vm366_vm0, %v3193_v51  ;;  %v2209_v0 = vmax.f32 %v2201_v32, 0.0  ;;  %v2287_v11 = vand.u32 2147483647, %v2279_v42  ;;  %v2327_v59 = vsub.f32 20.0, %v3629_v19  ;;  %v2031_v29 = vadd.f32 %v2023_v63, %v1983_v41  ;;  %v3195_v41 = vld [vmem:[#allocation6 + $0x10] sm:$0xff] }
 0x13a   :  { %3156 = vmatmul.msk.f32.vlgmr.msrb.gmra.mxu3 %vm366_vm0, %v3193_v51  ;;  %v2202_v45 = vsub.f32 1.0, %v2194_v35  ;;  %v2241_v31 = vand.u32 2147483647, %v2233_v37  ;;  %v2242_v56 = vand.u32 2147483647, %v2234_v10  ;;  %v2032_v50 = vadd.f32 %v2024_v24, %v1984_v1 }
 0x13b   :  { %3061 = vmatmul.msk.f32.gmra.mxu0 %vm366_vm0, %v3194_v22  ;;  %v2288_v52 = vand.u32 2147483647, %v2280_v53  ;;  %v2208_v55 = vmax.f32 %v2200_v2, 0.0  ;;  %v2281_v39 = vsub.f32 19.0, %v3539_v49  ;;  %v2119_v33 = vmul.f32 %v2111_v27, %v3805_v34 }
 0x13c   :  { %v754_v23 = vpop.f32.mrf.mxu2  ;;  %v2210_v13 = vmax.f32 %v2202_v45, 0.0  ;;  %v2255_v4 = vmax.f32 %v2247_v61, 0.0  ;;  %v2295_v54 = vsub.f32 1.0, %v2287_v11  ;;  %v2335_v35 = vand.u32 2147483647, %v2327_v59  ;;  %v3196_v11 = vld [vmem:[#allocation6 + $0x18] sm:$0xff] }
 0x13d   :  { %v2169_v43 = vmul.f32 %v2161_v12, %v754_v23  ;;  %v867_v36 = vpop.f32.mrf.mxu3  ;;  %v3873_v51 = vpop.f32.mrf.mxu1  ;;  %v2282_v1 = vsub.f32 19.0, %v3543_v44  ;;  %v2249_v63 = vsub.f32 1.0, %v2241_v31  ;;  %v2250_v23 = vsub.f32 1.0, %v2242_v56 }
 0x13e   :  { %v2170_v60 = vmul.f32 %v2162_v9, %v867_v36  ;;  %v2256_v9 = vmax.f32 %v2248_v26, 0.0  ;;  %v2296_v32 = vsub.f32 1.0, %v2288_v52  ;;  %v2328_v27 = vsub.f32 20.0, %v3634_v25 }
 0x13f   :  { %v2177_v6 = vadd.f32 %v2169_v43, %v2129_v20  ;;  %v2079_v20 = vadd.f32 %v2071_v46, %v2031_v29  ;;  %v2167_v36 = vmul.f32 %v3862_v5, %v3833_v3  ;;  %v2343_v24 = vsub.f32 1.0, %v2335_v35 }
 0x140   :  { %v2178_v15 = vadd.f32 %v2170_v60, %v2130_v18  ;;  %3093 = vmatmul.msk.f32.gmra.mxu1 %vm366_vm0, %v3194_v22  ;;  %v534_v14 = vpop.f32.mrf.mxu0  ;;  %v2072_v18 = vmul.f32 %v3839_v21, %v3796_v57  ;;  %v2120_v57 = vmul.f32 %v3859_v30, %v3823_v62  ;;  %v2289_v21 = vand.u32 2147483647, %v2281_v39 }
 0x141   :  { %3125 = vmatmul.msk.f32.gmra.mxu2 %vm366_vm0, %v3194_v22  ;;  %v2127_v43 = vadd.f32 %v2119_v33, %v2079_v20  ;;  %v2290_v60 = vand.u32 2147483647, %v2282_v1  ;;  %v2375_v2 = vsub.f32 21.0, %v3629_v19  ;;  %v2215_v62 = vmul.f32 %v3870_v48, %v3857_v47 }
 0x142   :  { %3157 = vmatmul.msk.f32.gmra.mxu3 %vm366_vm0, %v3194_v22  ;;  %v2080_v42 = vadd.f32 %v2072_v18, %v2032_v50  ;;  %v2303_v30 = vmax.f32 %v2295_v54, 0.0  ;;  %v2257_v45 = vmax.f32 %v2249_v63, 0.0  ;;  %v2258_v46 = vmax.f32 %v2250_v23, 0.0 }
 0x143   :  { %3062 = vmatmul.msk.f32.gmra.mxu0 %vm366_vm0, %v3195_v41  ;;  %v2304_v3 = vmax.f32 %v2296_v32, 0.0  ;;  %v2297_v5 = vsub.f32 1.0, %v2289_v21  ;;  %v2175_v26 = vadd.f32 %v2167_v36, %v2127_v43  ;;  %v2329_v47 = vsub.f32 20.0, %v3539_v49 }
 0x144   :  { %v757_v12 = vpop.f32.mrf.mxu2  ;;  %v2128_v61 = vadd.f32 %v2120_v57, %v2080_v42  ;;  %v2351_v59 = vmax.f32 %v2343_v24, 0.0  ;;  %v2298_v29 = vsub.f32 1.0, %v2290_v60  ;;  %v2383_v31 = vand.u32 2147483647, %v2375_v2 }
 0x145   :  { %v2217_v22 = vmul.f32 %v2209_v0, %v757_v12  ;;  %v870_v8 = vpop.f32.mrf.mxu3  ;;  %v647_v7 = vpop.f32.mrf.mxu1  ;;  %v2263_v0 = vmul.f32 %v2255_v4, %v534_v14  ;;  %v2330_v56 = vsub.f32 20.0, %v3543_v44  ;;  %v2223_v52 = vadd.f32 %v2215_v62, %v2175_v26 }
 0x146   :  { %v2218_v34 = vmul.f32 %v2210_v13, %v870_v8  ;;  %v2376_v18 = vsub.f32 21.0, %v3634_v25  ;;  %v2305_v14 = vmax.f32 %v2297_v5, 0.0  ;;  %v2337_v54 = vand.u32 2147483647, %v2329_v47 }
 0x147   :  { %v2225_v37 = vadd.f32 %v2217_v22, %v2177_v6  ;;  %v2336_v6 = vand.u32 2147483647, %v2328_v27  ;;  %v2264_v35 = vmul.f32 %v2256_v9, %v647_v7  ;;  %v2391_v8 = vsub.f32 1.0, %v2383_v31  ;;  %v3197_v7 = vld [vmem:[#allocation6 + $0x20] sm:$0xff] }
 0x148   :  { %v2226_v10 = vadd.f32 %v2218_v34, %v2178_v15  ;;  %3094 = vmatmul.msk.f32.gmra.mxu1 %vm366_vm0, %v3195_v41  ;;  %v537_v53 = vpop.f32.mrf.mxu0  ;;  %v2168_v15 = vmul.f32 %v3865_v40, %v3848_v16  ;;  %v2216_v16 = vmul.f32 %v2208_v55, %v3873_v51  ;;  %v2338_v63 = vand.u32 2147483647, %v2330_v56 }
 0x149   :  { %3126 = vmatmul.msk.f32.gmra.mxu2 %vm366_vm0, %v3195_v41  ;;  %v2311_v50 = vmul.f32 %v2303_v30, %v537_v53  ;;  %v2344_v33 = vsub.f32 1.0, %v2336_v6  ;;  %v2384_v57 = vand.u32 2147483647, %v2376_v18  ;;  %v2423_v51 = vsub.f32 22.0, %v3629_v19 }
 0x14a   :  { %3158 = vmatmul.msk.f32.gmra.mxu3 %vm366_vm0, %v3195_v41  ;;  %v2176_v4 = vadd.f32 %v2168_v15, %v2128_v61  ;;  %v2271_v41 = vadd.f32 %v2263_v0, %v2223_v52  ;;  %v2306_v21 = vmax.f32 %v2298_v29, 0.0  ;;  %v2345_v42 = vsub.f32 1.0, %v2337_v54 }
 0x14b   :  { %3063 = vmatmul.msk.f32.gmra.mxu0 %vm366_vm0, %v3196_v11  ;;  %v2352_v27 = vmax.f32 %v2344_v33, 0.0  ;;  %v2378_v53 = vsub.f32 21.0, %v3543_v44  ;;  %v2399_v62 = vmax.f32 %v2391_v8, 0.0  ;;  %v2392_v30 = vsub.f32 1.0, %v2384_v57 }
 0x14c   :  { %v760_v48 = vpop.f32.mrf.mxu2  ;;  %v2319_v23 = vadd.f32 %v2311_v50, %v2271_v41  ;;  %v2224_v55 = vadd.f32 %v2216_v16, %v2176_v4  ;;  %v2424_v5 = vsub.f32 22.0, %v3634_v25  ;;  %v2471_v31 = vsub.f32 23.0, %v3629_v19 }
 0x14d   :  { %v2265_v13 = vmul.f32 %v2257_v45, %v760_v48  ;;  %v873_v39 = vpop.f32.mrf.mxu3  ;;  %v650_v20 = vpop.f32.mrf.mxu1  ;;  %v2431_v45 = vand.u32 2147483647, %v2423_v51  ;;  %v2386_v47 = vand.u32 2147483647, %v2378_v53  ;;  %v2400_v52 = vmax.f32 %v2392_v30, 0.0 }
 0x14e   :  { %v2266_v40 = vmul.f32 %v2258_v46, %v873_v39  ;;  %v2312_v34 = vmul.f32 %v2304_v3, %v650_v20  ;;  %v2272_v43 = vadd.f32 %v2264_v35, %v2224_v55  ;;  %v2432_v50 = vand.u32 2147483647, %v2424_v5  ;;  %v3198_v39 = vld [vmem:[#allocation6 + $0x28] sm:$0xff] }
 0x14f   :  { %v2273_v12 = vadd.f32 %v2265_v13, %v2225_v37  ;;  %v2346_v37 = vsub.f32 1.0, %v2338_v63  ;;  %v2439_v29 = vsub.f32 1.0, %v2431_v45  ;;  %v2394_v16 = vsub.f32 1.0, %v2386_v47 }
 0x150   :  { %v2274_v1 = vadd.f32 %v2266_v40, %v2226_v10  ;;  %3095 = vmatmul.msk.f32.gmra.mxu1 %vm366_vm0, %v3196_v11  ;;  %v540_v22 = vpop.f32.mrf.mxu0  ;;  %v2377_v10 = vsub.f32 21.0, %v3539_v49  ;;  %v2320_v46 = vadd.f32 %v2312_v34, %v2272_v43  ;;  %v2425_v40 = vsub.f32 22.0, %v3539_v49 }
 0x151   :  { %3127 = vmatmul.msk.f32.gmra.mxu2 %vm366_vm0, %v3196_v11  ;;  %v2359_v32 = vmul.f32 %v2351_v59, %v540_v22  ;;  %v2353_v59 = vmax.f32 %v2345_v42, 0.0  ;;  %v2354_v56 = vmax.f32 %v2346_v37, 0.0  ;;  %v2447_v41 = vmax.f32 %v2439_v29, 0.0  ;;  %v3199_v37 = vld [vmem:[#allocation6 + $0x30] sm:$0xff] }
 0x152   :  { %3159 = vmatmul.msk.f32.gmra.mxu3 %vm366_vm0, %v3196_v11  ;;  %v2385_v11 = vand.u32 2147483647, %v2377_v10  ;;  %v2426_v54 = vsub.f32 22.0, %v3543_v44  ;;  %v2440_v22 = vsub.f32 1.0, %v2432_v50  ;;  %v2472_v8 = vsub.f32 23.0, %v3634_v25 }
 0x153   :  { %v2367_v9 = vadd.f32 %v2359_v32, %v2319_v23  ;;  %3064 = vmatmul.msk.f32.gmra.mxu0 %vm366_vm0, %v3197_v7  ;;  %v2433_v55 = vand.u32 2147483647, %v2425_v40 }
 0x154   :  { %v763_v36 = vpop.f32.mrf.mxu2  ;;  %v2393_v18 = vsub.f32 1.0, %v2385_v11  ;;  %v2448_v42 = vmax.f32 %v2440_v22, 0.0  ;;  %v2480_v43 = vand.u32 2147483647, %v2472_v8 }
 0x155   :  { %v2313_v24 = vmul.f32 %v2305_v14, %v763_v36  ;;  %v876_v60 = vpop.f32.mrf.mxu3  ;;  %v653_v2 = vpop.f32.mrf.mxu1  ;;  %v2441_v53 = vsub.f32 1.0, %v2433_v55 }
 0x156   :  { %v2314_v61 = vmul.f32 %v2306_v21, %v876_v60  ;;  %v2360_v3 = vmul.f32 %v2352_v27, %v653_v2  ;;  %v2401_v51 = vmax.f32 %v2393_v18, 0.0  ;;  %v2434_v27 = vand.u32 2147483647, %v2426_v54  ;;  %v3200_v18 = vld [vmem:[#allocation6 + $0x38] sm:$0xff] }
 0x157   :  { %v2321_v6 = vadd.f32 %v2313_v24, %v2273_v12  ;;  %v2479_v12 = vand.u32 2147483647, %v2471_v31  ;;  %v2473_v24 = vsub.f32 23.0, %v3539_v49  ;;  %v2474_v60 = vsub.f32 23.0, %v3543_v44 }
 0x158   :  { %v2322_v26 = vadd.f32 %v2314_v61, %v2274_v1  ;;  %v2368_v15 = vadd.f32 %v2360_v3, %v2320_v46  ;;  %3096 = vmatmul.msk.f32.gmra.mxu1 %vm366_vm0, %v3197_v7  ;;  %v543_v0 = vpop.f32.mrf.mxu0  ;;  %v2442_v46 = vsub.f32 1.0, %v2434_v27  ;;  %v2449_v31 = vmax.f32 %v2441_v53, 0.0  ;;  %v3201_v53 = vld [vmem:[#allocation6 + $0x40] sm:$0xff] }
 0x159   :  { %3128 = vmatmul.msk.f32.gmra.mxu2 %vm366_vm0, %v3197_v7  ;;  %v2407_v48 = vmul.f32 %v2399_v62, %v543_v0  ;;  %v2487_v21 = vsub.f32 1.0, %v2479_v12 }
 0x15a   :  { %3160 = vmatmul.msk.f32.gmra.mxu3 %vm366_vm0, %v3197_v7  ;;  %v2402_v7 = vmax.f32 %v2394_v16, 0.0  ;;  %v2450_v50 = vmax.f32 %v2442_v46, 0.0 }
 0x15b   :  { %v2415_v13 = vadd.f32 %v2407_v48, %v2367_v9  ;;  %3065 = vmatmul.msk.f32.gmra.mxu0 %vm366_vm0, %v3198_v39  ;;  %v2519_v9 = vsub.f32 24.0, %v3629_v19  ;;  %v2495_v45 = vmax.f32 %v2487_v21, 0.0  ;;  %v2481_v48 = vand.u32 2147483647, %v2473_v24 }
 0x15c   :  { %v766_v20 = vpop.f32.mrf.mxu2 }
 0x15d   :  { %v2361_v14 = vmul.f32 %v2353_v59, %v766_v20  ;;  %v879_v33 = vpop.f32.mrf.mxu3  ;;  %v656_v4 = vpop.f32.mrf.mxu1  ;;  %v2527_v61 = vand.u32 2147483647, %v2519_v9  ;;  %v2482_v59 = vand.u32 2147483647, %v2474_v60  ;;  %v2489_v40 = vsub.f32 1.0, %v2481_v48 }
 0x15e   :  { %v2362_v35 = vmul.f32 %v2354_v56, %v879_v33  ;;  %v2408_v1 = vmul.f32 %v2400_v52, %v656_v4  ;;  %v2567_v52 = vsub.f32 25.0, %v3629_v19  ;;  %v2521_v33 = vsub.f32 24.0, %v3539_v49 }
 0x15f   :  { %v2369_v63 = vadd.f32 %v2361_v14, %v2321_v6  ;;  %v2488_v6 = vsub.f32 1.0, %v2480_v43  ;;  %v2535_v56 = vsub.f32 1.0, %v2527_v61  ;;  %v2490_v14 = vsub.f32 1.0, %v2482_v59 }
 0x160   :  { %v2370_v23 = vadd.f32 %v2362_v35, %v2322_v26  ;;  %v2416_v32 = vadd.f32 %v2408_v1, %v2368_v15  ;;  %3097 = vmatmul.msk.f32.gmra.mxu1 %vm366_vm0, %v3198_v39  ;;  %v546_v57 = vpop.f32.mrf.mxu0  ;;  %v2520_v26 = vsub.f32 24.0, %v3634_v25  ;;  %v2575_v35 = vand.u32 2147483647, %v2567_v52 }
 0x161   :  { %3129 = vmatmul.msk.f32.gmra.mxu2 %vm366_vm0, %v3198_v39  ;;  %v2455_v34 = vmul.f32 %v2447_v41, %v546_v57  ;;  %v2543_v54 = vmax.f32 %v2535_v56, 0.0  ;;  %v2522_v1 = vsub.f32 24.0, %v3543_v44  ;;  %v2529_v21 = vand.u32 2147483647, %v2521_v33 }
 0x162   :  { %3161 = vmatmul.msk.f32.gmra.mxu3 %vm366_vm0, %v3198_v39  ;;  %v2528_v39 = vand.u32 2147483647, %v2520_v26  ;;  %v2583_v9 = vsub.f32 1.0, %v2575_v35  ;;  %v2498_v43 = vmax.f32 %v2490_v14, 0.0 }
 0x163   :  { %v2463_v36 = vadd.f32 %v2455_v34, %v2415_v13  ;;  %3066 = vmatmul.msk.f32.gmra.mxu0 %vm366_vm0, %v3199_v37  ;;  %v2496_v13 = vmax.f32 %v2488_v6, 0.0  ;;  %v2497_v34 = vmax.f32 %v2489_v40, 0.0  ;;  %v2537_v60 = vsub.f32 1.0, %v2529_v21  ;;  %v3202_v40 = vld [vmem:[#allocation6 + $0x48] sm:$0xff] }
 0x164   :  { %v769_v10 = vpop.f32.mrf.mxu2  ;;  %v2591_v61 = vmax.f32 %v2583_v9, 0.0 }
 0x165   :  { %v2409_v2 = vmul.f32 %v2401_v51, %v769_v10  ;;  %v882_v62 = vpop.f32.mrf.mxu3  ;;  %v659_v30 = vpop.f32.mrf.mxu1  ;;  %v2545_v52 = vmax.f32 %v2537_v60, 0.0  ;;  %v3203_v60 = vld [vmem:[#allocation6 + $0x50] sm:$0xff] }
 0x166   :  { %v2410_v3 = vmul.f32 %v2402_v7, %v882_v62  ;;  %v2456_v5 = vmul.f32 %v2448_v42, %v659_v30  ;;  %v2530_v7 = vand.u32 2147483647, %v2522_v1  ;;  %v2615_v42 = vsub.f32 26.0, %v3629_v19 }
 0x167   :  { %v2417_v15 = vadd.f32 %v2409_v2, %v2369_v63  ;;  %v2536_v63 = vsub.f32 1.0, %v2528_v39  ;;  %v2569_v2 = vsub.f32 25.0, %v3539_v49  ;;  %v2570_v62 = vsub.f32 25.0, %v3543_v44 }
 0x168   :  { %v2418_v0 = vadd.f32 %v2410_v3, %v2370_v23  ;;  %v2464_v11 = vadd.f32 %v2456_v5, %v2416_v32  ;;  %3098 = vmatmul.msk.f32.gmra.mxu1 %vm366_vm0, %v3199_v37  ;;  %v549_v47 = vpop.f32.mrf.mxu0  ;;  %v2568_v23 = vsub.f32 25.0, %v3634_v25  ;;  %v2538_v3 = vsub.f32 1.0, %v2530_v7 }
 0x169   :  { %3130 = vmatmul.msk.f32.gmra.mxu2 %vm366_vm0, %v3199_v37  ;;  %v2503_v29 = vmul.f32 %v2495_v45, %v549_v47  ;;  %v2623_v5 = vand.u32 2147483647, %v2615_v42 }
 0x16a   :  { %3162 = vmatmul.msk.f32.gmra.mxu3 %vm366_vm0, %v3199_v37  ;;  %v2576_v37 = vand.u32 2147483647, %v2568_v23  ;;  %v2546_v39 = vmax.f32 %v2538_v3, 0.0 }
 0x16b   :  { %v2511_v20 = vadd.f32 %v2503_v29, %v2463_v36  ;;  %3067 = vmatmul.msk.f32.gmra.mxu0 %vm366_vm0, %v3200_v18  ;;  %v2544_v36 = vmax.f32 %v2536_v63, 0.0  ;;  %v2577_v29 = vand.u32 2147483647, %v2569_v2 }
 0x16c   :  { %v772_v16 = vpop.f32.mrf.mxu2 }
 0x16d   :  { %v2457_v4 = vmul.f32 %v2449_v31, %v772_v16  ;;  %v885_v41 = vpop.f32.mrf.mxu3  ;;  %v662_v12 = vpop.f32.mrf.mxu1  ;;  %v2578_v31 = vand.u32 2147483647, %v2570_v62  ;;  %v2585_v33 = vsub.f32 1.0, %v2577_v29 }
 0x16e   :  { %v2458_v22 = vmul.f32 %v2450_v50, %v885_v41  ;;  %v2504_v8 = vmul.f32 %v2496_v13, %v662_v12  ;;  %v2631_v50 = vsub.f32 1.0, %v2623_v5  ;;  %v2663_v13 = vsub.f32 27.0, %v3629_v19 }
 0x16f   :  { %v2465_v32 = vadd.f32 %v2457_v4, %v2417_v15  ;;  %v2584_v15 = vsub.f32 1.0, %v2576_v37  ;;  %v2586_v4 = vsub.f32 1.0, %v2578_v31  ;;  %v2617_v41 = vsub.f32 26.0, %v3539_v49 }
 0x170   :  { %v2466_v57 = vadd.f32 %v2458_v22, %v2418_v0  ;;  %v2512_v51 = vadd.f32 %v2504_v8, %v2464_v11  ;;  %3099 = vmatmul.msk.f32.gmra.mxu1 %vm366_vm0, %v3200_v18  ;;  %v552_v55 = vpop.f32.mrf.mxu0  ;;  %v2616_v0 = vsub.f32 26.0, %v3634_v25  ;;  %v2639_v1 = vmax.f32 %v2631_v50, 0.0 }
 0x171   :  { %3131 = vmatmul.msk.f32.gmra.mxu2 %vm366_vm0, %v3200_v18  ;;  %v2551_v27 = vmul.f32 %v2543_v54, %v552_v55  ;;  %v2671_v22 = vand.u32 2147483647, %v2663_v13  ;;  %v2618_v8 = vsub.f32 26.0, %v3543_v44  ;;  %v2625_v9 = vand.u32 2147483647, %v2617_v41 }
 0x172   :  { %3163 = vmatmul.msk.f32.gmra.mxu3 %vm366_vm0, %v3200_v18  ;;  %v2624_v18 = vand.u32 2147483647, %v2616_v0  ;;  %v2594_v37 = vmax.f32 %v2586_v4, 0.0 }
 0x173   :  { %v2559_v10 = vadd.f32 %v2551_v27, %v2511_v20  ;;  %3068 = vmatmul.msk.f32.gmra.mxu0 %vm366_vm0, %v3201_v53  ;;  %v2592_v20 = vmax.f32 %v2584_v15, 0.0  ;;  %v2593_v27 = vmax.f32 %v2585_v33, 0.0  ;;  %v2679_v42 = vsub.f32 1.0, %v2671_v22  ;;  %v3204_v33 = vld [vmem:[#allocation6 + $0x58] sm:$0xff] }
 0x174   :  { %v775_v24 = vpop.f32.mrf.mxu2  ;;  %v2633_v62 = vsub.f32 1.0, %v2625_v9 }
 0x175   :  { %v2505_v30 = vmul.f32 %v2497_v34, %v775_v24  ;;  %v888_v45 = vpop.f32.mrf.mxu3  ;;  %v665_v46 = vpop.f32.mrf.mxu1  ;;  %v2687_v5 = vmax.f32 %v2679_v42, 0.0 }
 0x176   :  { %v2506_v6 = vmul.f32 %v2498_v43, %v888_v45  ;;  %v2552_v26 = vmul.f32 %v2544_v36, %v665_v46  ;;  %v2626_v43 = vand.u32 2147483647, %v2618_v8  ;;  %v2711_v36 = vsub.f32 28.0, %v3629_v19 }
 0x177   :  { %v2513_v11 = vadd.f32 %v2505_v30, %v2465_v32  ;;  %v2632_v32 = vsub.f32 1.0, %v2624_v18  ;;  %v2665_v30 = vsub.f32 27.0, %v3539_v49  ;;  %v2666_v45 = vsub.f32 27.0, %v3543_v44 }
 0x178   :  { %v2514_v47 = vadd.f32 %v2506_v6, %v2466_v57  ;;  %v2560_v48 = vadd.f32 %v2552_v26, %v2512_v51  ;;  %3100 = vmatmul.msk.f32.gmra.mxu1 %vm366_vm0, %v3201_v53  ;;  %v555_v59 = vpop.f32.mrf.mxu0  ;;  %v2664_v57 = vsub.f32 27.0, %v3634_v25  ;;  %v2634_v6 = vsub.f32 1.0, %v2626_v43 }
 0x179   :  { %3132 = vmatmul.msk.f32.gmra.mxu2 %vm366_vm0, %v3201_v53  ;;  %v2599_v56 = vmul.f32 %v2591_v61, %v555_v59  ;;  %v2719_v26 = vand.u32 2147483647, %v2711_v36  ;;  %v2641_v13 = vmax.f32 %v2633_v62, 0.0  ;;  %v3205_v62 = vld [vmem:[#allocation6 + $0x60] sm:$0xff] }
 0x17a   :  { %3164 = vmatmul.msk.f32.gmra.mxu3 %vm366_vm0, %v3201_v53  ;;  %v2672_v53 = vand.u32 2147483647, %v2664_v57  ;;  %v2642_v18 = vmax.f32 %v2634_v6, 0.0 }
 0x17b   :  { %v2607_v16 = vadd.f32 %v2599_v56, %v2559_v10  ;;  %3069 = vmatmul.msk.f32.gmra.mxu0 %vm366_vm0, %v3202_v40  ;;  %v2640_v10 = vmax.f32 %v2632_v32, 0.0  ;;  %v2673_v56 = vand.u32 2147483647, %v2665_v30 }
 0x17c   :  { %v778_v14 = vpop.f32.mrf.mxu2 }
 0x17d   :  { %v2553_v12 = vmul.f32 %v2545_v52, %v778_v14  ;;  %v891_v54 = vpop.f32.mrf.mxu3  ;;  %v668_v35 = vpop.f32.mrf.mxu1  ;;  %v2674_v52 = vand.u32 2147483647, %v2666_v45  ;;  %v2681_v41 = vsub.f32 1.0, %v2673_v56 }
 0x17e   :  { %v2554_v63 = vmul.f32 %v2546_v39, %v891_v54  ;;  %v2600_v23 = vmul.f32 %v2592_v20, %v668_v35  ;;  %v2727_v39 = vsub.f32 1.0, %v2719_v26  ;;  %v2759_v20 = vsub.f32 29.0, %v3629_v19 }
 0x17f   :  { %v2561_v51 = vadd.f32 %v2553_v12, %v2513_v11  ;;  %v2680_v11 = vsub.f32 1.0, %v2672_v53  ;;  %v2682_v12 = vsub.f32 1.0, %v2674_v52  ;;  %v2713_v54 = vsub.f32 28.0, %v3539_v49 }
 0x180   :  { %v2562_v55 = vadd.f32 %v2554_v63, %v2514_v47  ;;  %v2608_v34 = vadd.f32 %v2600_v23, %v2560_v48  ;;  %3101 = vmatmul.msk.f32.gmra.mxu1 %vm366_vm0, %v3202_v40  ;;  %v558_v21 = vpop.f32.mrf.mxu0  ;;  %v2712_v47 = vsub.f32 28.0, %v3634_v25  ;;  %v2735_v8 = vmax.f32 %v2727_v39, 0.0 }
 0x181   :  { %3133 = vmatmul.msk.f32.gmra.mxu2 %vm366_vm0, %v3202_v40  ;;  %v2647_v7 = vmul.f32 %v2639_v1, %v558_v21  ;;  %v2767_v63 = vand.u32 2147483647, %v2759_v20  ;;  %v2714_v23 = vsub.f32 28.0, %v3543_v44  ;;  %v2721_v42 = vand.u32 2147483647, %v2713_v54 }
 0x182   :  { %3165 = vmatmul.msk.f32.gmra.mxu3 %vm366_vm0, %v3202_v40  ;;  %v2720_v40 = vand.u32 2147483647, %v2712_v47  ;;  %v2690_v53 = vmax.f32 %v2682_v12, 0.0 }
 0x183   :  { %v2655_v24 = vadd.f32 %v2647_v7, %v2607_v16  ;;  %3070 = vmatmul.msk.f32.gmra.mxu0 %vm366_vm0, %v3203_v60  ;;  %v2688_v16 = vmax.f32 %v2680_v11, 0.0  ;;  %v2689_v7 = vmax.f32 %v2681_v41, 0.0  ;;  %v2775_v36 = vsub.f32 1.0, %v2767_v63  ;;  %v3206_v41 = vld [vmem:[#allocation6 + $0x68] sm:$0xff] }
 0x184   :  { %v781_v2 = vpop.f32.mrf.mxu2  ;;  %v2729_v45 = vsub.f32 1.0, %v2721_v42 }
 0x185   :  { %v2601_v46 = vmul.f32 %v2593_v27, %v781_v2  ;;  %v894_v61 = vpop.f32.mrf.mxu3  ;;  %v671_v3 = vpop.f32.mrf.mxu1  ;;  %v2783_v26 = vmax.f32 %v2775_v36, 0.0 }
 0x186   :  { %v2602_v15 = vmul.f32 %v2594_v37, %v894_v61  ;;  %v2648_v0 = vmul.f32 %v2640_v10, %v671_v3  ;;  %v2722_v37 = vand.u32 2147483647, %v2714_v23  ;;  %v2807_v10 = vsub.f32 30.0, %v3629_v19 }
 0x187   :  { %v2609_v48 = vadd.f32 %v2601_v46, %v2561_v51  ;;  %v2728_v51 = vsub.f32 1.0, %v2720_v40  ;;  %v2761_v46 = vsub.f32 29.0, %v3539_v49  ;;  %v2762_v61 = vsub.f32 29.0, %v3543_v44 }
 0x188   :  { %v2610_v59 = vadd.f32 %v2602_v15, %v2562_v55  ;;  %v2656_v29 = vadd.f32 %v2648_v0, %v2608_v34  ;;  %3102 = vmatmul.msk.f32.gmra.mxu1 %vm366_vm0, %v3203_v60  ;;  %v561_v31 = vpop.f32.mrf.mxu0  ;;  %v2760_v55 = vsub.f32 29.0, %v3634_v25  ;;  %v2730_v15 = vsub.f32 1.0, %v2722_v37 }
 0x189   :  { %3134 = vmatmul.msk.f32.gmra.mxu2 %vm366_vm0, %v3203_v60  ;;  %v2695_v50 = vmul.f32 %v2687_v5, %v561_v31  ;;  %v2815_v0 = vand.u32 2147483647, %v2807_v10  ;;  %v2737_v20 = vmax.f32 %v2729_v45, 0.0 }
 0x18a   :  { %3166 = vmatmul.msk.f32.gmra.mxu3 %vm366_vm0, %v3203_v60  ;;  %v2768_v60 = vand.u32 2147483647, %v2760_v55  ;;  %v2738_v40 = vmax.f32 %v2730_v15, 0.0 }
 0x18b   :  { %v2703_v14 = vadd.f32 %v2695_v50, %v2655_v24  ;;  %3071 = vmatmul.msk.f32.gmra.mxu0 %vm366_vm0, %v3204_v33  ;;  %v2736_v24 = vmax.f32 %v2728_v51, 0.0  ;;  %v2769_v50 = vand.u32 2147483647, %v2761_v46 }
 0x18c   :  { %v784_v4 = vpop.f32.mrf.mxu2 }
 0x18d   :  { %v2649_v35 = vmul.f32 %v2641_v13, %v784_v4  ;;  %v897_v1 = vpop.f32.mrf.mxu3  ;;  %v674_v22 = vpop.f32.mrf.mxu1  ;;  %v2770_v13 = vand.u32 2147483647, %v2762_v61  ;;  %v2777_v54 = vsub.f32 1.0, %v2769_v50 }
 0x18e   :  { %v2650_v32 = vmul.f32 %v2642_v18, %v897_v1  ;;  %v2696_v57 = vmul.f32 %v2688_v16, %v674_v22  ;;  %v2823_v18 = vsub.f32 1.0, %v2815_v0  ;;  %v2855_v16 = vsub.f32 31.0, %v3629_v19 }
 0x18f   :  { %v2657_v34 = vadd.f32 %v2649_v35, %v2609_v48  ;;  %v2776_v48 = vsub.f32 1.0, %v2768_v60  ;;  %v2778_v35 = vsub.f32 1.0, %v2770_v13  ;;  %v2809_v1 = vsub.f32 30.0, %v3539_v49 }
 0x190   :  { %v2658_v21 = vadd.f32 %v2650_v32, %v2610_v59  ;;  %v2704_v27 = vadd.f32 %v2696_v57, %v2656_v29  ;;  %3103 = vmatmul.msk.f32.gmra.mxu1 %vm366_vm0, %v3204_v33  ;;  %v564_v9 = vpop.f32.mrf.mxu0  ;;  %v2808_v59 = vsub.f32 30.0, %v3634_v25  ;;  %v2831_v23 = vmax.f32 %v2823_v18, 0.0 }
 0x191   :  { %3135 = vmatmul.msk.f32.gmra.mxu2 %vm366_vm0, %v3204_v33  ;;  %v2743_v43 = vmul.f32 %v2735_v8, %v564_v9  ;;  %v2863_v32 = vand.u32 2147483647, %v2855_v16  ;;  %v2810_v19 = vsub.f32 30.0, %v3543_v44  ;;  %v2817_v42 = vand.u32 2147483647, %v2809_v1 }
 0x192   :  { %3167 = vmatmul.msk.f32.gmra.mxu3 %vm366_vm0, %v3204_v33  ;;  %v2816_v33 = vand.u32 2147483647, %v2808_v59  ;;  %v2785_v36 = vmax.f32 %v2777_v54, 0.0  ;;  %v1374_v54 = vsub.f32 0.0, %v3452_v28 }
 0x193   :  { %v2751_v2 = vadd.f32 %v2743_v43, %v2703_v14  ;;  %3072 = vmatmul.msk.f32.gmra.mxu0 %vm366_vm0, %v3205_v62  ;;  %v2784_v14 = vmax.f32 %v2776_v48, 0.0  ;;  %v2871_v37 = vsub.f32 1.0, %v2863_v32  ;;  %v2818_v10 = vand.u32 2147483647, %v2810_v19 }
 0x194   :  { %v787_v30 = vpop.f32.mrf.mxu2  ;;  %v2824_v55 = vsub.f32 1.0, %v2816_v33  ;;  %v1373_v33 = vsub.f32 0.0, %v3429_v58  ;;  %v1382_v19 = vand.u32 2147483647, %v1374_v54 }
 0x195   :  { %v2697_v3 = vmul.f32 %v2689_v7, %v787_v30  ;;  %v900_v5 = vpop.f32.mrf.mxu3  ;;  %v677_v6 = vpop.f32.mrf.mxu1  ;;  %v2825_v30 = vsub.f32 1.0, %v2817_v42 }
 0x196   :  { %v2698_v11 = vmul.f32 %v2690_v53, %v900_v5  ;;  %v2744_v47 = vmul.f32 %v2736_v24, %v677_v6  ;;  %v2786_v53 = vmax.f32 %v2778_v35, 0.0  ;;  %v2832_v24 = vmax.f32 %v2824_v55, 0.0 }
 0x197   :  { %v2705_v29 = vadd.f32 %v2697_v3, %v2657_v34  ;;  %v2856_v34 = vsub.f32 31.0, %v3634_v25  ;;  %v3207_v25 = vld [vmem:[#allocation6 + $0x70] sm:$0xff]  ;;  %v2879_v3 = vmax.f32 %v2871_v37, 0.0  ;;  %v2826_v5 = vsub.f32 1.0, %v2818_v10 }
 0x198   :  { %v2706_v31 = vadd.f32 %v2698_v11, %v2658_v21  ;;  %v2752_v56 = vadd.f32 %v2744_v47, %v2704_v27  ;;  %3104 = vmatmul.msk.f32.gmra.mxu1 %vm366_vm0, %v3205_v62  ;;  %v567_v52 = vpop.f32.mrf.mxu0  ;;  %v2857_v6 = vsub.f32 31.0, %v3539_v49  ;;  %v2858_v11 = vsub.f32 31.0, %v3543_v44 }
 0x199   :  { %3136 = vmatmul.msk.f32.gmra.mxu2 %vm366_vm0, %v3205_v62  ;;  %v2791_v39 = vmul.f32 %v2783_v26, %v567_v52  ;;  %v2864_v60 = vand.u32 2147483647, %v2856_v34  ;;  %v2834_v50 = vmax.f32 %v2826_v5, 0.0  ;;  %v1390_v42 = vsub.f32 1.0, %v1382_v19 }
 0x19a   :  { %3168 = vmatmul.msk.f32.gmra.mxu3 %vm366_vm0, %v3205_v62  ;;  %v2865_v52 = vand.u32 2147483647, %v2857_v6  ;;  %v2866_v13 = vand.u32 2147483647, %v2858_v11 }
 0x19b   :  { %v2799_v4 = vadd.f32 %v2791_v39, %v2751_v2  ;;  %3073 = vmatmul.msk.f32.gmra.mxu0 %vm366_vm0, %v3206_v41  ;;  %v2872_v0 = vsub.f32 1.0, %v2864_v60  ;;  %v1398_v60 = vmax.f32 %v1390_v42, 0.0  ;;  %v1516_v42 = vsub.f32 3.0, %v3466_v38 }
 0x19c   :  { %v790_v12 = vpop.f32.mrf.mxu2 }
 0x19d   :  { %v2745_v22 = vmul.f32 %v2737_v20, %v790_v12  ;;  %v903_v8 = vpop.f32.mrf.mxu3  ;;  %v680_v63 = vpop.f32.mrf.mxu1  ;;  %v2880_v49 = vmax.f32 %v2872_v0, 0.0  ;;  %v3208_v20 = vld [vmem:[#allocation6 + $0x78] sm:$0xff]  ;;  %v2874_v12 = vsub.f32 1.0, %v2866_v13 }
 0x19e   :  { %v2746_v57 = vmul.f32 %v2738_v40, %v903_v8  ;;  %v2792_v51 = vmul.f32 %v2784_v14, %v680_v63  ;;  %v2873_v14 = vsub.f32 1.0, %v2865_v52 }
 0x19f   :  { %v2753_v21 = vadd.f32 %v2745_v22, %v2705_v29  ;;  %v2882_v32 = vmax.f32 %v2874_v12, 0.0 }
 0x1a0   :  { %v2754_v27 = vadd.f32 %v2746_v57, %v2706_v31  ;;  %v2800_v9 = vadd.f32 %v2792_v51, %v2752_v56  ;;  %3105 = vmatmul.msk.f32.gmra.mxu1 %vm366_vm0, %v3206_v41  ;;  %v570_v7 = vpop.f32.mrf.mxu0  ;;  %v2833_v56 = vmax.f32 %v2825_v30, 0.0  ;;  %v2881_v63 = vmax.f32 %v2873_v14, 0.0  ;;  %v3209_v57 = vld [vmem:[#allocation6 + $0x80] sm:$0xff] }
 0x1a1   :  { %3137 = vmatmul.msk.f32.gmra.mxu2 %vm366_vm0, %v3206_v41  ;;  %v2839_v43 = vmul.f32 %v2831_v23, %v570_v7  ;;  %v1381_v23 = vand.u32 2147483647, %v1373_v33  ;;  %v1467_v33 = vsub.f32 2.0, %v3460_v17 }
 0x1a2   :  { %3169 = vmatmul.msk.f32.gmra.mxu3 %vm366_vm0, %v3206_v41 }
 0x1a3   :  { %v2847_v2 = vadd.f32 %v2839_v43, %v2799_v4  ;;  %3074 = vmatmul.msk.f32.gmra.mxu0 %vm366_vm0, %v3207_v25  ;;  %v1422_v43 = vsub.f32 1.0, %v3452_v28 }
 0x1a4   :  { %v793_v62 = vpop.f32.mrf.mxu2 }
 0x1a5   :  { %v2793_v45 = vmul.f32 %v2785_v36, %v793_v62  ;;  %v906_v46 = vpop.f32.mrf.mxu3  ;;  %v683_v61 = vpop.f32.mrf.mxu1 }
 0x1a6   :  { %v2794_v26 = vmul.f32 %v2786_v53, %v906_v46  ;;  %v2840_v15 = vmul.f32 %v2832_v24, %v683_v61 }
 0x1a7   :  { %v2801_v47 = vadd.f32 %v2793_v45, %v2753_v21 }
 0x1a8   :  { %v2802_v48 = vadd.f32 %v2794_v26, %v2754_v27  ;;  %v2848_v59 = vadd.f32 %v2840_v15, %v2800_v9  ;;  %3106 = vmatmul.msk.f32.gmra.mxu1 %vm366_vm0, %v3207_v25  ;;  %v573_v29 = vpop.f32.mrf.mxu0  ;;  %v1389_v27 = vsub.f32 1.0, %v1381_v23  ;;  %v1421_v9 = vsub.f32 1.0, %v3429_v58 }
 0x1a9   :  { %3138 = vmatmul.msk.f32.gmra.mxu2 %vm366_vm0, %v3207_v25  ;;  %v2887_v31 = vmul.f32 %v2879_v3, %v573_v29  ;;  %v1469_v3 = vsub.f32 2.0, %v3429_v58  ;;  %v1470_v26 = vsub.f32 2.0, %v3452_v28  ;;  %v3211_v29 = vld [vmem:[#allocation6 + $0x90] sm:$0xff] }
 0x1aa   :  { %3170 = vmatmul.msk.f32.gmra.mxu3 %vm366_vm0, %v3207_v25  ;;  %v1397_v53 = vmax.f32 %v1389_v27, 0.0  ;;  %v1429_v24 = vand.u32 2147483647, %v1421_v9  ;;  %v3210_v25 = vld [vmem:[#allocation6 + $0x88] sm:$0xff]  ;;  %v1515_v9 = vsub.f32 3.0, %v3460_v17 }
 0x1ab   :  { %v2895_v39 = vadd.f32 %v2887_v31, %v2847_v2  ;;  %3075 = vmatmul.msk.f32.gmra.mxu0 %vm366_vm0, %v3208_v20  ;;  %v1430_v2 = vand.u32 2147483647, %v1422_v43  ;;  %v1477_v11 = vand.u32 2147483647, %v1469_v3  ;;  %v1372_v31 = vsub.f32 0.0, %v3466_v38 }
 0x1ac   :  { %v796_v44 = vpop.f32.mrf.mxu2  ;;  %v1437_v61 = vsub.f32 1.0, %v1429_v24 }
 0x1ad   :  { %2903 = vst [vmem:[#allocation7] sm:$0xff] %v2895_v39  ;;  %v2841_v18 = vmul.f32 %v2833_v56, %v796_v44  ;;  %v909_v16 = vpop.f32.mrf.mxu3  ;;  %v686_v40 = vpop.f32.mrf.mxu1  ;;  %v1438_v6 = vsub.f32 1.0, %v1430_v2  ;;  %v1419_v56 = vsub.f32 1.0, %v3460_v17  ;;  %v1485_v39 = vsub.f32 1.0, %v1477_v11 }
 0x1ae   :  { %v2842_v4 = vmul.f32 %v2834_v50, %v909_v16  ;;  %v2888_v41 = vmul.f32 %v2880_v49, %v686_v40  ;;  %v1445_v0 = vmax.f32 %v1437_v61, 0.0  ;;  %v1420_v44 = vsub.f32 1.0, %v3466_v38 }
 0x1af   :  { %v2849_v35 = vadd.f32 %v2841_v18, %v2801_v47  ;;  %v1446_v47 = vmax.f32 %v1438_v6, 0.0  ;;  %v1518_v40 = vsub.f32 3.0, %v3452_v28  ;;  %v1427_v12 = vand.u32 2147483647, %v1419_v56 }
 0x1b0   :  { %v2850_v1 = vadd.f32 %v2842_v4, %v2802_v48  ;;  %v2896_v22 = vadd.f32 %v2888_v41, %v2848_v59  ;;  %3107 = vmatmul.msk.f32.gmra.mxu1 %vm366_vm0, %v3208_v20  ;;  %v4003_v8 = vpop.f32.mrf.mxu0  ;;  %v1478_v48 = vand.u32 2147483647, %v1470_v26  ;;  %v1371_v59 = vsub.f32 0.0, %v3460_v17 }
 0x1b1   :  { %3139 = vmatmul.msk.f32.gmra.mxu2 %vm366_vm0, %v3208_v20  ;;  %v1380_v41 = vand.u32 2147483647, %v1372_v31  ;;  %v1435_v27 = vsub.f32 1.0, %v1427_v12  ;;  %v1523_v6 = vand.u32 2147483647, %v1515_v9 }
 0x1b2   :  { %2904 = vst [vmem:[#allocation7 + $0x8] sm:$0xff] %v2896_v22  ;;  %3171 = vmatmul.msk.f32.gmra.mxu3 %vm366_vm0, %v3208_v20  ;;  %v1517_v20 = vsub.f32 3.0, %v3429_v58  ;;  %v1486_v16 = vsub.f32 1.0, %v1478_v48  ;;  %v1379_v14 = vand.u32 2147483647, %v1371_v59 }
 0x1b3   :  { %3076 = vmatmul.msk.f32.gmra.mxu0 %vm366_vm0, %v3209_v57 }
 0x1b4   :  { %v799_v51 = vpop.f32.mrf.mxu2  ;;  %v1525_v22 = vand.u32 2147483647, %v1517_v20  ;;  %v1494_v23 = vmax.f32 %v1486_v16, 0.0  ;;  %v1387_v19 = vsub.f32 1.0, %v1379_v14 }
 0x1b5   :  { %v2889_v55 = vmul.f32 %v2881_v63, %v799_v51  ;;  %v912_v34 = vpop.f32.mrf.mxu3  ;;  %v4008_v21 = vpop.f32.mrf.mxu1  ;;  %v1428_v63 = vand.u32 2147483647, %v1420_v44  ;;  %v1468_v51 = vsub.f32 2.0, %v3466_v38 }
 0x1b6   :  { %v2890_v7 = vmul.f32 %v2882_v32, %v912_v34  ;;  %v1526_v32 = vand.u32 2147483647, %v1518_v40  ;;  %v1388_v34 = vsub.f32 1.0, %v1380_v41  ;;  %v1533_v24 = vsub.f32 1.0, %v1525_v22 }
 0x1b7   :  { %v2897_v36 = vadd.f32 %v2889_v55, %v2849_v35  ;;  %v3212_v55 = vld [vmem:[#allocation6 + $0x98] sm:$0xff]  ;;  %v1436_v2 = vsub.f32 1.0, %v1428_v63  ;;  %v1476_v61 = vand.u32 2147483647, %v1468_v51  ;;  %v1395_v31 = vmax.f32 %v1387_v19, 0.0 }
 0x1b8   :  { %v2898_v37 = vadd.f32 %v2890_v7, %v2850_v1  ;;  %3108 = vmatmul.msk.f32.gmra.mxu1 %vm366_vm0, %v3209_v57  ;;  %v4013_v10 = vpop.f32.mrf.mxu0  ;;  %v1493_v1 = vmax.f32 %v1485_v39, 0.0  ;;  %v1541_v59 = vmax.f32 %v1533_v24, 0.0  ;;  %v1396_v56 = vmax.f32 %v1388_v34, 0.0 }
 0x1b9   :  { %2905 = vst [vmem:[#allocation7 + $0x10] sm:$0xff] %v2897_v36  ;;  %3140 = vmatmul.msk.f32.gmra.mxu2 %vm366_vm0, %v3209_v57  ;;  %v1444_v39 = vmax.f32 %v1436_v2, 0.0  ;;  %v1484_v16 = vsub.f32 1.0, %v1476_v61  ;;  %v1531_v40 = vsub.f32 1.0, %v1523_v6  ;;  %v1612_v19 = vsub.f32 5.0, %v3466_v38 }
 0x1ba   :  { %2906 = vst [vmem:[#allocation7 + $0x18] sm:$0xff] %v2898_v37  ;;  %3172 = vmatmul.msk.f32.gmra.mxu3 %vm366_vm0, %v3209_v57  ;;  %v1475_v57 = vand.u32 2147483647, %v1467_v33  ;;  %v1659_v34 = vsub.f32 6.0, %v3460_v17  ;;  %v1404_v61 = vmul.f32 %v1396_v56, %v4008_v21  ;;  %v1661_v21 = vsub.f32 6.0, %v3429_v58 }
 0x1bb   :  { %3077 = vmatmul.msk.f32.gmra.mxu0 %vm366_vm0, %v3210_v25  ;;  %v1492_v9 = vmax.f32 %v1484_v16, 0.0  ;;  %v1539_v24 = vmax.f32 %v1531_v40, 0.0  ;;  %v1662_v56 = vsub.f32 6.0, %v3452_v28 }
 0x1bc   :  { %v1158_v62 = vpop.f32.mrf.mxu2 }
 0x1bd   :  { %v1405_v30 = vmul.f32 %v1397_v53, %v1158_v62  ;;  %v1271_v45 = vpop.f32.mrf.mxu3  ;;  %v4018_v46 = vpop.f32.mrf.mxu1  ;;  %v1563_v53 = vsub.f32 4.0, %v3460_v17  ;;  %v1534_v62 = vsub.f32 1.0, %v1526_v32 }
 0x1be   :  { %v1406_v5 = vmul.f32 %v1398_v60, %v1271_v45  ;;  %v1565_v60 = vsub.f32 4.0, %v3429_v58  ;;  %v1483_v45 = vsub.f32 1.0, %v1475_v57  ;;  %v1614_v57 = vsub.f32 5.0, %v3452_v28 }
 0x1bf   :  { %v1571_v48 = vand.u32 2147483647, %v1563_v53  ;;  %v1403_v53 = vmul.f32 %v1395_v31, %v4003_v8  ;;  %v1667_v8 = vand.u32 2147483647, %v1659_v34 }
 0x1c0   :  { %3109 = vmatmul.msk.f32.gmra.mxu1 %vm366_vm0, %v3210_v25  ;;  %v4023_v15 = vpop.f32.mrf.mxu0  ;;  %v1491_v20 = vmax.f32 %v1483_v45, 0.0  ;;  %v1622_v45 = vand.u32 2147483647, %v1614_v57 }
 0x1c1   :  { %3141 = vmatmul.msk.f32.gmra.mxu2 %vm366_vm0, %v3210_v25  ;;  %v1579_v12 = vsub.f32 1.0, %v1571_v48 }
 0x1c2   :  { %3173 = vmatmul.msk.f32.gmra.mxu3 %vm366_vm0, %v3210_v25  ;;  %v1499_v16 = vmul.f32 %v1491_v20, %v4023_v15  ;;  %v1709_v20 = vsub.f32 7.0, %v3429_v58 }
 0x1c3   :  { %3078 = vmatmul.msk.f32.gmra.mxu0 %vm366_vm0, %v3211_v29 }
 0x1c4   :  { %v1161_v52 = vpop.f32.mrf.mxu2 }
 0x1c5   :  { %v1453_v50 = vmul.f32 %v1445_v0, %v1161_v52  ;;  %v1274_v49 = vpop.f32.mrf.mxu3  ;;  %v4031_v13 = vpop.f32.mrf.mxu1  ;;  %v1524_v0 = vand.u32 2147483647, %v1516_v42  ;;  %v1542_v52 = vmax.f32 %v1534_v62, 0.0 }
 0x1c6   :  { %v1454_v18 = vmul.f32 %v1446_v47, %v1274_v49  ;;  %v1611_v47 = vsub.f32 5.0, %v3460_v17  ;;  %v1443_v49 = vmax.f32 %v1435_v27, 0.0  ;;  %v1660_v27 = vsub.f32 6.0, %v3466_v38 }
 0x1c7   :  { %v1461_v4 = vadd.f32 %v1453_v50, %v1405_v30  ;;  %v1566_v30 = vsub.f32 4.0, %v3452_v28  ;;  %v1532_v41 = vsub.f32 1.0, %v1524_v0 }
 0x1c8   :  { %v1462_v54 = vadd.f32 %v1454_v18, %v1406_v5  ;;  %3110 = vmatmul.msk.f32.gmra.mxu1 %vm366_vm0, %v3211_v29  ;;  %v4038_v35 = vpop.f32.mrf.mxu0  ;;  %v1564_v5 = vsub.f32 4.0, %v3466_v38  ;;  %v3213_v18 = vld [vmem:[#allocation6 + $0xa0] sm:$0xff]  ;;  %v1619_v33 = vand.u32 2147483647, %v1611_v47  ;;  %v1668_v6 = vand.u32 2147483647, %v1660_v27 }
 0x1c9   :  { %3142 = vmatmul.msk.f32.gmra.mxu2 %vm366_vm0, %v3211_v29  ;;  %v1574_v50 = vand.u32 2147483647, %v1566_v30  ;;  %v1620_v30 = vand.u32 2147483647, %v1612_v19  ;;  %v3215_v27 = vld [vmem:[#allocation6 + $0xb0] sm:$0xff] }
 0x1ca   :  { %3174 = vmatmul.msk.f32.gmra.mxu3 %vm366_vm0, %v3211_v29  ;;  %v1573_v29 = vand.u32 2147483647, %v1565_v60  ;;  %v1572_v44 = vand.u32 2147483647, %v1564_v5  ;;  %v4070_v60 = vmax.f32 %v1532_v41, 0.0  ;;  %v3214_v5 = vld [vmem:[#allocation6 + $0xa8] sm:$0xff] }
 0x1cb   :  { %3079 = vmatmul.msk.f32.gmra.mxu0 %vm366_vm0, %v3212_v55  ;;  %v1582_v32 = vsub.f32 1.0, %v1574_v50  ;;  %v1708_v50 = vsub.f32 7.0, %v3466_v38 }
 0x1cc   :  { %v1164_v7 = vpop.f32.mrf.mxu2  ;;  %v1581_v63 = vsub.f32 1.0, %v1573_v29 }
 0x1cd   :  { %v1501_v43 = vmul.f32 %v1493_v1, %v1164_v7  ;;  %v1277_v36 = vpop.f32.mrf.mxu3  ;;  %v4046_v37 = vpop.f32.mrf.mxu1  ;;  %v1590_v62 = vmax.f32 %v1582_v32, 0.0 }
 0x1ce   :  { %v1502_v25 = vmul.f32 %v1494_v23, %v1277_v36  ;;  %v1589_v2 = vmax.f32 %v1581_v63, 0.0 }
 0x1cf   :  { %v1509_v3 = vadd.f32 %v1501_v43, %v1461_v4  ;;  %v1613_v4 = vsub.f32 5.0, %v3429_v58  ;;  %v1627_v43 = vsub.f32 1.0, %v1619_v33  ;;  %v1676_v33 = vsub.f32 1.0, %v1668_v6 }
 0x1d0   :  { %v1510_v26 = vadd.f32 %v1502_v25, %v1462_v54  ;;  %3111 = vmatmul.msk.f32.gmra.mxu1 %vm366_vm0, %v3212_v55  ;;  %v4053_v11 = vpop.f32.mrf.mxu0  ;;  %v4073_v25 = vmax.f32 %v1579_v12, 0.0 }
 0x1d1   :  { %3143 = vmatmul.msk.f32.gmra.mxu2 %vm366_vm0, %v3212_v55  ;;  %v1621_v36 = vand.u32 2147483647, %v1613_v4  ;;  %v4081_v0 = vmax.f32 %v1627_v43, 0.0  ;;  %v1684_v43 = vmax.f32 %v1676_v33, 0.0 }
 0x1d2   :  { %3175 = vmatmul.msk.f32.gmra.mxu3 %vm366_vm0, %v3212_v55  ;;  %v1580_v55 = vsub.f32 1.0, %v1572_v44  ;;  %v1452_v44 = vmul.f32 %v1444_v39, %v4018_v46  ;;  %v1669_v46 = vand.u32 2147483647, %v1661_v21  ;;  %v1670_v39 = vand.u32 2147483647, %v1662_v56 }
 0x1d3   :  { %3080 = vmatmul.msk.f32.gmra.mxu0 %vm366_vm0, %v3213_v18  ;;  %v1629_v48 = vsub.f32 1.0, %v1621_v36  ;;  %v1803_v56 = vsub.f32 9.0, %v3460_v17 }
 0x1d4   :  { %v1167_v14 = vpop.f32.mrf.mxu2  ;;  %v1460_v32 = vadd.f32 %v1452_v44, %v1404_v61  ;;  %v1677_v61 = vsub.f32 1.0, %v1669_v46 }
 0x1d5   :  { %v1549_v54 = vmul.f32 %v1541_v59, %v1167_v14  ;;  %v1280_v1 = vpop.f32.mrf.mxu3  ;;  %v4060_v22 = vpop.f32.mrf.mxu1  ;;  %v1707_v59 = vsub.f32 7.0, %v3460_v17  ;;  %v1675_v14 = vsub.f32 1.0, %v1667_v8  ;;  %v1637_v12 = vmax.f32 %v1629_v48, 0.0 }
 0x1d6   :  { %v1550_v23 = vmul.f32 %v1542_v52, %v1280_v1  ;;  %v1755_v1 = vsub.f32 8.0, %v3460_v17 }
 0x1d7   :  { %v1557_v51 = vadd.f32 %v1549_v54, %v1509_v3  ;;  %v4077_v3 = vmax.f32 %v1580_v55, 0.0  ;;  %v1715_v54 = vand.u32 2147483647, %v1707_v59  ;;  %v1547_v55 = vmul.f32 %v1539_v24, %v4038_v35 }
 0x1d8   :  { %v1558_v7 = vadd.f32 %v1550_v23, %v1510_v26  ;;  %3112 = vmatmul.msk.f32.gmra.mxu1 %vm366_vm0, %v3213_v18  ;;  %v4067_v42 = vpop.f32.mrf.mxu0  ;;  %v1451_v26 = vmul.f32 %v1443_v49, %v4013_v10  ;;  %v1628_v10 = vsub.f32 1.0, %v1620_v30  ;;  %v1630_v49 = vsub.f32 1.0, %v1622_v45 }
 0x1d9   :  { %3144 = vmatmul.msk.f32.gmra.mxu2 %vm366_vm0, %v3213_v18  ;;  %v1716_v23 = vand.u32 2147483647, %v1708_v50  ;;  %v1683_v34 = vmax.f32 %v1675_v14, 0.0  ;;  %v1723_v36 = vsub.f32 1.0, %v1715_v54  ;;  %v1756_v24 = vsub.f32 8.0, %v3466_v38  ;;  %v3216_v14 = vld [vmem:[#allocation6 + $0xb8] sm:$0xff] }
 0x1da   :  { %3176 = vmatmul.msk.f32.gmra.mxu3 %vm366_vm0, %v3213_v18  ;;  %v1459_v63 = vadd.f32 %v1451_v26, %v1403_v53  ;;  %v1636_v19 = vmax.f32 %v1628_v10, 0.0  ;;  %v1638_v15 = vmax.f32 %v1630_v49, 0.0  ;;  %v1763_v53 = vand.u32 2147483647, %v1755_v1 }
 0x1db   :  { %3081 = vmatmul.msk.f32.gmra.mxu0 %vm366_vm0, %v3214_v5  ;;  %v1724_v8 = vsub.f32 1.0, %v1716_v23  ;;  %v1685_v50 = vmax.f32 %v1677_v61, 0.0  ;;  %v1764_v10 = vand.u32 2147483647, %v1756_v24  ;;  %v1758_v54 = vsub.f32 8.0, %v3452_v28 }
 0x1dc   :  { %v1170_v47 = vpop.f32.mrf.mxu2  ;;  %v1507_v57 = vadd.f32 %v1499_v16, %v1459_v63  ;;  %v1596_v16 = vmul.f32 %v4077_v3, %v4060_v22 }
 0x1dd   :  { %v1597_v29 = vmul.f32 %v1589_v2, %v1170_v47  ;;  %v1283_v31 = vpop.f32.mrf.mxu3  ;;  %v4084_v52 = vpop.f32.mrf.mxu1  ;;  %v1710_v2 = vsub.f32 7.0, %v3452_v28  ;;  %v1595_v47 = vmul.f32 %v4073_v25, %v4053_v11  ;;  %v1732_v11 = vmax.f32 %v1724_v8, 0.0 }
 0x1de   :  { %v1598_v18 = vmul.f32 %v1590_v62, %v1283_v31  ;;  %v1555_v26 = vadd.f32 %v1547_v55, %v1507_v57  ;;  %v1771_v31 = vsub.f32 1.0, %v1763_v53  ;;  %v1644_v22 = vmul.f32 %v1636_v19, %v4084_v52 }
 0x1df   :  { %v1605_v40 = vadd.f32 %v1597_v29, %v1557_v51  ;;  %v1500_v51 = vmul.f32 %v1492_v9, %v4031_v13  ;;  %v1548_v13 = vmul.f32 %v4070_v60, %v4046_v37  ;;  %v1717_v9 = vand.u32 2147483647, %v1709_v20 }
 0x1e0   :  { %v1606_v4 = vadd.f32 %v1598_v18, %v1558_v7  ;;  %3113 = vmatmul.msk.f32.gmra.mxu1 %vm366_vm0, %v3214_v5  ;;  %v950_v41 = vpop.f32.mrf.mxu0  ;;  %v1718_v21 = vand.u32 2147483647, %v1710_v2  ;;  %v1643_v37 = vmul.f32 %v4081_v0, %v4067_v42  ;;  %v1731_v60 = vmax.f32 %v1723_v36, 0.0 }
 0x1e1   :  { %3145 = vmatmul.msk.f32.gmra.mxu2 %vm366_vm0, %v3214_v5  ;;  %v1508_v6 = vadd.f32 %v1500_v51, %v1460_v32  ;;  %v1725_v25 = vsub.f32 1.0, %v1717_v9  ;;  %v1603_v49 = vadd.f32 %v1595_v47, %v1555_v26  ;;  %v1757_v42 = vsub.f32 8.0, %v3429_v58 }
 0x1e2   :  { %3177 = vmatmul.msk.f32.gmra.mxu3 %vm366_vm0, %v3214_v5  ;;  %v1678_v5 = vsub.f32 1.0, %v1670_v39  ;;  %v1779_v33 = vmax.f32 %v1771_v31, 0.0  ;;  %v1804_v32 = vsub.f32 9.0, %v3466_v38  ;;  %v1766_v53 = vand.u32 2147483647, %v1758_v54  ;;  %v3218_v54 = vld [vmem:[#allocation6 + $0xc8] sm:$0xff] }
 0x1e3   :  { %3082 = vmatmul.msk.f32.gmra.mxu0 %vm366_vm0, %v3215_v27  ;;  %v1556_v18 = vadd.f32 %v1548_v13, %v1508_v6  ;;  %v1651_v1 = vadd.f32 %v1643_v37, %v1603_v49  ;;  %v1765_v55 = vand.u32 2147483647, %v1757_v42  ;;  %v1851_v52 = vsub.f32 10.0, %v3460_v17 }
 0x1e4   :  { %v1173_v7 = vpop.f32.mrf.mxu2  ;;  %v1686_v44 = vmax.f32 %v1678_v5, 0.0  ;;  %v1774_v24 = vsub.f32 1.0, %v1766_v53  ;;  %v1805_v6 = vsub.f32 9.0, %v3429_v58  ;;  %v1806_v26 = vsub.f32 9.0, %v3452_v28 }
 0x1e5   :  { %v1645_v62 = vmul.f32 %v1637_v12, %v1173_v7  ;;  %v1286_v30 = vpop.f32.mrf.mxu3  ;;  %v1063_v45 = vpop.f32.mrf.mxu1  ;;  %v1811_v12 = vand.u32 2147483647, %v1803_v56  ;;  %v1604_v20 = vadd.f32 %v1596_v16, %v1556_v18  ;;  %v1773_v13 = vsub.f32 1.0, %v1765_v55 }
 0x1e6   :  { %v1646_v35 = vmul.f32 %v1638_v15, %v1286_v30  ;;  %v1772_v15 = vsub.f32 1.0, %v1764_v10  ;;  %v1812_v30 = vand.u32 2147483647, %v1804_v32  ;;  %v1813_v10 = vand.u32 2147483647, %v1805_v6 }
 0x1e7   :  { %v1653_v48 = vadd.f32 %v1645_v62, %v1605_v40  ;;  %v1691_v40 = vmul.f32 %v1683_v34, %v950_v41  ;;  %v1733_v41 = vmax.f32 %v1725_v25, 0.0  ;;  %v1692_v34 = vmul.f32 %v1684_v43, %v1063_v45  ;;  %v3217_v45 = vld [vmem:[#allocation6 + $0xc0] sm:$0xff] }
 0x1e8   :  { %v1654_v59 = vadd.f32 %v1646_v35, %v1606_v4  ;;  %3114 = vmatmul.msk.f32.gmra.mxu1 %vm366_vm0, %v3215_v27  ;;  %v953_v29 = vpop.f32.mrf.mxu0  ;;  %v1726_v4 = vsub.f32 1.0, %v1718_v21  ;;  %v1819_v36 = vsub.f32 1.0, %v1811_v12  ;;  %v1652_v19 = vadd.f32 %v1644_v22, %v1604_v20 }
 0x1e9   :  { %3146 = vmatmul.msk.f32.gmra.mxu2 %vm366_vm0, %v3215_v27  ;;  %v1739_v63 = vmul.f32 %v1731_v60, %v953_v29  ;;  %v1699_v57 = vadd.f32 %v1691_v40, %v1651_v1  ;;  %v1780_v8 = vmax.f32 %v1772_v15, 0.0  ;;  %v1820_v31 = vsub.f32 1.0, %v1812_v30 }
 0x1ea   :  { %3178 = vmatmul.msk.f32.gmra.mxu3 %vm366_vm0, %v3215_v27  ;;  %v1734_v5 = vmax.f32 %v1726_v4, 0.0  ;;  %v1700_v35 = vadd.f32 %v1692_v34, %v1652_v19  ;;  %v1827_v29 = vmax.f32 %v1819_v36, 0.0  ;;  %v1859_v21 = vand.u32 2147483647, %v1851_v52 }
 0x1eb   :  { %3083 = vmatmul.msk.f32.gmra.mxu0 %vm366_vm0, %v3216_v14  ;;  %v1747_v2 = vadd.f32 %v1739_v63, %v1699_v57  ;;  %v1814_v49 = vand.u32 2147483647, %v1806_v26  ;;  %v1781_v40 = vmax.f32 %v1773_v13, 0.0  ;;  %v1899_v42 = vsub.f32 11.0, %v3460_v17 }
 0x1ec   :  { %v1176_v0 = vpop.f32.mrf.mxu2  ;;  %v1821_v63 = vsub.f32 1.0, %v1813_v10  ;;  %v1854_v15 = vsub.f32 10.0, %v3452_v28  ;;  %v1900_v55 = vsub.f32 11.0, %v3466_v38  ;;  %v1947_v19 = vsub.f32 12.0, %v3460_v17 }
 0x1ed   :  { %v1693_v46 = vmul.f32 %v1685_v50, %v1176_v0  ;;  %v1289_v39 = vpop.f32.mrf.mxu3  ;;  %v1066_v23 = vpop.f32.mrf.mxu1  ;;  %v1852_v50 = vsub.f32 10.0, %v3466_v38  ;;  %v1782_v0 = vmax.f32 %v1774_v24, 0.0  ;;  %v1902_v24 = vsub.f32 11.0, %v3452_v28 }
 0x1ee   :  { %v1694_v3 = vmul.f32 %v1686_v44, %v1289_v39  ;;  %v1740_v61 = vmul.f32 %v1732_v11, %v1066_v23  ;;  %v1853_v39 = vsub.f32 10.0, %v3429_v58  ;;  %v1829_v53 = vmax.f32 %v1821_v63, 0.0 }
 0x1ef   :  { %v1701_v51 = vadd.f32 %v1693_v46, %v1653_v48  ;;  %v1860_v4 = vand.u32 2147483647, %v1852_v50  ;;  %v1822_v46 = vsub.f32 1.0, %v1814_v49  ;;  %v1862_v52 = vand.u32 2147483647, %v1854_v15 }
 0x1f0   :  { %v1702_v27 = vadd.f32 %v1694_v3, %v1654_v59  ;;  %3115 = vmatmul.msk.f32.gmra.mxu1 %vm366_vm0, %v3216_v14  ;;  %v956_v7 = vpop.f32.mrf.mxu0  ;;  %v1748_v56 = vadd.f32 %v1740_v61, %v1700_v35  ;;  %v1949_v63 = vsub.f32 12.0, %v3429_v58 }
 0x1f1   :  { %3147 = vmatmul.msk.f32.gmra.mxu2 %vm366_vm0, %v3216_v14  ;;  %v1787_v62 = vmul.f32 %v1779_v33, %v956_v7  ;;  %v1828_v33 = vmax.f32 %v1820_v31, 0.0  ;;  %v1830_v61 = vmax.f32 %v1822_v46, 0.0 }
 0x1f2   :  { %3179 = vmatmul.msk.f32.gmra.mxu3 %vm366_vm0, %v3216_v14  ;;  %v1867_v14 = vsub.f32 1.0, %v1859_v21 }
 0x1f3   :  { %v1795_v43 = vadd.f32 %v1787_v62, %v1747_v2  ;;  %3084 = vmatmul.msk.f32.gmra.mxu0 %vm366_vm0, %v3217_v45  ;;  %v1861_v2 = vand.u32 2147483647, %v1853_v39 }
 0x1f4   :  { %v1179_v9 = vpop.f32.mrf.mxu2  ;;  %v1875_v3 = vmax.f32 %v1867_v14, 0.0 }
 0x1f5   :  { %v1741_v47 = vmul.f32 %v1733_v41, %v1179_v9  ;;  %v1292_v48 = vpop.f32.mrf.mxu3  ;;  %v1069_v59 = vpop.f32.mrf.mxu1  ;;  %v1907_v41 = vand.u32 2147483647, %v1899_v42  ;;  %v1869_v35 = vsub.f32 1.0, %v1861_v2  ;;  %v1901_v9 = vsub.f32 11.0, %v3429_v58 }
 0x1f6   :  { %v1742_v37 = vmul.f32 %v1734_v5, %v1292_v48  ;;  %v1788_v60 = vmul.f32 %v1780_v8, %v1069_v59  ;;  %v1908_v8 = vand.u32 2147483647, %v1900_v55  ;;  %v1870_v59 = vsub.f32 1.0, %v1862_v52 }
 0x1f7   :  { %v1749_v44 = vadd.f32 %v1741_v47, %v1701_v51  ;;  %v1868_v51 = vsub.f32 1.0, %v1860_v4  ;;  %v1915_v30 = vsub.f32 1.0, %v1907_v41  ;;  %v1877_v49 = vmax.f32 %v1869_v35, 0.0  ;;  %v3220_v4 = vld [vmem:[#allocation6 + $0xd8] sm:$0xff] }
 0x1f8   :  { %v1750_v18 = vadd.f32 %v1742_v37, %v1702_v27  ;;  %v1796_v11 = vadd.f32 %v1788_v60, %v1748_v56  ;;  %3116 = vmatmul.msk.f32.gmra.mxu1 %vm366_vm0, %v3217_v45  ;;  %v959_v25 = vpop.f32.mrf.mxu0  ;;  %v1916_v56 = vsub.f32 1.0, %v1908_v8  ;;  %v1948_v37 = vsub.f32 12.0, %v3466_v38  ;;  %v3221_v8 = vld [vmem:[#allocation6 + $0xe0] sm:$0xff] }
 0x1f9   :  { %3148 = vmatmul.msk.f32.gmra.mxu2 %vm366_vm0, %v3217_v45  ;;  %v1835_v16 = vmul.f32 %v1827_v29, %v959_v25  ;;  %v1876_v5 = vmax.f32 %v1868_v51, 0.0  ;;  %v1923_v48 = vmax.f32 %v1915_v30, 0.0  ;;  %v1955_v29 = vand.u32 2147483647, %v1947_v19 }
 0x1fa   :  { %3180 = vmatmul.msk.f32.gmra.mxu3 %vm366_vm0, %v3217_v45  ;;  %v3219_v45 = vld [vmem:[#allocation6 + $0xd0] sm:$0xff]  ;;  %v1910_v25 = vand.u32 2147483647, %v1902_v24  ;;  %v1878_v14 = vmax.f32 %v1870_v59, 0.0  ;;  %v1924_v42 = vmax.f32 %v1916_v56, 0.0  ;;  %v2043_v30 = vsub.f32 14.0, %v3460_v17 }
 0x1fb   :  { %v1843_v12 = vadd.f32 %v1835_v16, %v1795_v43  ;;  %3085 = vmatmul.msk.f32.gmra.mxu0 %vm366_vm0, %v3218_v54  ;;  %v1963_v16 = vsub.f32 1.0, %v1955_v29  ;;  %v1998_v35 = vsub.f32 13.0, %v3452_v28 }
 0x1fc   :  { %v1182_v1 = vpop.f32.mrf.mxu2 }
 0x1fd   :  { %v1789_v23 = vmul.f32 %v1781_v40, %v1182_v1  ;;  %v1295_v32 = vpop.f32.mrf.mxu3  ;;  %v1072_v22 = vpop.f32.mrf.mxu1  ;;  %v1995_v40 = vsub.f32 13.0, %v3460_v17  ;;  %v1918_v1 = vsub.f32 1.0, %v1910_v25 }
 0x1fe   :  { %v1790_v20 = vmul.f32 %v1782_v0, %v1295_v32  ;;  %v1836_v57 = vmul.f32 %v1828_v33, %v1072_v22  ;;  %v1956_v0 = vand.u32 2147483647, %v1948_v37  ;;  %v1971_v32 = vmax.f32 %v1963_v16, 0.0 }
 0x1ff   :  { %v1797_v34 = vadd.f32 %v1789_v23, %v1749_v44  ;;  %v2003_v22 = vand.u32 2147483647, %v1995_v40  ;;  %v1926_v52 = vmax.f32 %v1918_v1, 0.0 }
 0x200   :  { %v1798_v27 = vadd.f32 %v1790_v20, %v1750_v18  ;;  %v1844_v7 = vadd.f32 %v1836_v57, %v1796_v11  ;;  %3117 = vmatmul.msk.f32.gmra.mxu1 %vm366_vm0, %v3218_v54  ;;  %v962_v36 = vpop.f32.mrf.mxu0  ;;  %v1909_v11 = vand.u32 2147483647, %v1901_v9  ;;  %v1964_v20 = vsub.f32 1.0, %v1956_v0  ;;  %v3222_v0 = vld [vmem:[#allocation6 + $0xe8] sm:$0xff] }
 0x201   :  { %3149 = vmatmul.msk.f32.gmra.mxu2 %vm366_vm0, %v3218_v54  ;;  %v1883_v62 = vmul.f32 %v1875_v3, %v962_v36  ;;  %v1950_v3 = vsub.f32 12.0, %v3452_v28  ;;  %v1996_v57 = vsub.f32 13.0, %v3466_v38  ;;  %v1957_v36 = vand.u32 2147483647, %v1949_v63 }
 0x202   :  { %3181 = vmatmul.msk.f32.gmra.mxu3 %vm366_vm0, %v3218_v54  ;;  %v1917_v54 = vsub.f32 1.0, %v1909_v11  ;;  %v2011_v2 = vsub.f32 1.0, %v2003_v22  ;;  %v1972_v19 = vmax.f32 %v1964_v20, 0.0 }
 0x203   :  { %v1891_v43 = vadd.f32 %v1883_v62, %v1843_v12  ;;  %3086 = vmatmul.msk.f32.gmra.mxu0 %vm366_vm0, %v3219_v45  ;;  %v1958_v62 = vand.u32 2147483647, %v1950_v3 }
 0x204   :  { %v1185_v13 = vpop.f32.mrf.mxu2 }
 0x205   :  { %v1837_v6 = vmul.f32 %v1829_v53, %v1185_v13  ;;  %v1298_v26 = vpop.f32.mrf.mxu3  ;;  %v1075_v47 = vpop.f32.mrf.mxu1  ;;  %v1997_v13 = vsub.f32 13.0, %v3429_v58 }
 0x206   :  { %v1838_v31 = vmul.f32 %v1830_v61, %v1298_v26  ;;  %v1884_v21 = vmul.f32 %v1876_v5, %v1075_v47  ;;  %v2004_v61 = vand.u32 2147483647, %v1996_v57  ;;  %v2019_v26 = vmax.f32 %v2011_v2, 0.0 }
 0x207   :  { %v1845_v60 = vadd.f32 %v1837_v6, %v1797_v34  ;;  %v1966_v47 = vsub.f32 1.0, %v1958_v62  ;;  %v2139_v2 = vsub.f32 16.0, %v3460_v17 }
 0x208   :  { %v1846_v50 = vadd.f32 %v1838_v31, %v1798_v27  ;;  %v1892_v44 = vadd.f32 %v1884_v21, %v1844_v7  ;;  %3118 = vmatmul.msk.f32.gmra.mxu1 %vm366_vm0, %v3219_v45  ;;  %v965_v18 = vpop.f32.mrf.mxu0  ;;  %v1925_v7 = vmax.f32 %v1917_v54, 0.0  ;;  %v2012_v31 = vsub.f32 1.0, %v2004_v61  ;;  %v3223_v61 = vld [vmem:[#allocation6 + $0xf0] sm:$0xff] }
 0x209   :  { %3150 = vmatmul.msk.f32.gmra.mxu2 %vm366_vm0, %v3219_v45  ;;  %v1931_v10 = vmul.f32 %v1923_v48, %v965_v18  ;;  %v2051_v48 = vand.u32 2147483647, %v2043_v30  ;;  %v2044_v21 = vsub.f32 14.0, %v3466_v38  ;;  %v2006_v18 = vand.u32 2147483647, %v1998_v35 }
 0x20a   :  { %3182 = vmatmul.msk.f32.gmra.mxu3 %vm366_vm0, %v3219_v45  ;;  %v1965_v45 = vsub.f32 1.0, %v1957_v36  ;;  %v1974_v16 = vmax.f32 %v1966_v47, 0.0  ;;  %v2020_v40 = vmax.f32 %v2012_v31, 0.0  ;;  %v2045_v54 = vsub.f32 14.0, %v3429_v58 }
 0x20b   :  { %v1939_v33 = vadd.f32 %v1931_v10, %v1891_v43  ;;  %3087 = vmatmul.msk.f32.gmra.mxu0 %vm366_vm0, %v3220_v4  ;;  %v2059_v10 = vsub.f32 1.0, %v2051_v48 }
 0x20c   :  { %v1188_v12 = vpop.f32.mrf.mxu2  ;;  %v1973_v25 = vmax.f32 %v1965_v45, 0.0  ;;  %v2094_v45 = vsub.f32 15.0, %v3452_v28 }
 0x20d   :  { %v1885_v46 = vmul.f32 %v1877_v49, %v1188_v12  ;;  %v1301_v39 = vpop.f32.mrf.mxu3  ;;  %v1078_v23 = vpop.f32.mrf.mxu1  ;;  %v2091_v49 = vsub.f32 15.0, %v3460_v17  ;;  %v2014_v12 = vsub.f32 1.0, %v2006_v18 }
 0x20e   :  { %v1886_v41 = vmul.f32 %v1878_v14, %v1301_v39  ;;  %v1932_v15 = vmul.f32 %v1924_v42, %v1078_v23  ;;  %v2052_v14 = vand.u32 2147483647, %v2044_v21  ;;  %v2067_v39 = vmax.f32 %v2059_v10, 0.0 }
 0x20f   :  { %v1893_v51 = vadd.f32 %v1885_v46, %v1845_v60  ;;  %v2099_v23 = vand.u32 2147483647, %v2091_v49  ;;  %v2022_v62 = vmax.f32 %v2014_v12, 0.0 }
 0x210   :  { %v1894_v55 = vadd.f32 %v1886_v41, %v1846_v50  ;;  %v1940_v34 = vadd.f32 %v1932_v15, %v1892_v44  ;;  %3119 = vmatmul.msk.f32.gmra.mxu1 %vm366_vm0, %v3220_v4  ;;  %v968_v27 = vpop.f32.mrf.mxu0  ;;  %v2005_v44 = vand.u32 2147483647, %v1997_v13  ;;  %v2060_v41 = vsub.f32 1.0, %v2052_v14  ;;  %v3224_v14 = vld [vmem:[#allocation6 + $0xf8] sm:$0xff] }
 0x211   :  { %3151 = vmatmul.msk.f32.gmra.mxu2 %vm366_vm0, %v3220_v4  ;;  %v1979_v53 = vmul.f32 %v1971_v32, %v968_v27  ;;  %v2046_v32 = vsub.f32 14.0, %v3452_v28  ;;  %v2092_v15 = vsub.f32 15.0, %v3466_v38  ;;  %v2053_v27 = vand.u32 2147483647, %v2045_v54 }
 0x212   :  { %3183 = vmatmul.msk.f32.gmra.mxu3 %vm366_vm0, %v3220_v4  ;;  %v2013_v4 = vsub.f32 1.0, %v2005_v44  ;;  %v2107_v36 = vsub.f32 1.0, %v2099_v23  ;;  %v2068_v30 = vmax.f32 %v2060_v41, 0.0 }
 0x213   :  { %v1987_v5 = vadd.f32 %v1979_v53, %v1939_v33  ;;  %3088 = vmatmul.msk.f32.gmra.mxu0 %vm366_vm0, %v3221_v8  ;;  %v2054_v53 = vand.u32 2147483647, %v2046_v32 }
 0x214   :  { %v1191_v43 = vpop.f32.mrf.mxu2 }
 0x215   :  { %v1933_v9 = vmul.f32 %v1925_v7, %v1191_v43  ;;  %v1304_v24 = vpop.f32.mrf.mxu3  ;;  %v1081_v6 = vpop.f32.mrf.mxu1  ;;  %v2093_v43 = vsub.f32 15.0, %v3429_v58 }
 0x216   :  { %v1934_v59 = vmul.f32 %v1926_v52, %v1304_v24  ;;  %v1980_v29 = vmul.f32 %v1972_v19, %v1081_v6  ;;  %v2100_v52 = vand.u32 2147483647, %v2092_v15  ;;  %v2115_v24 = vmax.f32 %v2107_v36, 0.0 }
 0x217   :  { %v1941_v56 = vadd.f32 %v1933_v9, %v1893_v51  ;;  %v2062_v6 = vsub.f32 1.0, %v2054_v53  ;;  %v2235_v36 = vsub.f32 18.0, %v3460_v17 }
 0x218   :  { %v1942_v37 = vadd.f32 %v1934_v59, %v1894_v55  ;;  %v1988_v60 = vadd.f32 %v1980_v29, %v1940_v34  ;;  %3120 = vmatmul.msk.f32.gmra.mxu1 %vm366_vm0, %v3221_v8  ;;  %v971_v50 = vpop.f32.mrf.mxu0  ;;  %v2021_v34 = vmax.f32 %v2013_v4, 0.0  ;;  %v2108_v59 = vsub.f32 1.0, %v2100_v52 }
 0x219   :  { %3152 = vmatmul.msk.f32.gmra.mxu2 %vm366_vm0, %v3221_v8  ;;  %v2027_v11 = vmul.f32 %v2019_v26, %v971_v50  ;;  %v2147_v26 = vand.u32 2147483647, %v2139_v2  ;;  %v2140_v29 = vsub.f32 16.0, %v3466_v38  ;;  %v2102_v50 = vand.u32 2147483647, %v2094_v45 }
 0x21a   :  { %3184 = vmatmul.msk.f32.gmra.mxu3 %vm366_vm0, %v3221_v8  ;;  %v2061_v8 = vsub.f32 1.0, %v2053_v27  ;;  %v2070_v10 = vmax.f32 %v2062_v6, 0.0  ;;  %v2116_v49 = vmax.f32 %v2108_v59, 0.0  ;;  %v2141_v4 = vsub.f32 16.0, %v3429_v58 }
 0x21b   :  { %v2035_v42 = vadd.f32 %v2027_v11, %v1987_v5  ;;  %3089 = vmatmul.msk.f32.gmra.mxu0 %vm366_vm0, %v3222_v0  ;;  %v2155_v11 = vsub.f32 1.0, %v2147_v26 }
 0x21c   :  { %v1194_v33 = vpop.f32.mrf.mxu2  ;;  %v2069_v18 = vmax.f32 %v2061_v8, 0.0 }
 0x21d   :  { %v1981_v1 = vmul.f32 %v1973_v25, %v1194_v33  ;;  %v1307_v63 = vpop.f32.mrf.mxu3  ;;  %v1084_v46 = vpop.f32.mrf.mxu1  ;;  %v2187_v25 = vsub.f32 17.0, %v3460_v17  ;;  %v2110_v33 = vsub.f32 1.0, %v2102_v50 }
 0x21e   :  { %v1982_v22 = vmul.f32 %v1974_v16, %v1307_v63  ;;  %v2028_v3 = vmul.f32 %v2020_v40, %v1084_v46  ;;  %v2148_v16 = vand.u32 2147483647, %v2140_v29  ;;  %v2163_v63 = vmax.f32 %v2155_v11, 0.0 }
 0x21f   :  { %v1989_v20 = vadd.f32 %v1981_v1, %v1941_v56  ;;  %v2195_v46 = vand.u32 2147483647, %v2187_v25  ;;  %v2118_v53 = vmax.f32 %v2110_v33, 0.0 }
 0x220   :  { %v1990_v57 = vadd.f32 %v1982_v22, %v1942_v37  ;;  %v2036_v51 = vadd.f32 %v2028_v3, %v1988_v60  ;;  %3121 = vmatmul.msk.f32.gmra.mxu1 %vm366_vm0, %v3222_v0  ;;  %v974_v55 = vpop.f32.mrf.mxu0  ;;  %v2101_v60 = vand.u32 2147483647, %v2093_v43  ;;  %v2156_v22 = vsub.f32 1.0, %v2148_v16 }
 0x221   :  { %3153 = vmatmul.msk.f32.gmra.mxu2 %vm366_vm0, %v3222_v0  ;;  %v2075_v7 = vmul.f32 %v2067_v39, %v974_v55  ;;  %v2142_v39 = vsub.f32 16.0, %v3452_v28  ;;  %v2188_v3 = vsub.f32 17.0, %v3466_v38  ;;  %v2149_v55 = vand.u32 2147483647, %v2141_v4 }
 0x222   :  { %3185 = vmatmul.msk.f32.gmra.mxu3 %vm366_vm0, %v3222_v0  ;;  %v2109_v0 = vsub.f32 1.0, %v2101_v60  ;;  %v2203_v27 = vsub.f32 1.0, %v2195_v46  ;;  %v2164_v2 = vmax.f32 %v2156_v22, 0.0 }
 0x223   :  { %v2083_v19 = vadd.f32 %v2075_v7, %v2035_v42  ;;  %3090 = vmatmul.msk.f32.gmra.mxu0 %vm366_vm0, %v3223_v61  ;;  %v2150_v7 = vand.u32 2147483647, %v2142_v39  ;;  %v2284_v39 = vsub.f32 19.0, %v3466_v38 }
 0x224   :  { %v1197_v5 = vpop.f32.mrf.mxu2 }
 0x225   :  { %v2029_v13 = vmul.f32 %v2021_v34, %v1197_v5  ;;  %v1310_v35 = vpop.f32.mrf.mxu3  ;;  %v1087_v9 = vpop.f32.mrf.mxu1  ;;  %v2190_v5 = vsub.f32 17.0, %v3452_v28 }
 0x226   :  { %v2030_v47 = vmul.f32 %v2022_v62, %v1310_v35  ;;  %v2076_v48 = vmul.f32 %v2068_v30, %v1087_v9  ;;  %v2196_v62 = vand.u32 2147483647, %v2188_v3  ;;  %v2158_v35 = vsub.f32 1.0, %v2150_v7 }
 0x227   :  { %v2037_v31 = vadd.f32 %v2029_v13, %v1989_v20  ;;  %v2211_v13 = vmax.f32 %v2203_v27, 0.0  ;;  %v2243_v9 = vand.u32 2147483647, %v2235_v36  ;;  %v2292_v7 = vand.u32 2147483647, %v2284_v39 }
 0x228   :  { %v2038_v21 = vadd.f32 %v2030_v47, %v1990_v57  ;;  %v2084_v56 = vadd.f32 %v2076_v48, %v2036_v51  ;;  %3122 = vmatmul.msk.f32.gmra.mxu1 %vm366_vm0, %v3223_v61  ;;  %v977_v37 = vpop.f32.mrf.mxu0  ;;  %v2117_v51 = vmax.f32 %v2109_v0, 0.0  ;;  %v2204_v26 = vsub.f32 1.0, %v2196_v62 }
 0x229   :  { %3154 = vmatmul.msk.f32.gmra.mxu2 %vm366_vm0, %v3223_v61  ;;  %v2123_v44 = vmul.f32 %v2115_v24, %v977_v37  ;;  %v2236_v47 = vsub.f32 18.0, %v3466_v38  ;;  %v2251_v50 = vsub.f32 1.0, %v2243_v9  ;;  %v2285_v62 = vsub.f32 19.0, %v3429_v58 }
 0x22a   :  { %3186 = vmatmul.msk.f32.gmra.mxu3 %vm366_vm0, %v3223_v61  ;;  %v2189_v61 = vsub.f32 17.0, %v3429_v58  ;;  %v2212_v11 = vmax.f32 %v2204_v26, 0.0  ;;  %v2332_v9 = vsub.f32 20.0, %v3466_v38 }
 0x22b   :  { %v2131_v40 = vadd.f32 %v2123_v44, %v2083_v19  ;;  %3091 = vmatmul.msk.f32.gmra.mxu0 %vm366_vm0, %v3224_v14  ;;  %v2157_v19 = vsub.f32 1.0, %v2149_v55  ;;  %v2283_v44 = vsub.f32 19.0, %v3460_v17  ;;  %v2244_v25 = vand.u32 2147483647, %v2236_v47 }
 0x22c   :  { %v1200_v42 = vpop.f32.mrf.mxu2  ;;  %v2259_v4 = vmax.f32 %v2251_v50, 0.0  ;;  %v2331_v55 = vsub.f32 20.0, %v3460_v17  ;;  %v2340_v50 = vand.u32 2147483647, %v2332_v9 }
 0x22d   :  { %v2077_v12 = vmul.f32 %v2069_v18, %v1200_v42  ;;  %v1313_v54 = vpop.f32.mrf.mxu3  ;;  %v1090_v1 = vpop.f32.mrf.mxu1  ;;  %v2165_v60 = vmax.f32 %v2157_v19, 0.0  ;;  %v2166_v18 = vmax.f32 %v2158_v35, 0.0  ;;  %v2252_v46 = vsub.f32 1.0, %v2244_v25 }
 0x22e   :  { %v2078_v23 = vmul.f32 %v2070_v10, %v1313_v54  ;;  %v2124_v32 = vmul.f32 %v2116_v49, %v1090_v1  ;;  %v2238_v54 = vsub.f32 18.0, %v3452_v28  ;;  %v2300_v35 = vsub.f32 1.0, %v2292_v7 }
 0x22f   :  { %v2085_v41 = vadd.f32 %v2077_v12, %v2037_v31  ;;  %v2291_v12 = vand.u32 2147483647, %v2283_v44  ;;  %v2260_v27 = vmax.f32 %v2252_v46, 0.0  ;;  %v2381_v7 = vsub.f32 21.0, %v3429_v58 }
 0x230   :  { %v2086_v15 = vadd.f32 %v2078_v23, %v2038_v21  ;;  %v2132_v20 = vadd.f32 %v2124_v32, %v2084_v56  ;;  %3123 = vmatmul.msk.f32.gmra.mxu1 %vm366_vm0, %v3224_v14  ;;  %v980_v57 = vpop.f32.mrf.mxu0  ;;  %v2197_v21 = vand.u32 2147483647, %v2189_v61  ;;  %v2198_v56 = vand.u32 2147483647, %v2190_v5 }
 0x231   :  { %3155 = vmatmul.msk.f32.gmra.mxu2 %vm366_vm0, %v3224_v14  ;;  %v2171_v34 = vmul.f32 %v2163_v63, %v980_v57  ;;  %v2299_v57 = vsub.f32 1.0, %v2291_v12  ;;  %v2348_v12 = vsub.f32 1.0, %v2340_v50 }
 0x232   :  { %3187 = vmatmul.msk.f32.gmra.mxu3 %vm366_vm0, %v3224_v14  ;;  %v2205_v16 = vsub.f32 1.0, %v2197_v21  ;;  %v2237_v14 = vsub.f32 18.0, %v3429_v58 }
 0x233   :  { %v2179_v30 = vadd.f32 %v2171_v34, %v2131_v40  ;;  %v2206_v40 = vsub.f32 1.0, %v2198_v56  ;;  %v2307_v5 = vmax.f32 %v2299_v57, 0.0  ;;  %v2379_v56 = vsub.f32 21.0, %v3460_v17 }
 0x234   :  { %v1203_v52 = vpop.f32.mrf.mxu2  ;;  %v2356_v57 = vmax.f32 %v2348_v12, 0.0 }
 0x235   :  { %v2125_v8 = vmul.f32 %v2117_v51, %v1203_v52  ;;  %v1316_v43 = vpop.f32.mrf.mxu3  ;;  %v1093_v45 = vpop.f32.mrf.mxu1  ;;  %v2246_v51 = vand.u32 2147483647, %v2238_v54  ;;  %v2214_v34 = vmax.f32 %v2206_v40, 0.0  ;;  %v2380_v54 = vsub.f32 21.0, %v3466_v38 }
 0x236   :  { %v2126_v24 = vmul.f32 %v2118_v53, %v1316_v43  ;;  %v2172_v6 = vmul.f32 %v2164_v2, %v1093_v45  ;;  %v2339_v43 = vand.u32 2147483647, %v2331_v55 }
 0x237   :  { %v2133_v48 = vadd.f32 %v2125_v8, %v2085_v41  ;;  %v2213_v41 = vmax.f32 %v2205_v16, 0.0  ;;  %v2254_v8 = vsub.f32 1.0, %v2246_v51  ;;  %v2388_v51 = vand.u32 2147483647, %v2380_v54 }
 0x238   :  { %v2134_v59 = vadd.f32 %v2126_v24, %v2086_v15  ;;  %v2180_v29 = vadd.f32 %v2172_v6, %v2132_v20  ;;  %v983_v31 = vpop.f32.mrf.mxu0  ;;  %v2245_v15 = vand.u32 2147483647, %v2237_v14  ;;  %v2347_v21 = vsub.f32 1.0, %v2339_v43 }
 0x239   :  { %v2219_v37 = vmul.f32 %v2211_v13, %v983_v31  ;;  %v2428_v43 = vsub.f32 22.0, %v3466_v38 }
 0x23a   :  { %v2253_v2 = vsub.f32 1.0, %v2245_v15  ;;  %v2355_v14 = vmax.f32 %v2347_v21, 0.0  ;;  %v2427_v15 = vsub.f32 22.0, %v3460_v17 }
 0x23b   :  { %v2227_v10 = vadd.f32 %v2219_v37, %v2179_v30  ;;  %v2286_v30 = vsub.f32 19.0, %v3452_v28  ;;  %v2262_v37 = vmax.f32 %v2254_v8, 0.0  ;;  %v2396_v8 = vsub.f32 1.0, %v2388_v51 }
 0x23c   :  { %v1206_v49 = vpop.f32.mrf.mxu2  ;;  %v2261_v31 = vmax.f32 %v2253_v2, 0.0  ;;  %v2436_v21 = vand.u32 2147483647, %v2428_v43  ;;  %v2477_v51 = vsub.f32 23.0, %v3429_v58 }
 0x23d   :  { %v2173_v42 = vmul.f32 %v2165_v60, %v1206_v49  ;;  %v1319_v0 = vpop.f32.mrf.mxu3  ;;  %v1096_v33 = vpop.f32.mrf.mxu1  ;;  %v2308_v60 = vmax.f32 %v2300_v35, 0.0 }
 0x23e   :  { %v2174_v1 = vmul.f32 %v2166_v18, %v1319_v0  ;;  %v2220_v63 = vmul.f32 %v2212_v11, %v1096_v33  ;;  %v2334_v0 = vsub.f32 20.0, %v3452_v28 }
 0x23f   :  { %v2181_v23 = vadd.f32 %v2173_v42, %v2133_v48  ;;  %v2293_v48 = vand.u32 2147483647, %v2285_v62  ;;  %v2387_v42 = vand.u32 2147483647, %v2379_v56 }
 0x240   :  { %v2182_v32 = vadd.f32 %v2174_v1, %v2134_v59  ;;  %v2228_v22 = vadd.f32 %v2220_v63, %v2180_v29  ;;  %v986_v3 = vpop.f32.mrf.mxu0  ;;  %v2294_v59 = vand.u32 2147483647, %v2286_v30 }
 0x241   :  { %v2267_v20 = vmul.f32 %v2259_v4, %v986_v3  ;;  %v2301_v11 = vsub.f32 1.0, %v2293_v48  ;;  %v2395_v3 = vsub.f32 1.0, %v2387_v42  ;;  %v2444_v42 = vsub.f32 1.0, %v2436_v21 }
 0x242   :  { %v2302_v25 = vsub.f32 1.0, %v2294_v59  ;;  %v2475_v59 = vsub.f32 23.0, %v3460_v17 }
 0x243   :  { %v2275_v36 = vadd.f32 %v2267_v20, %v2227_v10  ;;  %v2333_v10 = vsub.f32 20.0, %v3429_v58  ;;  %v2403_v30 = vmax.f32 %v2395_v3, 0.0  ;;  %v2452_v3 = vmax.f32 %v2444_v42, 0.0 }
 0x244   :  { %v1209_v53 = vpop.f32.mrf.mxu2  ;;  %v2310_v20 = vmax.f32 %v2302_v25, 0.0 }
 0x245   :  { %v2221_v52 = vmul.f32 %v2213_v41, %v1209_v53  ;;  %v1322_v19 = vpop.f32.mrf.mxu3  ;;  %v1099_v61 = vpop.f32.mrf.mxu1  ;;  %v2342_v41 = vand.u32 2147483647, %v2334_v0  ;;  %v2476_v0 = vsub.f32 23.0, %v3466_v38 }
 0x246   :  { %v2222_v45 = vmul.f32 %v2214_v34, %v1322_v19  ;;  %v2268_v13 = vmul.f32 %v2260_v27, %v1099_v61  ;;  %v2435_v19 = vand.u32 2147483647, %v2427_v15 }
 0x247   :  { %v2229_v24 = vadd.f32 %v2221_v52, %v2181_v23  ;;  %v2309_v23 = vmax.f32 %v2301_v11, 0.0  ;;  %v2350_v52 = vsub.f32 1.0, %v2342_v41  ;;  %v2484_v41 = vand.u32 2147483647, %v2476_v0 }
 0x248   :  { %v2230_v6 = vadd.f32 %v2222_v45, %v2182_v32  ;;  %v2276_v26 = vadd.f32 %v2268_v13, %v2228_v22  ;;  %v989_v47 = vpop.f32.mrf.mxu0  ;;  %v2341_v32 = vand.u32 2147483647, %v2333_v10  ;;  %v2443_v48 = vsub.f32 1.0, %v2435_v19 }
 0x249   :  { %v2315_v29 = vmul.f32 %v2307_v5, %v989_v47  ;;  %v2524_v19 = vsub.f32 24.0, %v3466_v38 }
 0x24a   :  { %v2349_v27 = vsub.f32 1.0, %v2341_v32  ;;  %v2451_v10 = vmax.f32 %v2443_v48, 0.0  ;;  %v2523_v32 = vsub.f32 24.0, %v3460_v17 }
 0x24b   :  { %v2323_v44 = vadd.f32 %v2315_v29, %v2275_v36  ;;  %v2382_v36 = vsub.f32 21.0, %v3452_v28  ;;  %v2358_v29 = vmax.f32 %v2350_v52, 0.0  ;;  %v2492_v52 = vsub.f32 1.0, %v2484_v41 }
 0x24c   :  { %v1212_v18 = vpop.f32.mrf.mxu2  ;;  %v2357_v47 = vmax.f32 %v2349_v27, 0.0  ;;  %v2532_v48 = vand.u32 2147483647, %v2524_v19  ;;  %v2573_v41 = vsub.f32 25.0, %v3429_v58 }
 0x24d   :  { %v2269_v49 = vmul.f32 %v2261_v31, %v1212_v18  ;;  %v1325_v16 = vpop.f32.mrf.mxu3  ;;  %v1102_v40 = vpop.f32.mrf.mxu1  ;;  %v2404_v31 = vmax.f32 %v2396_v8, 0.0 }
 0x24e   :  { %v2270_v33 = vmul.f32 %v2262_v37, %v1325_v16  ;;  %v2316_v4 = vmul.f32 %v2308_v60, %v1102_v40  ;;  %v2430_v16 = vsub.f32 22.0, %v3452_v28 }
 0x24f   :  { %v2277_v1 = vadd.f32 %v2269_v49, %v2229_v24  ;;  %v2389_v24 = vand.u32 2147483647, %v2381_v7  ;;  %v2483_v49 = vand.u32 2147483647, %v2475_v59 }
 0x250   :  { %v2278_v63 = vadd.f32 %v2270_v33, %v2230_v6  ;;  %v2324_v46 = vadd.f32 %v2316_v4, %v2276_v26  ;;  %v992_v39 = vpop.f32.mrf.mxu0  ;;  %v2390_v6 = vand.u32 2147483647, %v2382_v36 }
 0x251   :  { %v2363_v22 = vmul.f32 %v2355_v14, %v992_v39  ;;  %v2397_v60 = vsub.f32 1.0, %v2389_v24  ;;  %v2491_v39 = vsub.f32 1.0, %v2483_v49  ;;  %v2540_v49 = vsub.f32 1.0, %v2532_v48 }
 0x252   :  { %v2398_v50 = vsub.f32 1.0, %v2390_v6  ;;  %v2571_v6 = vsub.f32 25.0, %v3460_v17 }
 0x253   :  { %v2371_v55 = vadd.f32 %v2363_v22, %v2323_v44  ;;  %v2429_v44 = vsub.f32 22.0, %v3429_v58  ;;  %v2499_v36 = vmax.f32 %v2491_v39, 0.0  ;;  %v2548_v39 = vmax.f32 %v2540_v49, 0.0 }
 0x254   :  { %v1215_v34 = vpop.f32.mrf.mxu2  ;;  %v2406_v22 = vmax.f32 %v2398_v50, 0.0 }
 0x255   :  { %v2317_v53 = vmul.f32 %v2309_v23, %v1215_v34  ;;  %v1328_v2 = vpop.f32.mrf.mxu3  ;;  %v1105_v62 = vpop.f32.mrf.mxu1  ;;  %v2438_v23 = vand.u32 2147483647, %v2430_v16  ;;  %v2572_v16 = vsub.f32 25.0, %v3466_v38 }
 0x256   :  { %v2318_v61 = vmul.f32 %v2310_v20, %v1328_v2  ;;  %v2364_v5 = vmul.f32 %v2356_v57, %v1105_v62  ;;  %v2531_v2 = vand.u32 2147483647, %v2523_v32 }
 0x257   :  { %v2325_v45 = vadd.f32 %v2317_v53, %v2277_v1  ;;  %v2405_v1 = vmax.f32 %v2397_v60, 0.0  ;;  %v2446_v53 = vsub.f32 1.0, %v2438_v23  ;;  %v2580_v23 = vand.u32 2147483647, %v2572_v16 }
 0x258   :  { %v2326_v13 = vadd.f32 %v2318_v61, %v2278_v63  ;;  %v2372_v35 = vadd.f32 %v2364_v5, %v2324_v46  ;;  %v995_v9 = vpop.f32.mrf.mxu0  ;;  %v2437_v63 = vand.u32 2147483647, %v2429_v44  ;;  %v2539_v24 = vsub.f32 1.0, %v2531_v2 }
 0x259   :  { %v2411_v26 = vmul.f32 %v2403_v30, %v995_v9  ;;  %v2620_v2 = vsub.f32 26.0, %v3466_v38 }
 0x25a   :  { %v2445_v57 = vsub.f32 1.0, %v2437_v63  ;;  %v2547_v44 = vmax.f32 %v2539_v24, 0.0  ;;  %v2619_v63 = vsub.f32 26.0, %v3460_v17 }
 0x25b   :  { %v2419_v56 = vadd.f32 %v2411_v26, %v2371_v55  ;;  %v2478_v55 = vsub.f32 23.0, %v3452_v28  ;;  %v2454_v26 = vmax.f32 %v2446_v53, 0.0  ;;  %v2588_v53 = vsub.f32 1.0, %v2580_v23 }
 0x25c   :  { %v1218_v37 = vpop.f32.mrf.mxu2  ;;  %v2453_v9 = vmax.f32 %v2445_v57, 0.0  ;;  %v2628_v24 = vand.u32 2147483647, %v2620_v2  ;;  %v2669_v23 = vsub.f32 27.0, %v3429_v58 }
 0x25d   :  { %v2365_v18 = vmul.f32 %v2357_v47, %v1218_v37  ;;  %v1331_v11 = vpop.f32.mrf.mxu3  ;;  %v1108_v25 = vpop.f32.mrf.mxu1  ;;  %v2500_v47 = vmax.f32 %v2492_v52, 0.0 }
 0x25e   :  { %v2366_v40 = vmul.f32 %v2358_v29, %v1331_v11  ;;  %v2412_v14 = vmul.f32 %v2404_v31, %v1108_v25  ;;  %v2526_v11 = vsub.f32 24.0, %v3452_v28 }
 0x25f   :  { %v2373_v33 = vadd.f32 %v2365_v18, %v2325_v45  ;;  %v2485_v45 = vand.u32 2147483647, %v2477_v51  ;;  %v2579_v18 = vand.u32 2147483647, %v2571_v6 }
 0x260   :  { %v2374_v4 = vadd.f32 %v2366_v40, %v2326_v13  ;;  %v2420_v12 = vadd.f32 %v2412_v14, %v2372_v35  ;;  %v998_v54 = vpop.f32.mrf.mxu0  ;;  %v2486_v13 = vand.u32 2147483647, %v2478_v55 }
 0x261   :  { %v2459_v46 = vmul.f32 %v2451_v10, %v998_v54  ;;  %v2493_v31 = vsub.f32 1.0, %v2485_v45  ;;  %v2587_v54 = vsub.f32 1.0, %v2579_v18  ;;  %v2636_v18 = vsub.f32 1.0, %v2628_v24 }
 0x262   :  { %v2494_v21 = vsub.f32 1.0, %v2486_v13  ;;  %v2667_v13 = vsub.f32 27.0, %v3460_v17 }
 0x263   :  { %v2467_v15 = vadd.f32 %v2459_v46, %v2419_v56  ;;  %v2525_v56 = vsub.f32 24.0, %v3429_v58  ;;  %v2595_v55 = vmax.f32 %v2587_v54, 0.0  ;;  %v2644_v54 = vmax.f32 %v2636_v18, 0.0 }
 0x264   :  { %v1221_v20 = vpop.f32.mrf.mxu2  ;;  %v2502_v46 = vmax.f32 %v2494_v21, 0.0 }
 0x265   :  { %v2413_v34 = vmul.f32 %v2405_v1, %v1221_v20  ;;  %v1334_v27 = vpop.f32.mrf.mxu3  ;;  %v1111_v7 = vpop.f32.mrf.mxu1  ;;  %v2534_v1 = vand.u32 2147483647, %v2526_v11  ;;  %v2668_v11 = vsub.f32 27.0, %v3466_v38 }
 0x266   :  { %v2414_v62 = vmul.f32 %v2406_v22, %v1334_v27  ;;  %v2460_v30 = vmul.f32 %v2452_v3, %v1111_v7  ;;  %v2627_v27 = vand.u32 2147483647, %v2619_v63 }
 0x267   :  { %v2421_v61 = vadd.f32 %v2413_v34, %v2373_v33  ;;  %v2501_v33 = vmax.f32 %v2493_v31, 0.0  ;;  %v2542_v34 = vsub.f32 1.0, %v2534_v1  ;;  %v2676_v1 = vand.u32 2147483647, %v2668_v11 }
 0x268   :  { %v2422_v5 = vadd.f32 %v2414_v62, %v2374_v4  ;;  %v2468_v8 = vadd.f32 %v2460_v30, %v2420_v12  ;;  %v1001_v43 = vpop.f32.mrf.mxu0  ;;  %v2533_v4 = vand.u32 2147483647, %v2525_v56  ;;  %v2635_v45 = vsub.f32 1.0, %v2627_v27 }
 0x269   :  { %v2507_v35 = vmul.f32 %v2499_v36, %v1001_v43  ;;  %v2716_v27 = vsub.f32 28.0, %v3466_v38 }
 0x26a   :  { %v2541_v3 = vsub.f32 1.0, %v2533_v4  ;;  %v2643_v56 = vmax.f32 %v2635_v45, 0.0  ;;  %v2715_v4 = vsub.f32 28.0, %v3460_v17 }
 0x26b   :  { %v2515_v59 = vadd.f32 %v2507_v35, %v2467_v15  ;;  %v2574_v15 = vsub.f32 25.0, %v3452_v28  ;;  %v2550_v35 = vmax.f32 %v2542_v34, 0.0  ;;  %v2684_v34 = vsub.f32 1.0, %v2676_v1 }
 0x26c   :  { %v1224_v29 = vpop.f32.mrf.mxu2  ;;  %v2549_v43 = vmax.f32 %v2541_v3, 0.0  ;;  %v2724_v45 = vand.u32 2147483647, %v2716_v27  ;;  %v2765_v1 = vsub.f32 29.0, %v3429_v58 }
 0x26d   :  { %v2461_v37 = vmul.f32 %v2453_v9, %v1224_v29  ;;  %v1337_v60 = vpop.f32.mrf.mxu3  ;;  %v1114_v50 = vpop.f32.mrf.mxu1  ;;  %v2596_v9 = vmax.f32 %v2588_v53, 0.0 }
 0x26e   :  { %v2462_v25 = vmul.f32 %v2454_v26, %v1337_v60  ;;  %v2508_v10 = vmul.f32 %v2500_v47, %v1114_v50  ;;  %v2622_v60 = vsub.f32 26.0, %v3452_v28 }
 0x26f   :  { %v2469_v40 = vadd.f32 %v2461_v37, %v2421_v61  ;;  %v2581_v61 = vand.u32 2147483647, %v2573_v41  ;;  %v2675_v37 = vand.u32 2147483647, %v2667_v13 }
 0x270   :  { %v2470_v14 = vadd.f32 %v2462_v25, %v2422_v5  ;;  %v2516_v42 = vadd.f32 %v2508_v10, %v2468_v8  ;;  %v1004_v0 = vpop.f32.mrf.mxu0  ;;  %v2582_v5 = vand.u32 2147483647, %v2574_v15 }
 0x271   :  { %v2555_v12 = vmul.f32 %v2547_v44, %v1004_v0  ;;  %v2589_v47 = vsub.f32 1.0, %v2581_v61  ;;  %v2683_v0 = vsub.f32 1.0, %v2675_v37  ;;  %v2732_v37 = vsub.f32 1.0, %v2724_v45 }
 0x272   :  { %v2590_v48 = vsub.f32 1.0, %v2582_v5  ;;  %v2763_v5 = vsub.f32 29.0, %v3460_v17 }
 0x273   :  { %v2563_v32 = vadd.f32 %v2555_v12, %v2515_v59  ;;  %v2621_v59 = vsub.f32 26.0, %v3429_v58  ;;  %v2691_v15 = vmax.f32 %v2683_v0, 0.0  ;;  %v2740_v0 = vmax.f32 %v2732_v37, 0.0 }
 0x274   :  { %v1227_v22 = vpop.f32.mrf.mxu2  ;;  %v2598_v12 = vmax.f32 %v2590_v48, 0.0 }
 0x275   :  { %v2509_v20 = vmul.f32 %v2501_v33, %v1227_v22  ;;  %v1340_v57 = vpop.f32.mrf.mxu3  ;;  %v1117_v51 = vpop.f32.mrf.mxu1  ;;  %v2630_v33 = vand.u32 2147483647, %v2622_v60  ;;  %v2764_v60 = vsub.f32 29.0, %v3466_v38 }
 0x276   :  { %v2510_v7 = vmul.f32 %v2502_v46, %v1340_v57  ;;  %v2556_v36 = vmul.f32 %v2548_v39, %v1117_v51  ;;  %v2723_v57 = vand.u32 2147483647, %v2715_v4 }
 0x277   :  { %v2517_v62 = vadd.f32 %v2509_v20, %v2469_v40  ;;  %v2597_v40 = vmax.f32 %v2589_v47, 0.0  ;;  %v2638_v20 = vsub.f32 1.0, %v2630_v33  ;;  %v2772_v33 = vand.u32 2147483647, %v2764_v60 }
 0x278   :  { %v2518_v30 = vadd.f32 %v2510_v7, %v2470_v14  ;;  %v2564_v52 = vadd.f32 %v2556_v36, %v2516_v42  ;;  %v1007_v19 = vpop.f32.mrf.mxu0  ;;  %v2629_v14 = vand.u32 2147483647, %v2621_v59  ;;  %v2731_v61 = vsub.f32 1.0, %v2723_v57 }
 0x279   :  { %v2603_v8 = vmul.f32 %v2595_v55, %v1007_v19  ;;  %v2812_v57 = vsub.f32 30.0, %v3466_v38 }
 0x27a   :  { %v2637_v39 = vsub.f32 1.0, %v2629_v14  ;;  %v2739_v59 = vmax.f32 %v2731_v61, 0.0  ;;  %v2811_v14 = vsub.f32 30.0, %v3460_v17 }
 0x27b   :  { %v2611_v6 = vadd.f32 %v2603_v8, %v2563_v32  ;;  %v2670_v32 = vsub.f32 27.0, %v3452_v28  ;;  %v2646_v8 = vmax.f32 %v2638_v20, 0.0  ;;  %v2780_v20 = vsub.f32 1.0, %v2772_v33 }
 0x27c   :  { %v1230_v26 = vpop.f32.mrf.mxu2  ;;  %v2645_v19 = vmax.f32 %v2637_v39, 0.0  ;;  %v2820_v61 = vand.u32 2147483647, %v2812_v57 }
 0x27d   :  { %v2557_v29 = vmul.f32 %v2549_v43, %v1230_v26  ;;  %v1343_v31 = vpop.f32.mrf.mxu3  ;;  %v1120_v21 = vpop.f32.mrf.mxu1  ;;  %v2692_v43 = vmax.f32 %v2684_v34, 0.0 }
 0x27e   :  { %v2558_v50 = vmul.f32 %v2550_v35, %v1343_v31  ;;  %v2604_v44 = vmul.f32 %v2596_v9, %v1120_v21  ;;  %v2718_v31 = vsub.f32 28.0, %v3452_v28 }
 0x27f   :  { %v2565_v25 = vadd.f32 %v2557_v29, %v2517_v62  ;;  %v2677_v62 = vand.u32 2147483647, %v2669_v23  ;;  %v2771_v29 = vand.u32 2147483647, %v2763_v5 }
 0x280   :  { %v2566_v10 = vadd.f32 %v2558_v50, %v2518_v30  ;;  %v2612_v49 = vadd.f32 %v2604_v44, %v2564_v52  ;;  %v1010_v16 = vpop.f32.mrf.mxu0  ;;  %v2678_v30 = vand.u32 2147483647, %v2670_v32 }
 0x281   :  { %v2651_v42 = vmul.f32 %v2643_v56, %v1010_v16  ;;  %v2685_v9 = vsub.f32 1.0, %v2677_v62  ;;  %v2779_v16 = vsub.f32 1.0, %v2771_v29  ;;  %v2828_v29 = vsub.f32 1.0, %v2820_v61 }
 0x282   :  { %v2686_v24 = vsub.f32 1.0, %v2678_v30  ;;  %v2859_v30 = vsub.f32 31.0, %v3460_v17  ;;  %v2860_v17 = vsub.f32 31.0, %v3466_v38 }
 0x283   :  { %v2659_v63 = vadd.f32 %v2651_v42, %v2611_v6  ;;  %v2717_v6 = vsub.f32 28.0, %v3429_v58  ;;  %v2787_v32 = vmax.f32 %v2779_v16, 0.0 }
 0x284   :  { %v1233_v46 = vpop.f32.mrf.mxu2  ;;  %v2694_v42 = vmax.f32 %v2686_v24, 0.0 }
 0x285   :  { %v2605_v22 = vmul.f32 %v2597_v40, %v1233_v46  ;;  %v1346_v3 = vpop.f32.mrf.mxu3  ;;  %v1123_v41 = vpop.f32.mrf.mxu1  ;;  %v2726_v40 = vand.u32 2147483647, %v2718_v31 }
 0x286   :  { %v2606_v51 = vmul.f32 %v2598_v12, %v1346_v3  ;;  %v2652_v55 = vmul.f32 %v2644_v54, %v1123_v41  ;;  %v2819_v3 = vand.u32 2147483647, %v2811_v14 }
 0x287   :  { %v2613_v7 = vadd.f32 %v2605_v22, %v2565_v25  ;;  %v2693_v25 = vmax.f32 %v2685_v9, 0.0  ;;  %v2734_v22 = vsub.f32 1.0, %v2726_v40 }
 0x288   :  { %v2614_v36 = vadd.f32 %v2606_v51, %v2566_v10  ;;  %v2660_v53 = vadd.f32 %v2652_v55, %v2612_v49  ;;  %v1013_v2 = vpop.f32.mrf.mxu0  ;;  %v2725_v10 = vand.u32 2147483647, %v2717_v6  ;;  %v2827_v62 = vsub.f32 1.0, %v2819_v3 }
 0x289   :  { %v2699_v52 = vmul.f32 %v2691_v15, %v1013_v2 }
 0x28a   :  { %v2733_v54 = vsub.f32 1.0, %v2725_v10  ;;  %v2835_v6 = vmax.f32 %v2827_v62, 0.0  ;;  %v2836_v10 = vmax.f32 %v2828_v29, 0.0 }
 0x28b   :  { %v2707_v13 = vadd.f32 %v2699_v52, %v2659_v63  ;;  %v2766_v63 = vsub.f32 29.0, %v3452_v28  ;;  %v2742_v52 = vmax.f32 %v2734_v22, 0.0 }
 0x28c   :  { %v1236_v35 = vpop.f32.mrf.mxu2  ;;  %v2741_v2 = vmax.f32 %v2733_v54, 0.0 }
 0x28d   :  { %v2653_v26 = vmul.f32 %v2645_v19, %v1236_v35  ;;  %v1349_v47 = vpop.f32.mrf.mxu3  ;;  %v1126_v48 = vpop.f32.mrf.mxu1  ;;  %v2788_v19 = vmax.f32 %v2780_v20, 0.0 }
 0x28e   :  { %v2654_v21 = vmul.f32 %v2646_v8, %v1349_v47  ;;  %v2700_v56 = vmul.f32 %v2692_v43, %v1126_v48  ;;  %v2814_v47 = vsub.f32 30.0, %v3452_v28 }
 0x28f   :  { %v2661_v50 = vadd.f32 %v2653_v26, %v2613_v7  ;;  %v2773_v7 = vand.u32 2147483647, %v2765_v1  ;;  %v2867_v26 = vand.u32 2147483647, %v2859_v30 }
 0x290   :  { %v2662_v44 = vadd.f32 %v2654_v21, %v2614_v36  ;;  %v2708_v18 = vadd.f32 %v2700_v56, %v2660_v53  ;;  %v1016_v11 = vpop.f32.mrf.mxu0  ;;  %v2774_v36 = vand.u32 2147483647, %v2766_v63 }
 0x291   :  { %v2747_v49 = vmul.f32 %v2739_v59, %v1016_v11  ;;  %v2781_v43 = vsub.f32 1.0, %v2773_v7  ;;  %v2822_v11 = vand.u32 2147483647, %v2814_v47 }
 0x292   :  { %v2782_v45 = vsub.f32 1.0, %v2774_v36 }
 0x293   :  { %v2755_v4 = vadd.f32 %v2747_v49, %v2707_v13  ;;  %v2813_v13 = vsub.f32 30.0, %v3429_v58  ;;  %v2868_v49 = vand.u32 2147483647, %v2860_v17  ;;  %v2830_v38 = vsub.f32 1.0, %v2822_v11 }
 0x294   :  { %v1239_v12 = vpop.f32.mrf.mxu2 }
 0x295   :  { %v2701_v46 = vmul.f32 %v2693_v25, %v1239_v12  ;;  %v1352_v39 = vpop.f32.mrf.mxu3  ;;  %v1129_v23 = vpop.f32.mrf.mxu1  ;;  %v2821_v60 = vand.u32 2147483647, %v2813_v13  ;;  %v2790_v25 = vmax.f32 %v2782_v45, 0.0  ;;  %v2861_v12 = vsub.f32 31.0, %v3429_v58 }
 0x296   :  { %v2702_v41 = vmul.f32 %v2694_v42, %v1352_v39  ;;  %v2748_v15 = vmul.f32 %v2740_v0, %v1129_v23  ;;  %v2876_v63 = vsub.f32 1.0, %v2868_v49  ;;  %v2838_v20 = vmax.f32 %v2830_v38, 0.0 }
 0x297   :  { %v2709_v51 = vadd.f32 %v2701_v46, %v2661_v50  ;;  %v2829_v14 = vsub.f32 1.0, %v2821_v60  ;;  %v2862_v46 = vsub.f32 31.0, %v3452_v28 }
 0x298   :  { %v2710_v55 = vadd.f32 %v2702_v41, %v2662_v44  ;;  %v2756_v34 = vadd.f32 %v2748_v15, %v2708_v18  ;;  %v1019_v27 = vpop.f32.mrf.mxu0  ;;  %v2789_v44 = vmax.f32 %v2781_v43, 0.0  ;;  %v2875_v18 = vsub.f32 1.0, %v2867_v26 }
 0x299   :  { %v2795_v53 = vmul.f32 %v2787_v32, %v1019_v27  ;;  %v2837_v41 = vmax.f32 %v2829_v14, 0.0  ;;  %v2869_v15 = vand.u32 2147483647, %v2861_v12  ;;  %v2884_v57 = vmax.f32 %v2876_v63, 0.0 }
 0x29b   :  { %v2803_v5 = vadd.f32 %v2795_v53, %v2755_v4  ;;  %v2883_v4 = vmax.f32 %v2875_v18, 0.0  ;;  %v2877_v36 = vsub.f32 1.0, %v2869_v15 }
 0x29c   :  { %v1242_v8 = vpop.f32.mrf.mxu2 }
 0x29d   :  { %v2749_v35 = vmul.f32 %v2741_v2, %v1242_v8  ;;  %v1355_v9 = vpop.f32.mrf.mxu3  ;;  %v1132_v24 = vpop.f32.mrf.mxu1 }
 0x29e   :  { %v2750_v48 = vmul.f32 %v2742_v52, %v1355_v9  ;;  %v2796_v59 = vmul.f32 %v2788_v19, %v1132_v24  ;;  %v2885_v19 = vmax.f32 %v2877_v36, 0.0 }
 0x29f   :  { %v2757_v31 = vadd.f32 %v2749_v35, %v2709_v51  ;;  %v2870_v51 = vand.u32 2147483647, %v2862_v46 }
 0x2a0   :  { %v2758_v21 = vadd.f32 %v2750_v48, %v2710_v55  ;;  %v2804_v56 = vadd.f32 %v2796_v59, %v2756_v34  ;;  %v1022_v37 = vpop.f32.mrf.mxu0 }
 0x2a1   :  { %v2843_v50 = vmul.f32 %v2835_v6, %v1022_v37  ;;  %v2878_v28 = vsub.f32 1.0, %v2870_v51 }
 0x2a3   :  { %v2851_v16 = vadd.f32 %v2843_v50, %v2803_v5  ;;  %v2886_v61 = vmax.f32 %v2878_v28, 0.0 }
 0x2a4   :  { %v1245_v40 = vpop.f32.mrf.mxu2 }
 0x2a5   :  { %v2797_v42 = vmul.f32 %v2789_v44, %v1245_v40  ;;  %v1358_v0 = vpop.f32.mrf.mxu3  ;;  %v1135_v33 = vpop.f32.mrf.mxu1 }
 0x2a6   :  { %v2798_v54 = vmul.f32 %v2790_v25, %v1358_v0  ;;  %v2844_v1 = vmul.f32 %v2836_v10, %v1135_v33 }
 0x2a7   :  { %v2805_v39 = vadd.f32 %v2797_v42, %v2757_v31 }
 0x2a8   :  { %v2806_v23 = vadd.f32 %v2798_v54, %v2758_v21  ;;  %v2852_v32 = vadd.f32 %v2844_v1, %v2804_v56  ;;  %v1025_v22 = vpop.f32.mrf.mxu0 }
 0x2a9   :  { %v2891_v3 = vmul.f32 %v2883_v4, %v1025_v22 }
 0x2ab   :  { %v2899_v55 = vadd.f32 %v2891_v3, %v2851_v16 }
 0x2ac   :  { %v1248_v34 = vpop.f32.mrf.mxu2 }
 0x2ad   :  { %2907 = vst [vmem:[#allocation7 + $0x20] sm:$0xff] %v2899_v55  ;;  %v2845_v27 = vmul.f32 %v2837_v41, %v1248_v34  ;;  %v1361_v58 = vpop.f32.mrf.mxu3  ;;  %v1138_v7 = vpop.f32.mrf.mxu1 }
 0x2ae   :  { %v2846_v53 = vmul.f32 %v2838_v20, %v1361_v58  ;;  %v2892_v2 = vmul.f32 %v2884_v57, %v1138_v7 }
 0x2af   :  { %v2853_v62 = vadd.f32 %v2845_v27, %v2805_v39 }
 0x2b0   :  { %v2854_v30 = vadd.f32 %v2846_v53, %v2806_v23  ;;  %v2900_v52 = vadd.f32 %v2892_v2, %v2852_v32 }
 0x2b2   :  { %2908 = vst [vmem:[#allocation7 + $0x28] sm:$0xff] %v2900_v52 }
 0x2b4   :  { %v1251_v5 = vpop.f32.mrf.mxu2 }
 0x2b5   :  { %v2893_v8 = vmul.f32 %v2885_v19, %v1251_v5  ;;  %v1364_v43 = vpop.f32.mrf.mxu3 }
 0x2b6   :  { %v2894_v45 = vmul.f32 %v2886_v61, %v1364_v43 }
 0x2b7   :  { %v2901_v13 = vadd.f32 %v2893_v8, %v2853_v62 }
 0x2b8   :  { %v2902_v35 = vadd.f32 %v2894_v45, %v2854_v30 }
 0x2b9   :  { %2909 = vst [vmem:[#allocation7 + $0x30] sm:$0xff] %v2901_v13 }
 0x2ba   :  { %2910 = vst [vmem:[#allocation7 + $0x38] sm:$0xff] %v2902_v35 }
 0x2bb   :  { %2921 = dma.vmem_to_hbm [thread:$0]  %s2917_s23, 1024, %s2919_s26, [#allocation4]  }
 0x2bc   :  { %3289 = dma.done.wait [#allocation4], 1024  }
 0x2bd   :  { %3290 = vsyncadd [#allocation4], 4294966272 }
 0x2be   :  { %2926 = vsyncpa [#allocation3], 1 }
 0x2bf   :  { %2927 = vsyncpa [#allocation4], 1 }
 0x2c0   :  { %2928 = vsyncpa [#allocation5], 1 }

</bundles_post_ra>
